<compile_context>
chip_gen: v5e
topology: v5e:2x2
jax: 0.10.0
libtpu: 0.0.40
codegen_flags: <defaults>
</compile_context>

<pallas_src>
import jax
import jax.numpy as jnp
from jax.experimental import pallas as pl
from jax.experimental.pallas import tpu as pltpu

SOS_token = 0
_NEG_INF = -1e30


# --------------------------------------------------------------------------
# Fused encoder + policy + decoder kernel (runs once, no grid)
# --------------------------------------------------------------------------
def seq2seq_kernel(in_ids_ref, tgt_ids_ref, db_ref, bs_ref,
                   enc_wfused_ref, enc_whh_ref, enc_bhh_ref,
                   pol_wh_ref, pol_wdb_ref, pol_wbs_ref, pol_b_ref,
                   dec_wfused_ref, dec_whh_ref, dec_bhh_ref,
                   dec_wout_ref, dec_bout_ref,
                   proba_ref):
    f32 = jnp.float32
    B = db_ref.shape[0]
    T_in = in_ids_ref.shape[1]
    T_out = tgt_ids_ref.shape[1]
    He = enc_whh_ref.shape[0]                 # padded encoder hidden
    Hd = dec_whh_ref.shape[0]                 # padded decoder hidden

    def token_gi(tokens, wfused_ref):
        """tokens: Python list (time-major, len T*B) of int32 SMEM scalars or
        Python ints.  Builds the one-hot matrix with iota/select ops only and
        does ONE MXU matmul against the fused embedding+input-projection table
        (bias already folded into the table rows)."""
        n = len(tokens)
        V = wfused_ref.shape[0]
        row = jax.lax.broadcasted_iota(jnp.int32, (n, 1), 0)
        ids = jnp.zeros((n, 1), jnp.int32)
        for i, tok in enumerate(tokens):
            ids = jnp.where(row == i, tok, ids)
        onehot = (jax.lax.broadcasted_iota(jnp.int32, (n, V), 1)
                  == ids).astype(f32)                               # [n, V]
        return jnp.dot(onehot, wfused_ref[...],
                       preferred_element_type=f32)                  # [n, 3H]

    def gru_step(gi_t, h, whh, bhh, H):
        # PyTorch GRU gate order (r, z, n); gate boundaries are 128-aligned
        # because H is padded to a multiple of 128.
        gh = jnp.dot(h, whh, preferred_element_type=f32) + bhh
        rz = jax.nn.sigmoid(gi_t[:, :2 * H] + gh[:, :2 * H])   # one EUP stream
        r, z = rz[:, :H], rz[:, H:]
        cand = jnp.tanh(gi_t[:, 2 * H:] + r * gh[:, 2 * H:])
        return (1.0 - z) * cand + z * h

    # ---- DefaultPolicy, encoder-independent part (hoisted off serial path) --
    # TODO(synk): DefaultPolicy source not provided; reconstructed as
    # tanh(W_h h + W_db db + W_bs bs + b).
    pol_ctx = (jnp.dot(db_ref[...], pol_wdb_ref[...], preferred_element_type=f32)
               + jnp.dot(bs_ref[...], pol_wbs_ref[...], preferred_element_type=f32)
               + pol_b_ref[...])

    # ---- EncoderRNN (dropout = identity, all lengths == seq_len) -----------
    enc_tokens = [in_ids_ref[b, t] for t in range(T_in) for b in range(B)]
    enc_gi = token_gi(enc_tokens, enc_wfused_ref)               # [T_in*B, 3He]
    enc_whh, enc_bhh = enc_whh_ref[...], enc_bhh_ref[...]
    h = jnp.zeros((B, He), f32)
    for t in range(T_in):                      # short, fully unrolled
        h = gru_step(enc_gi[t * B:(t + 1) * B, :], h, enc_whh, enc_bhh, He)

    # ---- DefaultPolicy: only h @ W_h is left on the serial path ------------
    h = jnp.tanh(jnp.dot(h, pol_wh_ref[...], preferred_element_type=f32)
                 + pol_ctx)

    # ---- DecoderRNN (full teacher forcing; SOS shift built in-kernel) ------
    dec_tokens = [SOS_token if t == 0 else tgt_ids_ref[b, t - 1]
                  for t in range(T_out) for b in range(B)]
    dec_gi = token_gi(dec_tokens, dec_wfused_ref)               # [T_out*B, 3Hd]
    dec_whh, dec_bhh = dec_whh_ref[...], dec_bhh_ref[...]
    hs = []
    for t in range(T_out):
        h = gru_step(dec_gi[t * B:(t + 1) * B, :], h, dec_whh, dec_bhh, Hd)
        hs.append(h)                            # stays in registers (no scratch)

    # ---- Batch-major stack of hidden states, register-resident -------------
    # row r = b*T_out + t  <-  hs[t][b, :]   (iota-masked selects, no relayout)
    rowi = jax.lax.broadcasted_iota(jnp.int32, (B * T_out, 1), 0)
    hs2d = jnp.zeros((B * T_out, Hd), f32)
    for b in range(B):
        for t in range(T_out):
            hs2d = jnp.where(rowi == (b * T_out + t), hs[t][b:b + 1, :], hs2d)

    # ---- Output projection + log_softmax for ALL steps ----------------------
    logits = (jnp.dot(hs2d, dec_wout_ref[...], preferred_element_type=f32)
              + dec_bout_ref[...])                              # [B*T_out, Vp]
    m = jnp.max(logits, axis=-1, keepdims=True)
    shifted = logits - m
    logp = shifted - jnp.log(jnp.sum(jnp.exp(shifted), axis=-1, keepdims=True))
    proba_ref[...] = logp          # one contiguous lane-dense store


# --------------------------------------------------------------------------
# Parameter init: deterministic uniform, pre-padded / pre-fused layouts
# --------------------------------------------------------------------------
def _round_up(x, m):
    return ((x + m - 1) // m) * m


def _pad_to(x, shape, fill=0.0):
    pads = [(0, s - d) for d, s in zip(x.shape, shape)]
    return jnp.pad(x, pads, constant_values=fill)


def _uniform(key, shape, fan):
    s = 1.0 / jnp.sqrt(jnp.float32(fan))
    return jax.random.uniform(key, shape, jnp.float32, -s, s)


def _gru_params(key, in_dim, hid, hid_pad):
    """GRU weights stored transposed ([in, 3H]) in gate order r,z,n, each gate
    block zero-padded to hid_pad so gate splits land on 128-lane boundaries."""
    k = jax.random.split(key, 4)
    wih = _uniform(k[0], (in_dim, 3 * hid), hid)
    whh = _uniform(k[1], (hid, 3 * hid), hid)
    bih = _uniform(k[2], (1, 3 * hid), hid)
    bhh = _uniform(k[3], (1, 3 * hid), hid)

    def pad_gates(w):
        parts = [_pad_to(w[..., g * hid:(g + 1) * hid],
                         w.shape[:-1] + (hid_pad,)) for g in range(3)]
        return jnp.concatenate(parts, axis=-1)

    return (pad_gates(wih),
            _pad_to(pad_gates(whh), (hid_pad, 3 * hid_pad)),
            pad_gates(bih),
            pad_gates(bhh))


def init_params(key, vocab_in, vocab_out, emb, hid_enc, hid_dec, hid_pol,
                db_size, bs_size):
    assert hid_pol == hid_dec, "policy output feeds decoder hidden state"
    He = _round_up(hid_enc, 128)
    Hd = _round_up(hid_dec, 128)
    Vp = _round_up(vocab_out, 128)
    keys = jax.random.split(key, 12)
    p = {}

    # embeddings (padding_idx=3 row zeroed)
    enc_emb = (jax.random.normal(keys[0], (vocab_in, emb), jnp.float32)
               * 0.1).at[3].set(0.0)
    dec_emb = (jax.random.normal(keys[1], (vocab_out, emb), jnp.float32)
               * 0.1).at[3].set(0.0)

    enc_wih, enc_whh, enc_bih, enc_bhh = _gru_params(keys[2], emb, hid_enc, He)
    dec_wih, dec_whh, dec_bih, dec_bhh = _gru_params(keys[3], emb, hid_dec, Hd)

    # Fused embedding + input-projection tables with b_ih folded in:
    # one-hot rows sum to exactly 1, so onehot @ (E@W_ih + b_ih) == emb@W_ih + b_ih.
    p['enc_wfused'] = jnp.dot(enc_emb, enc_wih) + enc_bih     # [V_in, 3He]
    p['dec_wfused'] = jnp.dot(dec_emb, dec_wih) + dec_bih     # [V_out, 3Hd]
    p['enc_whh'], p['enc_bhh'] = enc_whh, enc_bhh
    p['dec_whh'], p['dec_bhh'] = dec_whh, dec_bhh

    # DefaultPolicy (reconstructed): three Linear projections, biases summed.
    p['pol_wh'] = _pad_to(_uniform(keys[4], (hid_enc, hid_pol), hid_enc), (He, Hd))
    p['pol_wdb'] = _pad_to(_uniform(keys[5], (db_size, hid_pol), db_size),
                           (db_size, Hd))
    p['pol_wbs'] = _pad_to(_uniform(keys[6], (bs_size, hid_pol), bs_size),
                           (bs_size, Hd))
    pol_b = (_uniform(keys[7], (1, hid_pol), hid_enc)
             + _uniform(keys[8], (1, hid_pol), db_size)
             + _uniform(keys[9], (1, hid_pol), bs_size))
    p['pol_b'] = _pad_to(pol_b, (1, Hd))

    # decoder output Linear; padded vocab columns get a -1e30 bias so the
    # in-kernel log_softmax over the padded lane width is exact.
    p['dec_wout'] = _pad_to(_uniform(keys[10], (hid_dec, vocab_out), hid_dec),
                            (Hd, Vp))
    p['dec_bout'] = _pad_to(_uniform(keys[11], (1, vocab_out), hid_dec),
                            (1, Vp), fill=_NEG_INF)
    return p


# --------------------------------------------------------------------------
# Model.forward equivalent (single fused pallas_call, no surrounding XLA ops
# except a free leading-dim reshape and the tiny vocab un-pad slice)
# --------------------------------------------------------------------------
def model_forward(params, input_tokens, target_tokens, db, bs):
    """input_tokens [B,T_in] int32, target_tokens [B,T_out] int32,
    db [B,db_size] f32, bs [B,bs_size] f32.
    Returns proba [B, T_out, V]: per-step log-probabilities (teacher forcing).
    (Model.forward returns (proba, None, None); encoder_outputs are only
    needed by the attention decoder, which is disabled here.)"""
    B, T_in = input_tokens.shape
    _, T_out = target_tokens.shape
    V_out = params['dec_wfused'].shape[0]
    V_pad = params['dec_wout'].shape[1]

    smem = pl.BlockSpec(memory_space=pltpu.MemorySpace.SMEM)
    vmem = pl.BlockSpec(memory_space=pltpu.MemorySpace.VMEM)

    logp = pl.pallas_call(
        seq2seq_kernel,
        out_shape=jax.ShapeDtypeStruct((B * T_out, V_pad), jnp.float32),
        in_specs=[smem, smem] + [vmem] * 14,
        out_specs=vmem,
    )(input_tokens.astype(jnp.int32), target_tokens.astype(jnp.int32),
      db.astype(jnp.float32), bs.astype(jnp.float32),
      params['enc_wfused'], params['enc_whh'], params['enc_bhh'],
      params['pol_wh'], params['pol_wdb'], params['pol_wbs'], params['pol_b'],
      params['dec_wfused'], params['dec_whh'], params['dec_bhh'],
      params['dec_wout'], params['dec_bout'])

    # free leading-dim reshape + tiny vocab un-pad (padded entries are ~ -1e30)
    return logp.reshape(B, T_out, V_pad)[:, :, :V_out]


if __name__ == "__main__":
    B, T_IN, T_OUT = 2, 8, 6
    VOCAB = 64          # len(input_lang_index2word) == len(output_lang_index2word)
    EMB, HID = 16, 32   # emb_size, hid_size_enc == hid_size_dec == hid_size_pol
    DB, BS = 8, 8       # db_size, bs_size

    key = jax.random.PRNGKey(0)
    k_in, k_tgt, k_db, k_bs, k_par = jax.random.split(key, 5)
    params = init_params(k_par, VOCAB, VOCAB, EMB, HID, HID, HID, DB, BS)

    input_tokens = jax.random.randint(k_in, (B, T_IN), 0, VOCAB, dtype=jnp.int32)
    target_tokens = jax.random.randint(k_tgt, (B, T_OUT), 0, VOCAB, dtype=jnp.int32)
    db_tensor = jax.random.normal(k_db, (B, DB), jnp.float32)
    bs_tensor = jax.random.normal(k_bs, (B, BS), jnp.float32)

    proba = jax.jit(model_forward)(
        params, input_tokens, target_tokens, db_tensor, bs_tensor)
    jax.block_until_ready(proba)

    assert proba.shape == (B, T_OUT, VOCAB)
    # log_softmax sanity: each row exponentiates to ~1
    row_sums = jnp.exp(proba).sum(-1)
    assert bool(jnp.all(jnp.abs(row_sums - 1.0) < 1e-4))
    print("KERNEL_OK")
</pallas_src>

<mosaic_0001>
module attributes {stable_mosaic.version = 11 : i64} {
  func.func @seq2seq_kernel(%arg0: memref<2x8xi32, #tpu.memory_space<smem>>, %arg1: memref<2x6xi32, #tpu.memory_space<smem>>, %arg2: memref<2x8xf32, #tpu.memory_space<vmem>>, %arg3: memref<2x8xf32, #tpu.memory_space<vmem>>, %arg4: memref<64x384xf32, #tpu.memory_space<vmem>>, %arg5: memref<128x384xf32, #tpu.memory_space<vmem>>, %arg6: memref<1x384xf32, #tpu.memory_space<vmem>>, %arg7: memref<128x128xf32, #tpu.memory_space<vmem>>, %arg8: memref<8x128xf32, #tpu.memory_space<vmem>>, %arg9: memref<8x128xf32, #tpu.memory_space<vmem>>, %arg10: memref<1x128xf32, #tpu.memory_space<vmem>>, %arg11: memref<64x384xf32, #tpu.memory_space<vmem>>, %arg12: memref<128x384xf32, #tpu.memory_space<vmem>>, %arg13: memref<1x384xf32, #tpu.memory_space<vmem>>, %arg14: memref<128x128xf32, #tpu.memory_space<vmem>>, %arg15: memref<1x128xf32, #tpu.memory_space<vmem>>, %arg16: memref<12x128xf32, #tpu.memory_space<vmem>>) attributes {dimension_semantics = [], scalar_prefetch = 0 : i64, scratch_operands = 0 : i64, tpu.core_type = #tpu.core_type<tc>} {
    %c0 = arith.constant 0 : index
    %c0_0 = arith.constant 0 : index
    %0 = vector.load %arg2[%c0, %c0_0] : memref<2x8xf32, #tpu.memory_space<vmem>>, vector<2x8xf32>
    %c0_1 = arith.constant 0 : index
    %c0_2 = arith.constant 0 : index
    %1 = vector.load %arg8[%c0_1, %c0_2] : memref<8x128xf32, #tpu.memory_space<vmem>>, vector<8x128xf32>
    %cst = arith.constant dense<0.000000e+00> : vector<2x128xf32>
    %2 = tpu.matmul %0, %1, %cst {dimension_numbers = #tpu.dot_dimension_numbers<[1], [0], [0], [1], [0, 0, 1, 1], [], []>} : vector<2x8xf32>, vector<8x128xf32>, vector<2x128xf32> -> vector<2x128xf32>
    %c0_3 = arith.constant 0 : index
    %c0_4 = arith.constant 0 : index
    %3 = vector.load %arg3[%c0_3, %c0_4] : memref<2x8xf32, #tpu.memory_space<vmem>>, vector<2x8xf32>
    %c0_5 = arith.constant 0 : index
    %c0_6 = arith.constant 0 : index
    %4 = vector.load %arg9[%c0_5, %c0_6] : memref<8x128xf32, #tpu.memory_space<vmem>>, vector<8x128xf32>
    %cst_7 = arith.constant dense<0.000000e+00> : vector<2x128xf32>
    %5 = tpu.matmul %3, %4, %cst_7 {dimension_numbers = #tpu.dot_dimension_numbers<[1], [0], [0], [1], [0, 0, 1, 1], [], []>} : vector<2x8xf32>, vector<8x128xf32>, vector<2x128xf32> -> vector<2x128xf32>
    %6 = arith.addf %2, %5 : vector<2x128xf32>
    %c0_8 = arith.constant 0 : index
    %c0_9 = arith.constant 0 : index
    %7 = vector.load %arg10[%c0_8, %c0_9] : memref<1x128xf32, #tpu.memory_space<vmem>>, vector<1x128xf32>
    %8 = vector.broadcast %7 : vector<1x128xf32> to vector<2x128xf32>
    %9 = arith.addf %6, %8 : vector<2x128xf32>
    %c0_10 = arith.constant 0 : index
    %c0_11 = arith.constant 0 : index
    %10 = memref.load %arg0[%c0_10, %c0_11] : memref<2x8xi32, #tpu.memory_space<smem>>
    %c1 = arith.constant 1 : index
    %c0_12 = arith.constant 0 : index
    %11 = memref.load %arg0[%c1, %c0_12] : memref<2x8xi32, #tpu.memory_space<smem>>
    %c0_13 = arith.constant 0 : index
    %c1_14 = arith.constant 1 : index
    %12 = memref.load %arg0[%c0_13, %c1_14] : memref<2x8xi32, #tpu.memory_space<smem>>
    %c1_15 = arith.constant 1 : index
    %c1_16 = arith.constant 1 : index
    %13 = memref.load %arg0[%c1_15, %c1_16] : memref<2x8xi32, #tpu.memory_space<smem>>
    %c0_17 = arith.constant 0 : index
    %c2 = arith.constant 2 : index
    %14 = memref.load %arg0[%c0_17, %c2] : memref<2x8xi32, #tpu.memory_space<smem>>
    %c1_18 = arith.constant 1 : index
    %c2_19 = arith.constant 2 : index
    %15 = memref.load %arg0[%c1_18, %c2_19] : memref<2x8xi32, #tpu.memory_space<smem>>
    %c0_20 = arith.constant 0 : index
    %c3 = arith.constant 3 : index
    %16 = memref.load %arg0[%c0_20, %c3] : memref<2x8xi32, #tpu.memory_space<smem>>
    %c1_21 = arith.constant 1 : index
    %c3_22 = arith.constant 3 : index
    %17 = memref.load %arg0[%c1_21, %c3_22] : memref<2x8xi32, #tpu.memory_space<smem>>
    %c0_23 = arith.constant 0 : index
    %c4 = arith.constant 4 : index
    %18 = memref.load %arg0[%c0_23, %c4] : memref<2x8xi32, #tpu.memory_space<smem>>
    %c1_24 = arith.constant 1 : index
    %c4_25 = arith.constant 4 : index
    %19 = memref.load %arg0[%c1_24, %c4_25] : memref<2x8xi32, #tpu.memory_space<smem>>
    %c0_26 = arith.constant 0 : index
    %c5 = arith.constant 5 : index
    %20 = memref.load %arg0[%c0_26, %c5] : memref<2x8xi32, #tpu.memory_space<smem>>
    %c1_27 = arith.constant 1 : index
    %c5_28 = arith.constant 5 : index
    %21 = memref.load %arg0[%c1_27, %c5_28] : memref<2x8xi32, #tpu.memory_space<smem>>
    %c0_29 = arith.constant 0 : index
    %c6 = arith.constant 6 : index
    %22 = memref.load %arg0[%c0_29, %c6] : memref<2x8xi32, #tpu.memory_space<smem>>
    %c1_30 = arith.constant 1 : index
    %c6_31 = arith.constant 6 : index
    %23 = memref.load %arg0[%c1_30, %c6_31] : memref<2x8xi32, #tpu.memory_space<smem>>
    %c0_32 = arith.constant 0 : index
    %c7 = arith.constant 7 : index
    %24 = memref.load %arg0[%c0_32, %c7] : memref<2x8xi32, #tpu.memory_space<smem>>
    %c1_33 = arith.constant 1 : index
    %c7_34 = arith.constant 7 : index
    %25 = memref.load %arg0[%c1_33, %c7_34] : memref<2x8xi32, #tpu.memory_space<smem>>
    %26 = tpu.iota {dimensions = array<i32: 0>} : vector<16x1xi32>
    %c0_i32 = arith.constant 0 : i32
    %27 = vector.broadcast %c0_i32 : i32 to vector<16x1xi32>
    %c0_i32_35 = arith.constant 0 : i32
    %28 = vector.broadcast %c0_i32_35 : i32 to vector<16x1xi32>
    %29 = arith.cmpi eq, %26, %28 : vector<16x1xi32>
    %30 = vector.broadcast %10 : i32 to vector<16x1xi32>
    %31 = arith.select %29, %30, %27 : vector<16x1xi1>, vector<16x1xi32>
    %c1_i32 = arith.constant 1 : i32
    %32 = vector.broadcast %c1_i32 : i32 to vector<16x1xi32>
    %33 = arith.cmpi eq, %26, %32 : vector<16x1xi32>
    %34 = vector.broadcast %11 : i32 to vector<16x1xi32>
    %35 = arith.select %33, %34, %31 : vector<16x1xi1>, vector<16x1xi32>
    %c2_i32 = arith.constant 2 : i32
    %36 = vector.broadcast %c2_i32 : i32 to vector<16x1xi32>
    %37 = arith.cmpi eq, %26, %36 : vector<16x1xi32>
    %38 = vector.broadcast %12 : i32 to vector<16x1xi32>
    %39 = arith.select %37, %38, %35 : vector<16x1xi1>, vector<16x1xi32>
    %c3_i32 = arith.constant 3 : i32
    %40 = vector.broadcast %c3_i32 : i32 to vector<16x1xi32>
    %41 = arith.cmpi eq, %26, %40 : vector<16x1xi32>
    %42 = vector.broadcast %13 : i32 to vector<16x1xi32>
    %43 = arith.select %41, %42, %39 : vector<16x1xi1>, vector<16x1xi32>
    %c4_i32 = arith.constant 4 : i32
    %44 = vector.broadcast %c4_i32 : i32 to vector<16x1xi32>
    %45 = arith.cmpi eq, %26, %44 : vector<16x1xi32>
    %46 = vector.broadcast %14 : i32 to vector<16x1xi32>
    %47 = arith.select %45, %46, %43 : vector<16x1xi1>, vector<16x1xi32>
    %c5_i32 = arith.constant 5 : i32
    %48 = vector.broadcast %c5_i32 : i32 to vector<16x1xi32>
    %49 = arith.cmpi eq, %26, %48 : vector<16x1xi32>
    %50 = vector.broadcast %15 : i32 to vector<16x1xi32>
    %51 = arith.select %49, %50, %47 : vector<16x1xi1>, vector<16x1xi32>
    %c6_i32 = arith.constant 6 : i32
    %52 = vector.broadcast %c6_i32 : i32 to vector<16x1xi32>
    %53 = arith.cmpi eq, %26, %52 : vector<16x1xi32>
    %54 = vector.broadcast %16 : i32 to vector<16x1xi32>
    %55 = arith.select %53, %54, %51 : vector<16x1xi1>, vector<16x1xi32>
    %c7_i32 = arith.constant 7 : i32
    %56 = vector.broadcast %c7_i32 : i32 to vector<16x1xi32>
    %57 = arith.cmpi eq, %26, %56 : vector<16x1xi32>
    %58 = vector.broadcast %17 : i32 to vector<16x1xi32>
    %59 = arith.select %57, %58, %55 : vector<16x1xi1>, vector<16x1xi32>
    %c8_i32 = arith.constant 8 : i32
    %60 = vector.broadcast %c8_i32 : i32 to vector<16x1xi32>
    %61 = arith.cmpi eq, %26, %60 : vector<16x1xi32>
    %62 = vector.broadcast %18 : i32 to vector<16x1xi32>
    %63 = arith.select %61, %62, %59 : vector<16x1xi1>, vector<16x1xi32>
    %c9_i32 = arith.constant 9 : i32
    %64 = vector.broadcast %c9_i32 : i32 to vector<16x1xi32>
    %65 = arith.cmpi eq, %26, %64 : vector<16x1xi32>
    %66 = vector.broadcast %19 : i32 to vector<16x1xi32>
    %67 = arith.select %65, %66, %63 : vector<16x1xi1>, vector<16x1xi32>
    %c10_i32 = arith.constant 10 : i32
    %68 = vector.broadcast %c10_i32 : i32 to vector<16x1xi32>
    %69 = arith.cmpi eq, %26, %68 : vector<16x1xi32>
    %70 = vector.broadcast %20 : i32 to vector<16x1xi32>
    %71 = arith.select %69, %70, %67 : vector<16x1xi1>, vector<16x1xi32>
    %c11_i32 = arith.constant 11 : i32
    %72 = vector.broadcast %c11_i32 : i32 to vector<16x1xi32>
    %73 = arith.cmpi eq, %26, %72 : vector<16x1xi32>
    %74 = vector.broadcast %21 : i32 to vector<16x1xi32>
    %75 = arith.select %73, %74, %71 : vector<16x1xi1>, vector<16x1xi32>
    %c12_i32 = arith.constant 12 : i32
    %76 = vector.broadcast %c12_i32 : i32 to vector<16x1xi32>
    %77 = arith.cmpi eq, %26, %76 : vector<16x1xi32>
    %78 = vector.broadcast %22 : i32 to vector<16x1xi32>
    %79 = arith.select %77, %78, %75 : vector<16x1xi1>, vector<16x1xi32>
    %c13_i32 = arith.constant 13 : i32
    %80 = vector.broadcast %c13_i32 : i32 to vector<16x1xi32>
    %81 = arith.cmpi eq, %26, %80 : vector<16x1xi32>
    %82 = vector.broadcast %23 : i32 to vector<16x1xi32>
    %83 = arith.select %81, %82, %79 : vector<16x1xi1>, vector<16x1xi32>
    %c14_i32 = arith.constant 14 : i32
    %84 = vector.broadcast %c14_i32 : i32 to vector<16x1xi32>
    %85 = arith.cmpi eq, %26, %84 : vector<16x1xi32>
    %86 = vector.broadcast %24 : i32 to vector<16x1xi32>
    %87 = arith.select %85, %86, %83 : vector<16x1xi1>, vector<16x1xi32>
    %c15_i32 = arith.constant 15 : i32
    %88 = vector.broadcast %c15_i32 : i32 to vector<16x1xi32>
    %89 = arith.cmpi eq, %26, %88 : vector<16x1xi32>
    %90 = vector.broadcast %25 : i32 to vector<16x1xi32>
    %91 = arith.select %89, %90, %87 : vector<16x1xi1>, vector<16x1xi32>
    %92 = tpu.iota {dimensions = array<i32: 1>} : vector<16x64xi32>
    %93 = vector.broadcast %91 : vector<16x1xi32> to vector<16x64xi32>
    %94 = arith.cmpi eq, %92, %93 : vector<16x64xi32>
    %95 = arith.extui %94 : vector<16x64xi1> to vector<16x64xi32>
    %96 = arith.sitofp %95 : vector<16x64xi32> to vector<16x64xf32>
    %c0_36 = arith.constant 0 : index
    %c0_37 = arith.constant 0 : index
    %97 = vector.load %arg4[%c0_36, %c0_37] : memref<64x384xf32, #tpu.memory_space<vmem>>, vector<64x384xf32>
    %cst_38 = arith.constant dense<0.000000e+00> : vector<16x384xf32>
    %98 = tpu.matmul %96, %97, %cst_38 {dimension_numbers = #tpu.dot_dimension_numbers<[1], [0], [0], [1], [0, 0, 1, 1], [], []>} : vector<16x64xf32>, vector<64x384xf32>, vector<16x384xf32> -> vector<16x384xf32>
    %c0_39 = arith.constant 0 : index
    %c0_40 = arith.constant 0 : index
    %99 = vector.load %arg5[%c0_39, %c0_40] : memref<128x384xf32, #tpu.memory_space<vmem>>, vector<128x384xf32>
    %c0_41 = arith.constant 0 : index
    %c0_42 = arith.constant 0 : index
    %100 = vector.load %arg6[%c0_41, %c0_42] : memref<1x384xf32, #tpu.memory_space<vmem>>, vector<1x384xf32>
    %cst_43 = arith.constant 0.000000e+00 : f32
    %101 = vector.broadcast %cst_43 : f32 to vector<2x128xf32>
    %102 = vector.extract_strided_slice %98 {offsets = [0, 0], sizes = [2, 384], strides = [1, 1]} : vector<16x384xf32> to vector<2x384xf32>
    %cst_44 = arith.constant dense<0.000000e+00> : vector<2x384xf32>
    %103 = tpu.matmul %101, %99, %cst_44 {dimension_numbers = #tpu.dot_dimension_numbers<[1], [0], [0], [1], [0, 0, 1, 1], [], []>} : vector<2x128xf32>, vector<128x384xf32>, vector<2x384xf32> -> vector<2x384xf32>
    %104 = vector.broadcast %100 : vector<1x384xf32> to vector<2x384xf32>
    %105 = arith.addf %103, %104 : vector<2x384xf32>
    %106 = vector.extract_strided_slice %102 {offsets = [0, 0], sizes = [2, 256], strides = [1, 1]} : vector<2x384xf32> to vector<2x256xf32>
    %107 = vector.extract_strided_slice %105 {offsets = [0, 0], sizes = [2, 256], strides = [1, 1]} : vector<2x384xf32> to vector<2x256xf32>
    %108 = arith.addf %106, %107 : vector<2x256xf32>
    %109 = arith.negf %108 : vector<2x256xf32>
    %110 = math.exp %109 : vector<2x256xf32>
    %cst_45 = arith.constant 1.000000e+00 : f32
    %111 = vector.broadcast %cst_45 : f32 to vector<2x256xf32>
    %112 = arith.addf %111, %110 : vector<2x256xf32>
    %113 = arith.divf %111, %112 : vector<2x256xf32>
    %114 = vector.extract_strided_slice %113 {offsets = [0, 0], sizes = [2, 128], strides = [1, 1]} : vector<2x256xf32> to vector<2x128xf32>
    %115 = vector.extract_strided_slice %113 {offsets = [0, 128], sizes = [2, 128], strides = [1, 1]} : vector<2x256xf32> to vector<2x128xf32>
    %116 = vector.extract_strided_slice %102 {offsets = [0, 256], sizes = [2, 128], strides = [1, 1]} : vector<2x384xf32> to vector<2x128xf32>
    %117 = vector.extract_strided_slice %105 {offsets = [0, 256], sizes = [2, 128], strides = [1, 1]} : vector<2x384xf32> to vector<2x128xf32>
    %118 = arith.mulf %114, %117 : vector<2x128xf32>
    %119 = arith.addf %116, %118 : vector<2x128xf32>
    %120 = math.tanh %119 : vector<2x128xf32>
    %cst_46 = arith.constant 1.000000e+00 : f32
    %121 = vector.broadcast %cst_46 : f32 to vector<2x128xf32>
    %122 = arith.subf %121, %115 : vector<2x128xf32>
    %123 = arith.mulf %122, %120 : vector<2x128xf32>
    %124 = arith.mulf %115, %101 : vector<2x128xf32>
    %125 = arith.addf %123, %124 : vector<2x128xf32>
    %126 = vector.extract_strided_slice %98 {offsets = [2, 0], sizes = [2, 384], strides = [1, 1]} : vector<16x384xf32> to vector<2x384xf32>
    %cst_47 = arith.constant dense<0.000000e+00> : vector<2x384xf32>
    %127 = tpu.matmul %125, %99, %cst_47 {dimension_numbers = #tpu.dot_dimension_numbers<[1], [0], [0], [1], [0, 0, 1, 1], [], []>} : vector<2x128xf32>, vector<128x384xf32>, vector<2x384xf32> -> vector<2x384xf32>
    %128 = vector.broadcast %100 : vector<1x384xf32> to vector<2x384xf32>
    %129 = arith.addf %127, %128 : vector<2x384xf32>
    %130 = vector.extract_strided_slice %126 {offsets = [0, 0], sizes = [2, 256], strides = [1, 1]} : vector<2x384xf32> to vector<2x256xf32>
    %131 = vector.extract_strided_slice %129 {offsets = [0, 0], sizes = [2, 256], strides = [1, 1]} : vector<2x384xf32> to vector<2x256xf32>
    %132 = arith.addf %130, %131 : vector<2x256xf32>
    %133 = arith.negf %132 : vector<2x256xf32>
    %134 = math.exp %133 : vector<2x256xf32>
    %cst_48 = arith.constant 1.000000e+00 : f32
    %135 = vector.broadcast %cst_48 : f32 to vector<2x256xf32>
    %136 = arith.addf %135, %134 : vector<2x256xf32>
    %137 = arith.divf %135, %136 : vector<2x256xf32>
    %138 = vector.extract_strided_slice %137 {offsets = [0, 0], sizes = [2, 128], strides = [1, 1]} : vector<2x256xf32> to vector<2x128xf32>
    %139 = vector.extract_strided_slice %137 {offsets = [0, 128], sizes = [2, 128], strides = [1, 1]} : vector<2x256xf32> to vector<2x128xf32>
    %140 = vector.extract_strided_slice %126 {offsets = [0, 256], sizes = [2, 128], strides = [1, 1]} : vector<2x384xf32> to vector<2x128xf32>
    %141 = vector.extract_strided_slice %129 {offsets = [0, 256], sizes = [2, 128], strides = [1, 1]} : vector<2x384xf32> to vector<2x128xf32>
    %142 = arith.mulf %138, %141 : vector<2x128xf32>
    %143 = arith.addf %140, %142 : vector<2x128xf32>
    %144 = math.tanh %143 : vector<2x128xf32>
    %cst_49 = arith.constant 1.000000e+00 : f32
    %145 = vector.broadcast %cst_49 : f32 to vector<2x128xf32>
    %146 = arith.subf %145, %139 : vector<2x128xf32>
    %147 = arith.mulf %146, %144 : vector<2x128xf32>
    %148 = arith.mulf %139, %125 : vector<2x128xf32>
    %149 = arith.addf %147, %148 : vector<2x128xf32>
    %150 = vector.extract_strided_slice %98 {offsets = [4, 0], sizes = [2, 384], strides = [1, 1]} : vector<16x384xf32> to vector<2x384xf32>
    %cst_50 = arith.constant dense<0.000000e+00> : vector<2x384xf32>
    %151 = tpu.matmul %149, %99, %cst_50 {dimension_numbers = #tpu.dot_dimension_numbers<[1], [0], [0], [1], [0, 0, 1, 1], [], []>} : vector<2x128xf32>, vector<128x384xf32>, vector<2x384xf32> -> vector<2x384xf32>
    %152 = vector.broadcast %100 : vector<1x384xf32> to vector<2x384xf32>
    %153 = arith.addf %151, %152 : vector<2x384xf32>
    %154 = vector.extract_strided_slice %150 {offsets = [0, 0], sizes = [2, 256], strides = [1, 1]} : vector<2x384xf32> to vector<2x256xf32>
    %155 = vector.extract_strided_slice %153 {offsets = [0, 0], sizes = [2, 256], strides = [1, 1]} : vector<2x384xf32> to vector<2x256xf32>
    %156 = arith.addf %154, %155 : vector<2x256xf32>
    %157 = arith.negf %156 : vector<2x256xf32>
    %158 = math.exp %157 : vector<2x256xf32>
    %cst_51 = arith.constant 1.000000e+00 : f32
    %159 = vector.broadcast %cst_51 : f32 to vector<2x256xf32>
    %160 = arith.addf %159, %158 : vector<2x256xf32>
    %161 = arith.divf %159, %160 : vector<2x256xf32>
    %162 = vector.extract_strided_slice %161 {offsets = [0, 0], sizes = [2, 128], strides = [1, 1]} : vector<2x256xf32> to vector<2x128xf32>
    %163 = vector.extract_strided_slice %161 {offsets = [0, 128], sizes = [2, 128], strides = [1, 1]} : vector<2x256xf32> to vector<2x128xf32>
    %164 = vector.extract_strided_slice %150 {offsets = [0, 256], sizes = [2, 128], strides = [1, 1]} : vector<2x384xf32> to vector<2x128xf32>
    %165 = vector.extract_strided_slice %153 {offsets = [0, 256], sizes = [2, 128], strides = [1, 1]} : vector<2x384xf32> to vector<2x128xf32>
    %166 = arith.mulf %162, %165 : vector<2x128xf32>
    %167 = arith.addf %164, %166 : vector<2x128xf32>
    %168 = math.tanh %167 : vector<2x128xf32>
    %cst_52 = arith.constant 1.000000e+00 : f32
    %169 = vector.broadcast %cst_52 : f32 to vector<2x128xf32>
    %170 = arith.subf %169, %163 : vector<2x128xf32>
    %171 = arith.mulf %170, %168 : vector<2x128xf32>
    %172 = arith.mulf %163, %149 : vector<2x128xf32>
    %173 = arith.addf %171, %172 : vector<2x128xf32>
    %174 = vector.extract_strided_slice %98 {offsets = [6, 0], sizes = [2, 384], strides = [1, 1]} : vector<16x384xf32> to vector<2x384xf32>
    %cst_53 = arith.constant dense<0.000000e+00> : vector<2x384xf32>
    %175 = tpu.matmul %173, %99, %cst_53 {dimension_numbers = #tpu.dot_dimension_numbers<[1], [0], [0], [1], [0, 0, 1, 1], [], []>} : vector<2x128xf32>, vector<128x384xf32>, vector<2x384xf32> -> vector<2x384xf32>
    %176 = vector.broadcast %100 : vector<1x384xf32> to vector<2x384xf32>
    %177 = arith.addf %175, %176 : vector<2x384xf32>
    %178 = vector.extract_strided_slice %174 {offsets = [0, 0], sizes = [2, 256], strides = [1, 1]} : vector<2x384xf32> to vector<2x256xf32>
    %179 = vector.extract_strided_slice %177 {offsets = [0, 0], sizes = [2, 256], strides = [1, 1]} : vector<2x384xf32> to vector<2x256xf32>
    %180 = arith.addf %178, %179 : vector<2x256xf32>
    %181 = arith.negf %180 : vector<2x256xf32>
    %182 = math.exp %181 : vector<2x256xf32>
    %cst_54 = arith.constant 1.000000e+00 : f32
    %183 = vector.broadcast %cst_54 : f32 to vector<2x256xf32>
    %184 = arith.addf %183, %182 : vector<2x256xf32>
    %185 = arith.divf %183, %184 : vector<2x256xf32>
    %186 = vector.extract_strided_slice %185 {offsets = [0, 0], sizes = [2, 128], strides = [1, 1]} : vector<2x256xf32> to vector<2x128xf32>
    %187 = vector.extract_strided_slice %185 {offsets = [0, 128], sizes = [2, 128], strides = [1, 1]} : vector<2x256xf32> to vector<2x128xf32>
    %188 = vector.extract_strided_slice %174 {offsets = [0, 256], sizes = [2, 128], strides = [1, 1]} : vector<2x384xf32> to vector<2x128xf32>
    %189 = vector.extract_strided_slice %177 {offsets = [0, 256], sizes = [2, 128], strides = [1, 1]} : vector<2x384xf32> to vector<2x128xf32>
    %190 = arith.mulf %186, %189 : vector<2x128xf32>
    %191 = arith.addf %188, %190 : vector<2x128xf32>
    %192 = math.tanh %191 : vector<2x128xf32>
    %cst_55 = arith.constant 1.000000e+00 : f32
    %193 = vector.broadcast %cst_55 : f32 to vector<2x128xf32>
    %194 = arith.subf %193, %187 : vector<2x128xf32>
    %195 = arith.mulf %194, %192 : vector<2x128xf32>
    %196 = arith.mulf %187, %173 : vector<2x128xf32>
    %197 = arith.addf %195, %196 : vector<2x128xf32>
    %198 = vector.extract_strided_slice %98 {offsets = [8, 0], sizes = [2, 384], strides = [1, 1]} : vector<16x384xf32> to vector<2x384xf32>
    %cst_56 = arith.constant dense<0.000000e+00> : vector<2x384xf32>
    %199 = tpu.matmul %197, %99, %cst_56 {dimension_numbers = #tpu.dot_dimension_numbers<[1], [0], [0], [1], [0, 0, 1, 1], [], []>} : vector<2x128xf32>, vector<128x384xf32>, vector<2x384xf32> -> vector<2x384xf32>
    %200 = vector.broadcast %100 : vector<1x384xf32> to vector<2x384xf32>
    %201 = arith.addf %199, %200 : vector<2x384xf32>
    %202 = vector.extract_strided_slice %198 {offsets = [0, 0], sizes = [2, 256], strides = [1, 1]} : vector<2x384xf32> to vector<2x256xf32>
    %203 = vector.extract_strided_slice %201 {offsets = [0, 0], sizes = [2, 256], strides = [1, 1]} : vector<2x384xf32> to vector<2x256xf32>
    %204 = arith.addf %202, %203 : vector<2x256xf32>
    %205 = arith.negf %204 : vector<2x256xf32>
    %206 = math.exp %205 : vector<2x256xf32>
    %cst_57 = arith.constant 1.000000e+00 : f32
    %207 = vector.broadcast %cst_57 : f32 to vector<2x256xf32>
    %208 = arith.addf %207, %206 : vector<2x256xf32>
    %209 = arith.divf %207, %208 : vector<2x256xf32>
    %210 = vector.extract_strided_slice %209 {offsets = [0, 0], sizes = [2, 128], strides = [1, 1]} : vector<2x256xf32> to vector<2x128xf32>
    %211 = vector.extract_strided_slice %209 {offsets = [0, 128], sizes = [2, 128], strides = [1, 1]} : vector<2x256xf32> to vector<2x128xf32>
    %212 = vector.extract_strided_slice %198 {offsets = [0, 256], sizes = [2, 128], strides = [1, 1]} : vector<2x384xf32> to vector<2x128xf32>
    %213 = vector.extract_strided_slice %201 {offsets = [0, 256], sizes = [2, 128], strides = [1, 1]} : vector<2x384xf32> to vector<2x128xf32>
    %214 = arith.mulf %210, %213 : vector<2x128xf32>
    %215 = arith.addf %212, %214 : vector<2x128xf32>
    %216 = math.tanh %215 : vector<2x128xf32>
    %cst_58 = arith.constant 1.000000e+00 : f32
    %217 = vector.broadcast %cst_58 : f32 to vector<2x128xf32>
    %218 = arith.subf %217, %211 : vector<2x128xf32>
    %219 = arith.mulf %218, %216 : vector<2x128xf32>
    %220 = arith.mulf %211, %197 : vector<2x128xf32>
    %221 = arith.addf %219, %220 : vector<2x128xf32>
    %222 = vector.extract_strided_slice %98 {offsets = [10, 0], sizes = [2, 384], strides = [1, 1]} : vector<16x384xf32> to vector<2x384xf32>
    %cst_59 = arith.constant dense<0.000000e+00> : vector<2x384xf32>
    %223 = tpu.matmul %221, %99, %cst_59 {dimension_numbers = #tpu.dot_dimension_numbers<[1], [0], [0], [1], [0, 0, 1, 1], [], []>} : vector<2x128xf32>, vector<128x384xf32>, vector<2x384xf32> -> vector<2x384xf32>
    %224 = vector.broadcast %100 : vector<1x384xf32> to vector<2x384xf32>
    %225 = arith.addf %223, %224 : vector<2x384xf32>
    %226 = vector.extract_strided_slice %222 {offsets = [0, 0], sizes = [2, 256], strides = [1, 1]} : vector<2x384xf32> to vector<2x256xf32>
    %227 = vector.extract_strided_slice %225 {offsets = [0, 0], sizes = [2, 256], strides = [1, 1]} : vector<2x384xf32> to vector<2x256xf32>
    %228 = arith.addf %226, %227 : vector<2x256xf32>
    %229 = arith.negf %228 : vector<2x256xf32>
    %230 = math.exp %229 : vector<2x256xf32>
    %cst_60 = arith.constant 1.000000e+00 : f32
    %231 = vector.broadcast %cst_60 : f32 to vector<2x256xf32>
    %232 = arith.addf %231, %230 : vector<2x256xf32>
    %233 = arith.divf %231, %232 : vector<2x256xf32>
    %234 = vector.extract_strided_slice %233 {offsets = [0, 0], sizes = [2, 128], strides = [1, 1]} : vector<2x256xf32> to vector<2x128xf32>
    %235 = vector.extract_strided_slice %233 {offsets = [0, 128], sizes = [2, 128], strides = [1, 1]} : vector<2x256xf32> to vector<2x128xf32>
    %236 = vector.extract_strided_slice %222 {offsets = [0, 256], sizes = [2, 128], strides = [1, 1]} : vector<2x384xf32> to vector<2x128xf32>
    %237 = vector.extract_strided_slice %225 {offsets = [0, 256], sizes = [2, 128], strides = [1, 1]} : vector<2x384xf32> to vector<2x128xf32>
    %238 = arith.mulf %234, %237 : vector<2x128xf32>
    %239 = arith.addf %236, %238 : vector<2x128xf32>
    %240 = math.tanh %239 : vector<2x128xf32>
    %cst_61 = arith.constant 1.000000e+00 : f32
    %241 = vector.broadcast %cst_61 : f32 to vector<2x128xf32>
    %242 = arith.subf %241, %235 : vector<2x128xf32>
    %243 = arith.mulf %242, %240 : vector<2x128xf32>
    %244 = arith.mulf %235, %221 : vector<2x128xf32>
    %245 = arith.addf %243, %244 : vector<2x128xf32>
    %246 = vector.extract_strided_slice %98 {offsets = [12, 0], sizes = [2, 384], strides = [1, 1]} : vector<16x384xf32> to vector<2x384xf32>
    %cst_62 = arith.constant dense<0.000000e+00> : vector<2x384xf32>
    %247 = tpu.matmul %245, %99, %cst_62 {dimension_numbers = #tpu.dot_dimension_numbers<[1], [0], [0], [1], [0, 0, 1, 1], [], []>} : vector<2x128xf32>, vector<128x384xf32>, vector<2x384xf32> -> vector<2x384xf32>
    %248 = vector.broadcast %100 : vector<1x384xf32> to vector<2x384xf32>
    %249 = arith.addf %247, %248 : vector<2x384xf32>
    %250 = vector.extract_strided_slice %246 {offsets = [0, 0], sizes = [2, 256], strides = [1, 1]} : vector<2x384xf32> to vector<2x256xf32>
    %251 = vector.extract_strided_slice %249 {offsets = [0, 0], sizes = [2, 256], strides = [1, 1]} : vector<2x384xf32> to vector<2x256xf32>
    %252 = arith.addf %250, %251 : vector<2x256xf32>
    %253 = arith.negf %252 : vector<2x256xf32>
    %254 = math.exp %253 : vector<2x256xf32>
    %cst_63 = arith.constant 1.000000e+00 : f32
    %255 = vector.broadcast %cst_63 : f32 to vector<2x256xf32>
    %256 = arith.addf %255, %254 : vector<2x256xf32>
    %257 = arith.divf %255, %256 : vector<2x256xf32>
    %258 = vector.extract_strided_slice %257 {offsets = [0, 0], sizes = [2, 128], strides = [1, 1]} : vector<2x256xf32> to vector<2x128xf32>
    %259 = vector.extract_strided_slice %257 {offsets = [0, 128], sizes = [2, 128], strides = [1, 1]} : vector<2x256xf32> to vector<2x128xf32>
    %260 = vector.extract_strided_slice %246 {offsets = [0, 256], sizes = [2, 128], strides = [1, 1]} : vector<2x384xf32> to vector<2x128xf32>
    %261 = vector.extract_strided_slice %249 {offsets = [0, 256], sizes = [2, 128], strides = [1, 1]} : vector<2x384xf32> to vector<2x128xf32>
    %262 = arith.mulf %258, %261 : vector<2x128xf32>
    %263 = arith.addf %260, %262 : vector<2x128xf32>
    %264 = math.tanh %263 : vector<2x128xf32>
    %cst_64 = arith.constant 1.000000e+00 : f32
    %265 = vector.broadcast %cst_64 : f32 to vector<2x128xf32>
    %266 = arith.subf %265, %259 : vector<2x128xf32>
    %267 = arith.mulf %266, %264 : vector<2x128xf32>
    %268 = arith.mulf %259, %245 : vector<2x128xf32>
    %269 = arith.addf %267, %268 : vector<2x128xf32>
    %270 = vector.extract_strided_slice %98 {offsets = [14, 0], sizes = [2, 384], strides = [1, 1]} : vector<16x384xf32> to vector<2x384xf32>
    %cst_65 = arith.constant dense<0.000000e+00> : vector<2x384xf32>
    %271 = tpu.matmul %269, %99, %cst_65 {dimension_numbers = #tpu.dot_dimension_numbers<[1], [0], [0], [1], [0, 0, 1, 1], [], []>} : vector<2x128xf32>, vector<128x384xf32>, vector<2x384xf32> -> vector<2x384xf32>
    %272 = vector.broadcast %100 : vector<1x384xf32> to vector<2x384xf32>
    %273 = arith.addf %271, %272 : vector<2x384xf32>
    %274 = vector.extract_strided_slice %270 {offsets = [0, 0], sizes = [2, 256], strides = [1, 1]} : vector<2x384xf32> to vector<2x256xf32>
    %275 = vector.extract_strided_slice %273 {offsets = [0, 0], sizes = [2, 256], strides = [1, 1]} : vector<2x384xf32> to vector<2x256xf32>
    %276 = arith.addf %274, %275 : vector<2x256xf32>
    %277 = arith.negf %276 : vector<2x256xf32>
    %278 = math.exp %277 : vector<2x256xf32>
    %cst_66 = arith.constant 1.000000e+00 : f32
    %279 = vector.broadcast %cst_66 : f32 to vector<2x256xf32>
    %280 = arith.addf %279, %278 : vector<2x256xf32>
    %281 = arith.divf %279, %280 : vector<2x256xf32>
    %282 = vector.extract_strided_slice %281 {offsets = [0, 0], sizes = [2, 128], strides = [1, 1]} : vector<2x256xf32> to vector<2x128xf32>
    %283 = vector.extract_strided_slice %281 {offsets = [0, 128], sizes = [2, 128], strides = [1, 1]} : vector<2x256xf32> to vector<2x128xf32>
    %284 = vector.extract_strided_slice %270 {offsets = [0, 256], sizes = [2, 128], strides = [1, 1]} : vector<2x384xf32> to vector<2x128xf32>
    %285 = vector.extract_strided_slice %273 {offsets = [0, 256], sizes = [2, 128], strides = [1, 1]} : vector<2x384xf32> to vector<2x128xf32>
    %286 = arith.mulf %282, %285 : vector<2x128xf32>
    %287 = arith.addf %284, %286 : vector<2x128xf32>
    %288 = math.tanh %287 : vector<2x128xf32>
    %cst_67 = arith.constant 1.000000e+00 : f32
    %289 = vector.broadcast %cst_67 : f32 to vector<2x128xf32>
    %290 = arith.subf %289, %283 : vector<2x128xf32>
    %291 = arith.mulf %290, %288 : vector<2x128xf32>
    %292 = arith.mulf %283, %269 : vector<2x128xf32>
    %293 = arith.addf %291, %292 : vector<2x128xf32>
    %c0_68 = arith.constant 0 : index
    %c0_69 = arith.constant 0 : index
    %294 = vector.load %arg7[%c0_68, %c0_69] : memref<128x128xf32, #tpu.memory_space<vmem>>, vector<128x128xf32>
    %cst_70 = arith.constant dense<0.000000e+00> : vector<2x128xf32>
    %295 = tpu.matmul %293, %294, %cst_70 {dimension_numbers = #tpu.dot_dimension_numbers<[1], [0], [0], [1], [0, 0, 1, 1], [], []>} : vector<2x128xf32>, vector<128x128xf32>, vector<2x128xf32> -> vector<2x128xf32>
    %296 = arith.addf %295, %9 : vector<2x128xf32>
    %297 = math.tanh %296 : vector<2x128xf32>
    %c0_71 = arith.constant 0 : index
    %c0_72 = arith.constant 0 : index
    %298 = memref.load %arg1[%c0_71, %c0_72] : memref<2x6xi32, #tpu.memory_space<smem>>
    %c1_73 = arith.constant 1 : index
    %c0_74 = arith.constant 0 : index
    %299 = memref.load %arg1[%c1_73, %c0_74] : memref<2x6xi32, #tpu.memory_space<smem>>
    %c0_75 = arith.constant 0 : index
    %c1_76 = arith.constant 1 : index
    %300 = memref.load %arg1[%c0_75, %c1_76] : memref<2x6xi32, #tpu.memory_space<smem>>
    %c1_77 = arith.constant 1 : index
    %c1_78 = arith.constant 1 : index
    %301 = memref.load %arg1[%c1_77, %c1_78] : memref<2x6xi32, #tpu.memory_space<smem>>
    %c0_79 = arith.constant 0 : index
    %c2_80 = arith.constant 2 : index
    %302 = memref.load %arg1[%c0_79, %c2_80] : memref<2x6xi32, #tpu.memory_space<smem>>
    %c1_81 = arith.constant 1 : index
    %c2_82 = arith.constant 2 : index
    %303 = memref.load %arg1[%c1_81, %c2_82] : memref<2x6xi32, #tpu.memory_space<smem>>
    %c0_83 = arith.constant 0 : index
    %c3_84 = arith.constant 3 : index
    %304 = memref.load %arg1[%c0_83, %c3_84] : memref<2x6xi32, #tpu.memory_space<smem>>
    %c1_85 = arith.constant 1 : index
    %c3_86 = arith.constant 3 : index
    %305 = memref.load %arg1[%c1_85, %c3_86] : memref<2x6xi32, #tpu.memory_space<smem>>
    %c0_87 = arith.constant 0 : index
    %c4_88 = arith.constant 4 : index
    %306 = memref.load %arg1[%c0_87, %c4_88] : memref<2x6xi32, #tpu.memory_space<smem>>
    %c1_89 = arith.constant 1 : index
    %c4_90 = arith.constant 4 : index
    %307 = memref.load %arg1[%c1_89, %c4_90] : memref<2x6xi32, #tpu.memory_space<smem>>
    %308 = tpu.iota {dimensions = array<i32: 0>} : vector<12x1xi32>
    %c0_i32_91 = arith.constant 0 : i32
    %309 = vector.broadcast %c0_i32_91 : i32 to vector<12x1xi32>
    %c0_i32_92 = arith.constant 0 : i32
    %310 = vector.broadcast %c0_i32_92 : i32 to vector<12x1xi32>
    %311 = arith.cmpi eq, %308, %310 : vector<12x1xi32>
    %c0_i32_93 = arith.constant 0 : i32
    %312 = vector.broadcast %c0_i32_93 : i32 to vector<12x1xi32>
    %313 = arith.select %311, %312, %309 : vector<12x1xi1>, vector<12x1xi32>
    %c1_i32_94 = arith.constant 1 : i32
    %314 = vector.broadcast %c1_i32_94 : i32 to vector<12x1xi32>
    %315 = arith.cmpi eq, %308, %314 : vector<12x1xi32>
    %c0_i32_95 = arith.constant 0 : i32
    %316 = vector.broadcast %c0_i32_95 : i32 to vector<12x1xi32>
    %317 = arith.select %315, %316, %313 : vector<12x1xi1>, vector<12x1xi32>
    %c2_i32_96 = arith.constant 2 : i32
    %318 = vector.broadcast %c2_i32_96 : i32 to vector<12x1xi32>
    %319 = arith.cmpi eq, %308, %318 : vector<12x1xi32>
    %320 = vector.broadcast %298 : i32 to vector<12x1xi32>
    %321 = arith.select %319, %320, %317 : vector<12x1xi1>, vector<12x1xi32>
    %c3_i32_97 = arith.constant 3 : i32
    %322 = vector.broadcast %c3_i32_97 : i32 to vector<12x1xi32>
    %323 = arith.cmpi eq, %308, %322 : vector<12x1xi32>
    %324 = vector.broadcast %299 : i32 to vector<12x1xi32>
    %325 = arith.select %323, %324, %321 : vector<12x1xi1>, vector<12x1xi32>
    %c4_i32_98 = arith.constant 4 : i32
    %326 = vector.broadcast %c4_i32_98 : i32 to vector<12x1xi32>
    %327 = arith.cmpi eq, %308, %326 : vector<12x1xi32>
    %328 = vector.broadcast %300 : i32 to vector<12x1xi32>
    %329 = arith.select %327, %328, %325 : vector<12x1xi1>, vector<12x1xi32>
    %c5_i32_99 = arith.constant 5 : i32
    %330 = vector.broadcast %c5_i32_99 : i32 to vector<12x1xi32>
    %331 = arith.cmpi eq, %308, %330 : vector<12x1xi32>
    %332 = vector.broadcast %301 : i32 to vector<12x1xi32>
    %333 = arith.select %331, %332, %329 : vector<12x1xi1>, vector<12x1xi32>
    %c6_i32_100 = arith.constant 6 : i32
    %334 = vector.broadcast %c6_i32_100 : i32 to vector<12x1xi32>
    %335 = arith.cmpi eq, %308, %334 : vector<12x1xi32>
    %336 = vector.broadcast %302 : i32 to vector<12x1xi32>
    %337 = arith.select %335, %336, %333 : vector<12x1xi1>, vector<12x1xi32>
    %c7_i32_101 = arith.constant 7 : i32
    %338 = vector.broadcast %c7_i32_101 : i32 to vector<12x1xi32>
    %339 = arith.cmpi eq, %308, %338 : vector<12x1xi32>
    %340 = vector.broadcast %303 : i32 to vector<12x1xi32>
    %341 = arith.select %339, %340, %337 : vector<12x1xi1>, vector<12x1xi32>
    %c8_i32_102 = arith.constant 8 : i32
    %342 = vector.broadcast %c8_i32_102 : i32 to vector<12x1xi32>
    %343 = arith.cmpi eq, %308, %342 : vector<12x1xi32>
    %344 = vector.broadcast %304 : i32 to vector<12x1xi32>
    %345 = arith.select %343, %344, %341 : vector<12x1xi1>, vector<12x1xi32>
    %c9_i32_103 = arith.constant 9 : i32
    %346 = vector.broadcast %c9_i32_103 : i32 to vector<12x1xi32>
    %347 = arith.cmpi eq, %308, %346 : vector<12x1xi32>
    %348 = vector.broadcast %305 : i32 to vector<12x1xi32>
    %349 = arith.select %347, %348, %345 : vector<12x1xi1>, vector<12x1xi32>
    %c10_i32_104 = arith.constant 10 : i32
    %350 = vector.broadcast %c10_i32_104 : i32 to vector<12x1xi32>
    %351 = arith.cmpi eq, %308, %350 : vector<12x1xi32>
    %352 = vector.broadcast %306 : i32 to vector<12x1xi32>
    %353 = arith.select %351, %352, %349 : vector<12x1xi1>, vector<12x1xi32>
    %c11_i32_105 = arith.constant 11 : i32
    %354 = vector.broadcast %c11_i32_105 : i32 to vector<12x1xi32>
    %355 = arith.cmpi eq, %308, %354 : vector<12x1xi32>
    %356 = vector.broadcast %307 : i32 to vector<12x1xi32>
    %357 = arith.select %355, %356, %353 : vector<12x1xi1>, vector<12x1xi32>
    %358 = tpu.iota {dimensions = array<i32: 1>} : vector<12x64xi32>
    %359 = vector.broadcast %357 : vector<12x1xi32> to vector<12x64xi32>
    %360 = arith.cmpi eq, %358, %359 : vector<12x64xi32>
    %361 = arith.extui %360 : vector<12x64xi1> to vector<12x64xi32>
    %362 = arith.sitofp %361 : vector<12x64xi32> to vector<12x64xf32>
    %c0_106 = arith.constant 0 : index
    %c0_107 = arith.constant 0 : index
    %363 = vector.load %arg11[%c0_106, %c0_107] : memref<64x384xf32, #tpu.memory_space<vmem>>, vector<64x384xf32>
    %cst_108 = arith.constant dense<0.000000e+00> : vector<12x384xf32>
    %364 = tpu.matmul %362, %363, %cst_108 {dimension_numbers = #tpu.dot_dimension_numbers<[1], [0], [0], [1], [0, 0, 1, 1], [], []>} : vector<12x64xf32>, vector<64x384xf32>, vector<12x384xf32> -> vector<12x384xf32>
    %c0_109 = arith.constant 0 : index
    %c0_110 = arith.constant 0 : index
    %365 = vector.load %arg12[%c0_109, %c0_110] : memref<128x384xf32, #tpu.memory_space<vmem>>, vector<128x384xf32>
    %c0_111 = arith.constant 0 : index
    %c0_112 = arith.constant 0 : index
    %366 = vector.load %arg13[%c0_111, %c0_112] : memref<1x384xf32, #tpu.memory_space<vmem>>, vector<1x384xf32>
    %367 = vector.extract_strided_slice %364 {offsets = [0, 0], sizes = [2, 384], strides = [1, 1]} : vector<12x384xf32> to vector<2x384xf32>
    %cst_113 = arith.constant dense<0.000000e+00> : vector<2x384xf32>
    %368 = tpu.matmul %297, %365, %cst_113 {dimension_numbers = #tpu.dot_dimension_numbers<[1], [0], [0], [1], [0, 0, 1, 1], [], []>} : vector<2x128xf32>, vector<128x384xf32>, vector<2x384xf32> -> vector<2x384xf32>
    %369 = vector.broadcast %366 : vector<1x384xf32> to vector<2x384xf32>
    %370 = arith.addf %368, %369 : vector<2x384xf32>
    %371 = vector.extract_strided_slice %367 {offsets = [0, 0], sizes = [2, 256], strides = [1, 1]} : vector<2x384xf32> to vector<2x256xf32>
    %372 = vector.extract_strided_slice %370 {offsets = [0, 0], sizes = [2, 256], strides = [1, 1]} : vector<2x384xf32> to vector<2x256xf32>
    %373 = arith.addf %371, %372 : vector<2x256xf32>
    %374 = arith.negf %373 : vector<2x256xf32>
    %375 = math.exp %374 : vector<2x256xf32>
    %cst_114 = arith.constant 1.000000e+00 : f32
    %376 = vector.broadcast %cst_114 : f32 to vector<2x256xf32>
    %377 = arith.addf %376, %375 : vector<2x256xf32>
    %378 = arith.divf %376, %377 : vector<2x256xf32>
    %379 = vector.extract_strided_slice %378 {offsets = [0, 0], sizes = [2, 128], strides = [1, 1]} : vector<2x256xf32> to vector<2x128xf32>
    %380 = vector.extract_strided_slice %378 {offsets = [0, 128], sizes = [2, 128], strides = [1, 1]} : vector<2x256xf32> to vector<2x128xf32>
    %381 = vector.extract_strided_slice %367 {offsets = [0, 256], sizes = [2, 128], strides = [1, 1]} : vector<2x384xf32> to vector<2x128xf32>
    %382 = vector.extract_strided_slice %370 {offsets = [0, 256], sizes = [2, 128], strides = [1, 1]} : vector<2x384xf32> to vector<2x128xf32>
    %383 = arith.mulf %379, %382 : vector<2x128xf32>
    %384 = arith.addf %381, %383 : vector<2x128xf32>
    %385 = math.tanh %384 : vector<2x128xf32>
    %cst_115 = arith.constant 1.000000e+00 : f32
    %386 = vector.broadcast %cst_115 : f32 to vector<2x128xf32>
    %387 = arith.subf %386, %380 : vector<2x128xf32>
    %388 = arith.mulf %387, %385 : vector<2x128xf32>
    %389 = arith.mulf %380, %297 : vector<2x128xf32>
    %390 = arith.addf %388, %389 : vector<2x128xf32>
    %391 = vector.extract_strided_slice %364 {offsets = [2, 0], sizes = [2, 384], strides = [1, 1]} : vector<12x384xf32> to vector<2x384xf32>
    %cst_116 = arith.constant dense<0.000000e+00> : vector<2x384xf32>
    %392 = tpu.matmul %390, %365, %cst_116 {dimension_numbers = #tpu.dot_dimension_numbers<[1], [0], [0], [1], [0, 0, 1, 1], [], []>} : vector<2x128xf32>, vector<128x384xf32>, vector<2x384xf32> -> vector<2x384xf32>
    %393 = vector.broadcast %366 : vector<1x384xf32> to vector<2x384xf32>
    %394 = arith.addf %392, %393 : vector<2x384xf32>
    %395 = vector.extract_strided_slice %391 {offsets = [0, 0], sizes = [2, 256], strides = [1, 1]} : vector<2x384xf32> to vector<2x256xf32>
    %396 = vector.extract_strided_slice %394 {offsets = [0, 0], sizes = [2, 256], strides = [1, 1]} : vector<2x384xf32> to vector<2x256xf32>
    %397 = arith.addf %395, %396 : vector<2x256xf32>
    %398 = arith.negf %397 : vector<2x256xf32>
    %399 = math.exp %398 : vector<2x256xf32>
    %cst_117 = arith.constant 1.000000e+00 : f32
    %400 = vector.broadcast %cst_117 : f32 to vector<2x256xf32>
    %401 = arith.addf %400, %399 : vector<2x256xf32>
    %402 = arith.divf %400, %401 : vector<2x256xf32>
    %403 = vector.extract_strided_slice %402 {offsets = [0, 0], sizes = [2, 128], strides = [1, 1]} : vector<2x256xf32> to vector<2x128xf32>
    %404 = vector.extract_strided_slice %402 {offsets = [0, 128], sizes = [2, 128], strides = [1, 1]} : vector<2x256xf32> to vector<2x128xf32>
    %405 = vector.extract_strided_slice %391 {offsets = [0, 256], sizes = [2, 128], strides = [1, 1]} : vector<2x384xf32> to vector<2x128xf32>
    %406 = vector.extract_strided_slice %394 {offsets = [0, 256], sizes = [2, 128], strides = [1, 1]} : vector<2x384xf32> to vector<2x128xf32>
    %407 = arith.mulf %403, %406 : vector<2x128xf32>
    %408 = arith.addf %405, %407 : vector<2x128xf32>
    %409 = math.tanh %408 : vector<2x128xf32>
    %cst_118 = arith.constant 1.000000e+00 : f32
    %410 = vector.broadcast %cst_118 : f32 to vector<2x128xf32>
    %411 = arith.subf %410, %404 : vector<2x128xf32>
    %412 = arith.mulf %411, %409 : vector<2x128xf32>
    %413 = arith.mulf %404, %390 : vector<2x128xf32>
    %414 = arith.addf %412, %413 : vector<2x128xf32>
    %415 = vector.extract_strided_slice %364 {offsets = [4, 0], sizes = [2, 384], strides = [1, 1]} : vector<12x384xf32> to vector<2x384xf32>
    %cst_119 = arith.constant dense<0.000000e+00> : vector<2x384xf32>
    %416 = tpu.matmul %414, %365, %cst_119 {dimension_numbers = #tpu.dot_dimension_numbers<[1], [0], [0], [1], [0, 0, 1, 1], [], []>} : vector<2x128xf32>, vector<128x384xf32>, vector<2x384xf32> -> vector<2x384xf32>
    %417 = vector.broadcast %366 : vector<1x384xf32> to vector<2x384xf32>
    %418 = arith.addf %416, %417 : vector<2x384xf32>
    %419 = vector.extract_strided_slice %415 {offsets = [0, 0], sizes = [2, 256], strides = [1, 1]} : vector<2x384xf32> to vector<2x256xf32>
    %420 = vector.extract_strided_slice %418 {offsets = [0, 0], sizes = [2, 256], strides = [1, 1]} : vector<2x384xf32> to vector<2x256xf32>
    %421 = arith.addf %419, %420 : vector<2x256xf32>
    %422 = arith.negf %421 : vector<2x256xf32>
    %423 = math.exp %422 : vector<2x256xf32>
    %cst_120 = arith.constant 1.000000e+00 : f32
    %424 = vector.broadcast %cst_120 : f32 to vector<2x256xf32>
    %425 = arith.addf %424, %423 : vector<2x256xf32>
    %426 = arith.divf %424, %425 : vector<2x256xf32>
    %427 = vector.extract_strided_slice %426 {offsets = [0, 0], sizes = [2, 128], strides = [1, 1]} : vector<2x256xf32> to vector<2x128xf32>
    %428 = vector.extract_strided_slice %426 {offsets = [0, 128], sizes = [2, 128], strides = [1, 1]} : vector<2x256xf32> to vector<2x128xf32>
    %429 = vector.extract_strided_slice %415 {offsets = [0, 256], sizes = [2, 128], strides = [1, 1]} : vector<2x384xf32> to vector<2x128xf32>
    %430 = vector.extract_strided_slice %418 {offsets = [0, 256], sizes = [2, 128], strides = [1, 1]} : vector<2x384xf32> to vector<2x128xf32>
    %431 = arith.mulf %427, %430 : vector<2x128xf32>
    %432 = arith.addf %429, %431 : vector<2x128xf32>
    %433 = math.tanh %432 : vector<2x128xf32>
    %cst_121 = arith.constant 1.000000e+00 : f32
    %434 = vector.broadcast %cst_121 : f32 to vector<2x128xf32>
    %435 = arith.subf %434, %428 : vector<2x128xf32>
    %436 = arith.mulf %435, %433 : vector<2x128xf32>
    %437 = arith.mulf %428, %414 : vector<2x128xf32>
    %438 = arith.addf %436, %437 : vector<2x128xf32>
    %439 = vector.extract_strided_slice %364 {offsets = [6, 0], sizes = [2, 384], strides = [1, 1]} : vector<12x384xf32> to vector<2x384xf32>
    %cst_122 = arith.constant dense<0.000000e+00> : vector<2x384xf32>
    %440 = tpu.matmul %438, %365, %cst_122 {dimension_numbers = #tpu.dot_dimension_numbers<[1], [0], [0], [1], [0, 0, 1, 1], [], []>} : vector<2x128xf32>, vector<128x384xf32>, vector<2x384xf32> -> vector<2x384xf32>
    %441 = vector.broadcast %366 : vector<1x384xf32> to vector<2x384xf32>
    %442 = arith.addf %440, %441 : vector<2x384xf32>
    %443 = vector.extract_strided_slice %439 {offsets = [0, 0], sizes = [2, 256], strides = [1, 1]} : vector<2x384xf32> to vector<2x256xf32>
    %444 = vector.extract_strided_slice %442 {offsets = [0, 0], sizes = [2, 256], strides = [1, 1]} : vector<2x384xf32> to vector<2x256xf32>
    %445 = arith.addf %443, %444 : vector<2x256xf32>
    %446 = arith.negf %445 : vector<2x256xf32>
    %447 = math.exp %446 : vector<2x256xf32>
    %cst_123 = arith.constant 1.000000e+00 : f32
    %448 = vector.broadcast %cst_123 : f32 to vector<2x256xf32>
    %449 = arith.addf %448, %447 : vector<2x256xf32>
    %450 = arith.divf %448, %449 : vector<2x256xf32>
    %451 = vector.extract_strided_slice %450 {offsets = [0, 0], sizes = [2, 128], strides = [1, 1]} : vector<2x256xf32> to vector<2x128xf32>
    %452 = vector.extract_strided_slice %450 {offsets = [0, 128], sizes = [2, 128], strides = [1, 1]} : vector<2x256xf32> to vector<2x128xf32>
    %453 = vector.extract_strided_slice %439 {offsets = [0, 256], sizes = [2, 128], strides = [1, 1]} : vector<2x384xf32> to vector<2x128xf32>
    %454 = vector.extract_strided_slice %442 {offsets = [0, 256], sizes = [2, 128], strides = [1, 1]} : vector<2x384xf32> to vector<2x128xf32>
    %455 = arith.mulf %451, %454 : vector<2x128xf32>
    %456 = arith.addf %453, %455 : vector<2x128xf32>
    %457 = math.tanh %456 : vector<2x128xf32>
    %cst_124 = arith.constant 1.000000e+00 : f32
    %458 = vector.broadcast %cst_124 : f32 to vector<2x128xf32>
    %459 = arith.subf %458, %452 : vector<2x128xf32>
    %460 = arith.mulf %459, %457 : vector<2x128xf32>
    %461 = arith.mulf %452, %438 : vector<2x128xf32>
    %462 = arith.addf %460, %461 : vector<2x128xf32>
    %463 = vector.extract_strided_slice %364 {offsets = [8, 0], sizes = [2, 384], strides = [1, 1]} : vector<12x384xf32> to vector<2x384xf32>
    %cst_125 = arith.constant dense<0.000000e+00> : vector<2x384xf32>
    %464 = tpu.matmul %462, %365, %cst_125 {dimension_numbers = #tpu.dot_dimension_numbers<[1], [0], [0], [1], [0, 0, 1, 1], [], []>} : vector<2x128xf32>, vector<128x384xf32>, vector<2x384xf32> -> vector<2x384xf32>
    %465 = vector.broadcast %366 : vector<1x384xf32> to vector<2x384xf32>
    %466 = arith.addf %464, %465 : vector<2x384xf32>
    %467 = vector.extract_strided_slice %463 {offsets = [0, 0], sizes = [2, 256], strides = [1, 1]} : vector<2x384xf32> to vector<2x256xf32>
    %468 = vector.extract_strided_slice %466 {offsets = [0, 0], sizes = [2, 256], strides = [1, 1]} : vector<2x384xf32> to vector<2x256xf32>
    %469 = arith.addf %467, %468 : vector<2x256xf32>
    %470 = arith.negf %469 : vector<2x256xf32>
    %471 = math.exp %470 : vector<2x256xf32>
    %cst_126 = arith.constant 1.000000e+00 : f32
    %472 = vector.broadcast %cst_126 : f32 to vector<2x256xf32>
    %473 = arith.addf %472, %471 : vector<2x256xf32>
    %474 = arith.divf %472, %473 : vector<2x256xf32>
    %475 = vector.extract_strided_slice %474 {offsets = [0, 0], sizes = [2, 128], strides = [1, 1]} : vector<2x256xf32> to vector<2x128xf32>
    %476 = vector.extract_strided_slice %474 {offsets = [0, 128], sizes = [2, 128], strides = [1, 1]} : vector<2x256xf32> to vector<2x128xf32>
    %477 = vector.extract_strided_slice %463 {offsets = [0, 256], sizes = [2, 128], strides = [1, 1]} : vector<2x384xf32> to vector<2x128xf32>
    %478 = vector.extract_strided_slice %466 {offsets = [0, 256], sizes = [2, 128], strides = [1, 1]} : vector<2x384xf32> to vector<2x128xf32>
    %479 = arith.mulf %475, %478 : vector<2x128xf32>
    %480 = arith.addf %477, %479 : vector<2x128xf32>
    %481 = math.tanh %480 : vector<2x128xf32>
    %cst_127 = arith.constant 1.000000e+00 : f32
    %482 = vector.broadcast %cst_127 : f32 to vector<2x128xf32>
    %483 = arith.subf %482, %476 : vector<2x128xf32>
    %484 = arith.mulf %483, %481 : vector<2x128xf32>
    %485 = arith.mulf %476, %462 : vector<2x128xf32>
    %486 = arith.addf %484, %485 : vector<2x128xf32>
    %487 = vector.extract_strided_slice %364 {offsets = [10, 0], sizes = [2, 384], strides = [1, 1]} : vector<12x384xf32> to vector<2x384xf32>
    %cst_128 = arith.constant dense<0.000000e+00> : vector<2x384xf32>
    %488 = tpu.matmul %486, %365, %cst_128 {dimension_numbers = #tpu.dot_dimension_numbers<[1], [0], [0], [1], [0, 0, 1, 1], [], []>} : vector<2x128xf32>, vector<128x384xf32>, vector<2x384xf32> -> vector<2x384xf32>
    %489 = vector.broadcast %366 : vector<1x384xf32> to vector<2x384xf32>
    %490 = arith.addf %488, %489 : vector<2x384xf32>
    %491 = vector.extract_strided_slice %487 {offsets = [0, 0], sizes = [2, 256], strides = [1, 1]} : vector<2x384xf32> to vector<2x256xf32>
    %492 = vector.extract_strided_slice %490 {offsets = [0, 0], sizes = [2, 256], strides = [1, 1]} : vector<2x384xf32> to vector<2x256xf32>
    %493 = arith.addf %491, %492 : vector<2x256xf32>
    %494 = arith.negf %493 : vector<2x256xf32>
    %495 = math.exp %494 : vector<2x256xf32>
    %cst_129 = arith.constant 1.000000e+00 : f32
    %496 = vector.broadcast %cst_129 : f32 to vector<2x256xf32>
    %497 = arith.addf %496, %495 : vector<2x256xf32>
    %498 = arith.divf %496, %497 : vector<2x256xf32>
    %499 = vector.extract_strided_slice %498 {offsets = [0, 0], sizes = [2, 128], strides = [1, 1]} : vector<2x256xf32> to vector<2x128xf32>
    %500 = vector.extract_strided_slice %498 {offsets = [0, 128], sizes = [2, 128], strides = [1, 1]} : vector<2x256xf32> to vector<2x128xf32>
    %501 = vector.extract_strided_slice %487 {offsets = [0, 256], sizes = [2, 128], strides = [1, 1]} : vector<2x384xf32> to vector<2x128xf32>
    %502 = vector.extract_strided_slice %490 {offsets = [0, 256], sizes = [2, 128], strides = [1, 1]} : vector<2x384xf32> to vector<2x128xf32>
    %503 = arith.mulf %499, %502 : vector<2x128xf32>
    %504 = arith.addf %501, %503 : vector<2x128xf32>
    %505 = math.tanh %504 : vector<2x128xf32>
    %cst_130 = arith.constant 1.000000e+00 : f32
    %506 = vector.broadcast %cst_130 : f32 to vector<2x128xf32>
    %507 = arith.subf %506, %500 : vector<2x128xf32>
    %508 = arith.mulf %507, %505 : vector<2x128xf32>
    %509 = arith.mulf %500, %486 : vector<2x128xf32>
    %510 = arith.addf %508, %509 : vector<2x128xf32>
    %511 = tpu.iota {dimensions = array<i32: 0>} : vector<12x1xi32>
    %cst_131 = arith.constant 0.000000e+00 : f32
    %512 = vector.broadcast %cst_131 : f32 to vector<12x128xf32>
    %c0_i32_132 = arith.constant 0 : i32
    %513 = vector.broadcast %c0_i32_132 : i32 to vector<12x1xi32>
    %514 = arith.cmpi eq, %511, %513 : vector<12x1xi32>
    %515 = vector.extract_strided_slice %390 {offsets = [0, 0], sizes = [1, 128], strides = [1, 1]} : vector<2x128xf32> to vector<1x128xf32>
    %516 = vector.shape_cast %514 : vector<12x1xi1> to vector<12x1xi1>
    %517 = vector.broadcast %516 : vector<12x1xi1> to vector<12x128xi1>
    %518 = vector.shape_cast %515 : vector<1x128xf32> to vector<1x128xf32>
    %519 = vector.broadcast %518 : vector<1x128xf32> to vector<12x128xf32>
    %520 = arith.select %517, %519, %512 : vector<12x128xi1>, vector<12x128xf32>
    %c1_i32_133 = arith.constant 1 : i32
    %521 = vector.broadcast %c1_i32_133 : i32 to vector<12x1xi32>
    %522 = arith.cmpi eq, %511, %521 : vector<12x1xi32>
    %523 = vector.extract_strided_slice %414 {offsets = [0, 0], sizes = [1, 128], strides = [1, 1]} : vector<2x128xf32> to vector<1x128xf32>
    %524 = vector.shape_cast %522 : vector<12x1xi1> to vector<12x1xi1>
    %525 = vector.broadcast %524 : vector<12x1xi1> to vector<12x128xi1>
    %526 = vector.shape_cast %523 : vector<1x128xf32> to vector<1x128xf32>
    %527 = vector.broadcast %526 : vector<1x128xf32> to vector<12x128xf32>
    %528 = arith.select %525, %527, %520 : vector<12x128xi1>, vector<12x128xf32>
    %c2_i32_134 = arith.constant 2 : i32
    %529 = vector.broadcast %c2_i32_134 : i32 to vector<12x1xi32>
    %530 = arith.cmpi eq, %511, %529 : vector<12x1xi32>
    %531 = vector.extract_strided_slice %438 {offsets = [0, 0], sizes = [1, 128], strides = [1, 1]} : vector<2x128xf32> to vector<1x128xf32>
    %532 = vector.shape_cast %530 : vector<12x1xi1> to vector<12x1xi1>
    %533 = vector.broadcast %532 : vector<12x1xi1> to vector<12x128xi1>
    %534 = vector.shape_cast %531 : vector<1x128xf32> to vector<1x128xf32>
    %535 = vector.broadcast %534 : vector<1x128xf32> to vector<12x128xf32>
    %536 = arith.select %533, %535, %528 : vector<12x128xi1>, vector<12x128xf32>
    %c3_i32_135 = arith.constant 3 : i32
    %537 = vector.broadcast %c3_i32_135 : i32 to vector<12x1xi32>
    %538 = arith.cmpi eq, %511, %537 : vector<12x1xi32>
    %539 = vector.extract_strided_slice %462 {offsets = [0, 0], sizes = [1, 128], strides = [1, 1]} : vector<2x128xf32> to vector<1x128xf32>
    %540 = vector.shape_cast %538 : vector<12x1xi1> to vector<12x1xi1>
    %541 = vector.broadcast %540 : vector<12x1xi1> to vector<12x128xi1>
    %542 = vector.shape_cast %539 : vector<1x128xf32> to vector<1x128xf32>
    %543 = vector.broadcast %542 : vector<1x128xf32> to vector<12x128xf32>
    %544 = arith.select %541, %543, %536 : vector<12x128xi1>, vector<12x128xf32>
    %c4_i32_136 = arith.constant 4 : i32
    %545 = vector.broadcast %c4_i32_136 : i32 to vector<12x1xi32>
    %546 = arith.cmpi eq, %511, %545 : vector<12x1xi32>
    %547 = vector.extract_strided_slice %486 {offsets = [0, 0], sizes = [1, 128], strides = [1, 1]} : vector<2x128xf32> to vector<1x128xf32>
    %548 = vector.shape_cast %546 : vector<12x1xi1> to vector<12x1xi1>
    %549 = vector.broadcast %548 : vector<12x1xi1> to vector<12x128xi1>
    %550 = vector.shape_cast %547 : vector<1x128xf32> to vector<1x128xf32>
    %551 = vector.broadcast %550 : vector<1x128xf32> to vector<12x128xf32>
    %552 = arith.select %549, %551, %544 : vector<12x128xi1>, vector<12x128xf32>
    %c5_i32_137 = arith.constant 5 : i32
    %553 = vector.broadcast %c5_i32_137 : i32 to vector<12x1xi32>
    %554 = arith.cmpi eq, %511, %553 : vector<12x1xi32>
    %555 = vector.extract_strided_slice %510 {offsets = [0, 0], sizes = [1, 128], strides = [1, 1]} : vector<2x128xf32> to vector<1x128xf32>
    %556 = vector.shape_cast %554 : vector<12x1xi1> to vector<12x1xi1>
    %557 = vector.broadcast %556 : vector<12x1xi1> to vector<12x128xi1>
    %558 = vector.shape_cast %555 : vector<1x128xf32> to vector<1x128xf32>
    %559 = vector.broadcast %558 : vector<1x128xf32> to vector<12x128xf32>
    %560 = arith.select %557, %559, %552 : vector<12x128xi1>, vector<12x128xf32>
    %c6_i32_138 = arith.constant 6 : i32
    %561 = vector.broadcast %c6_i32_138 : i32 to vector<12x1xi32>
    %562 = arith.cmpi eq, %511, %561 : vector<12x1xi32>
    %563 = vector.extract_strided_slice %390 {offsets = [1, 0], sizes = [1, 128], strides = [1, 1]} : vector<2x128xf32> to vector<1x128xf32>
    %564 = vector.shape_cast %562 : vector<12x1xi1> to vector<12x1xi1>
    %565 = vector.broadcast %564 : vector<12x1xi1> to vector<12x128xi1>
    %566 = vector.shape_cast %563 : vector<1x128xf32> to vector<1x128xf32>
    %567 = vector.broadcast %566 : vector<1x128xf32> to vector<12x128xf32>
    %568 = arith.select %565, %567, %560 : vector<12x128xi1>, vector<12x128xf32>
    %c7_i32_139 = arith.constant 7 : i32
    %569 = vector.broadcast %c7_i32_139 : i32 to vector<12x1xi32>
    %570 = arith.cmpi eq, %511, %569 : vector<12x1xi32>
    %571 = vector.extract_strided_slice %414 {offsets = [1, 0], sizes = [1, 128], strides = [1, 1]} : vector<2x128xf32> to vector<1x128xf32>
    %572 = vector.shape_cast %570 : vector<12x1xi1> to vector<12x1xi1>
    %573 = vector.broadcast %572 : vector<12x1xi1> to vector<12x128xi1>
    %574 = vector.shape_cast %571 : vector<1x128xf32> to vector<1x128xf32>
    %575 = vector.broadcast %574 : vector<1x128xf32> to vector<12x128xf32>
    %576 = arith.select %573, %575, %568 : vector<12x128xi1>, vector<12x128xf32>
    %c8_i32_140 = arith.constant 8 : i32
    %577 = vector.broadcast %c8_i32_140 : i32 to vector<12x1xi32>
    %578 = arith.cmpi eq, %511, %577 : vector<12x1xi32>
    %579 = vector.extract_strided_slice %438 {offsets = [1, 0], sizes = [1, 128], strides = [1, 1]} : vector<2x128xf32> to vector<1x128xf32>
    %580 = vector.shape_cast %578 : vector<12x1xi1> to vector<12x1xi1>
    %581 = vector.broadcast %580 : vector<12x1xi1> to vector<12x128xi1>
    %582 = vector.shape_cast %579 : vector<1x128xf32> to vector<1x128xf32>
    %583 = vector.broadcast %582 : vector<1x128xf32> to vector<12x128xf32>
    %584 = arith.select %581, %583, %576 : vector<12x128xi1>, vector<12x128xf32>
    %c9_i32_141 = arith.constant 9 : i32
    %585 = vector.broadcast %c9_i32_141 : i32 to vector<12x1xi32>
    %586 = arith.cmpi eq, %511, %585 : vector<12x1xi32>
    %587 = vector.extract_strided_slice %462 {offsets = [1, 0], sizes = [1, 128], strides = [1, 1]} : vector<2x128xf32> to vector<1x128xf32>
    %588 = vector.shape_cast %586 : vector<12x1xi1> to vector<12x1xi1>
    %589 = vector.broadcast %588 : vector<12x1xi1> to vector<12x128xi1>
    %590 = vector.shape_cast %587 : vector<1x128xf32> to vector<1x128xf32>
    %591 = vector.broadcast %590 : vector<1x128xf32> to vector<12x128xf32>
    %592 = arith.select %589, %591, %584 : vector<12x128xi1>, vector<12x128xf32>
    %c10_i32_142 = arith.constant 10 : i32
    %593 = vector.broadcast %c10_i32_142 : i32 to vector<12x1xi32>
    %594 = arith.cmpi eq, %511, %593 : vector<12x1xi32>
    %595 = vector.extract_strided_slice %486 {offsets = [1, 0], sizes = [1, 128], strides = [1, 1]} : vector<2x128xf32> to vector<1x128xf32>
    %596 = vector.shape_cast %594 : vector<12x1xi1> to vector<12x1xi1>
    %597 = vector.broadcast %596 : vector<12x1xi1> to vector<12x128xi1>
    %598 = vector.shape_cast %595 : vector<1x128xf32> to vector<1x128xf32>
    %599 = vector.broadcast %598 : vector<1x128xf32> to vector<12x128xf32>
    %600 = arith.select %597, %599, %592 : vector<12x128xi1>, vector<12x128xf32>
    %c11_i32_143 = arith.constant 11 : i32
    %601 = vector.broadcast %c11_i32_143 : i32 to vector<12x1xi32>
    %602 = arith.cmpi eq, %511, %601 : vector<12x1xi32>
    %603 = vector.extract_strided_slice %510 {offsets = [1, 0], sizes = [1, 128], strides = [1, 1]} : vector<2x128xf32> to vector<1x128xf32>
    %604 = vector.shape_cast %602 : vector<12x1xi1> to vector<12x1xi1>
    %605 = vector.broadcast %604 : vector<12x1xi1> to vector<12x128xi1>
    %606 = vector.shape_cast %603 : vector<1x128xf32> to vector<1x128xf32>
    %607 = vector.broadcast %606 : vector<1x128xf32> to vector<12x128xf32>
    %608 = arith.select %605, %607, %600 : vector<12x128xi1>, vector<12x128xf32>
    %c0_144 = arith.constant 0 : index
    %c0_145 = arith.constant 0 : index
    %609 = vector.load %arg14[%c0_144, %c0_145] : memref<128x128xf32, #tpu.memory_space<vmem>>, vector<128x128xf32>
    %cst_146 = arith.constant dense<0.000000e+00> : vector<12x128xf32>
    %610 = tpu.matmul %608, %609, %cst_146 {dimension_numbers = #tpu.dot_dimension_numbers<[1], [0], [0], [1], [0, 0, 1, 1], [], []>} : vector<12x128xf32>, vector<128x128xf32>, vector<12x128xf32> -> vector<12x128xf32>
    %c0_147 = arith.constant 0 : index
    %c0_148 = arith.constant 0 : index
    %611 = vector.load %arg15[%c0_147, %c0_148] : memref<1x128xf32, #tpu.memory_space<vmem>>, vector<1x128xf32>
    %612 = vector.broadcast %611 : vector<1x128xf32> to vector<12x128xf32>
    %613 = arith.addf %610, %612 : vector<12x128xf32>
    %cst_149 = arith.constant dense<0xFF800000> : vector<12xf32>
    %614 = vector.multi_reduction <maximumf>, %613, %cst_149 [1] : vector<12x128xf32> to vector<12xf32>
    %615 = vector.shape_cast %614 : vector<12xf32> to vector<12x1xf32>
    %616 = vector.broadcast %615 : vector<12x1xf32> to vector<12x128xf32>
    %617 = arith.subf %613, %616 : vector<12x128xf32>
    %618 = math.exp %617 : vector<12x128xf32>
    %cst_150 = arith.constant dense<0.000000e+00> : vector<12xf32>
    %619 = vector.multi_reduction <add>, %618, %cst_150 [1] : vector<12x128xf32> to vector<12xf32>
    %620 = vector.shape_cast %619 : vector<12xf32> to vector<12x1xf32>
    %621 = math.log %620 : vector<12x1xf32>
    %622 = vector.broadcast %621 : vector<12x1xf32> to vector<12x128xf32>
    %623 = arith.subf %617, %622 : vector<12x128xf32>
    %c0_151 = arith.constant 0 : index
    %c0_152 = arith.constant 0 : index
    %624 = vector.load %arg16[%c0_151, %c0_152] : memref<12x128xf32, #tpu.memory_space<vmem>>, vector<12x128xf32>
    tpu.vector_store %arg16[%c0_151, %c0_152], %623 {strides = array<i32>} : memref<12x128xf32, #tpu.memory_space<vmem>>, vector<12x128xf32>,
    return
  }
}

</mosaic_0001>

<bundles_post_ra>
// kernel: model_forward.1
= control target key start
LH: loop header
LB: loop body
LE: loop exit
PB: predicated region body
PF: predicated region fallthrough
CT: control target
= control target key end

     0   :  { %s4749_s0 = inlined_call_operand.vmem [shape: s32[2,8], index: 0, kind: input, shape index: {}]   ;;  %s4750_s1 = inlined_call_operand.vmem [shape: s32[2,6], index: 1, kind: input, shape index: {}]   ;;  %s4751_s2 = inlined_call_operand.hbm [shape: f32[2,8], index: 2, kind: input, shape index: {}]   ;;  %s4752_s3 = inlined_call_operand.vmem [shape: f32[2,8], index: 3, kind: input, shape index: {}]   ;;  %s4753_s4 = inlined_call_operand.hbm [shape: f32[64,384], index: 4, kind: input, shape index: {}]   ;;  %s4754_s5 = inlined_call_operand.hbm [shape: f32[128,384], index: 5, kind: input, shape index: {}]   ;;  %s4755_s6 = inlined_call_operand.hbm [shape: f32[1,384], index: 6, kind: input, shape index: {}]   ;;  %s4756_s7 = inlined_call_operand.hbm [shape: f32[128,128], index: 7, kind: input, shape index: {}]   ;;  %s4757_s8 = inlined_call_operand.vmem [shape: f32[8,128], index: 8, kind: input, shape index: {}]   ;;  %s4758_s9 = inlined_call_operand.hbm [shape: f32[8,128], index: 9, kind: input, shape index: {}]   ;;  %s4759_s10 = inlined_call_operand.hbm [shape: f32[1,128], index: 10, kind: input, shape index: {}]   ;;  %s4760_s11 = inlined_call_operand.hbm [shape: f32[64,384], index: 11, kind: input, shape index: {}]   ;;  %s4761_s12 = inlined_call_operand.hbm [shape: f32[128,384], index: 12, kind: input, shape index: {}]   ;;  %s4762_s13 = inlined_call_operand.hbm [shape: f32[1,384], index: 13, kind: input, shape index: {}]   ;;  %s4763_s14 = inlined_call_operand.hbm [shape: f32[128,128], index: 14, kind: input, shape index: {}]   ;;  %s4764_s15 = inlined_call_operand.hbm [shape: f32[1,128], index: 15, kind: input, shape index: {}]   ;;  %s4765_s16 = inlined_call_operand.vmem [shape: f32[12,128], index: 16, kind: output, shape index: {}]  }
   0x1   :  { %4837 = sst [smem:[#allocation54_spill]] %s4749_s0 }
   0x2   :  { %21 = vsyncpa [#allocation4], 0 }
   0x3   :  { %22 = vsyncpa [#allocation6], 0 }
   0x4   :  { %23 = vsyncpa [#allocation3], 0 }
   0x5   :  { %24 = vsyncpa [#allocation9], 0 }
   0x6   :  { %25 = vsyncpa [#allocation12], 0 }
   0x7   :  { %26 = vsyncpa [#allocation15], 0 }
   0x8   :  { %27 = vsyncpa [#allocation18], 0 }
   0x9   :  { %28 = vsyncpa [#allocation21], 0  ;;  %s65_s23 = sshll.u32 %s4753_s4, 4  ;;  %s66_s23 = int_to_ptr.hbm [resolvable:$true] %s65_s23 }
   0xa   :  { %29 = vsyncpa [#allocation24], 0  ;;  %s3240_s24 = smov [#allocation8]   ;;  %s92_s28 = sshll.u32 %s4755_s6, 4  ;;  %s93_s28 = int_to_ptr.hbm [resolvable:$true] %s92_s28 }
   0xb   :  { %s67_s25 = sshll.u32 %s3240_s24, 4  ;;  %s3241_s29 = smov 384   ;;  %s68_s25 = int_to_ptr.vmem [resolvable:$true] %s67_s25 }
   0xc   :  { %s3242_s30 = smov 24   ;;  %s3243_s0 = smov [#allocation11]  }
   0xd   :  { %73 = dma.hbm_to_vmem [thread:$0]  %s66_s23, 3072, %s68_s25, [#allocation9], %s3241_s29, %s3241_s29, %s3242_s30  }
   0xe   :  { %s94_s17 = sshll.u32 %s3243_s0, 4  ;;  %s118_s19 = sshll.u32 %s4758_s9, 4  ;;  %s95_s17 = int_to_ptr.vmem [resolvable:$true] %s94_s17  ;;  %s119_s19 = int_to_ptr.hbm [resolvable:$true] %s118_s19 }
   0xf   :  { %97 = dma.hbm_to_vmem [thread:$0]  %s93_s28, 48, %s95_s17, [#allocation12]  }
  0x10   :  { %s139_s6 = sshll.u32 %s4760_s11, 4  ;;  %s3244_s22 = smov [#allocation14]   ;;  %s140_s6 = int_to_ptr.hbm [resolvable:$true] %s139_s6 }
  0x11   :  { %s120_s24 = sshll.u32 %s3244_s22, 4  ;;  %s3245_s23 = smov [#allocation17]   ;;  %s121_s24 = int_to_ptr.vmem [resolvable:$true] %s120_s24 }
  0x12   :  { %123 = dma.hbm_to_vmem [thread:$0]  %s119_s19, 128, %s121_s24, [#allocation15]  }
  0x13   :  { %s141_s25 = sshll.u32 %s3245_s23, 4  ;;  %s166_s0 = sshll.u32 %s4762_s13, 4  ;;  %s142_s25 = int_to_ptr.vmem [resolvable:$true] %s141_s25  ;;  %s167_s0 = int_to_ptr.hbm [resolvable:$true] %s166_s0 }
  0x14   :  { %147 = dma.hbm_to_vmem [thread:$0]  %s140_s6, 3072, %s142_s25, [#allocation18], %s3241_s29, %s3241_s29, %s3242_s30  }
  0x15   :  { %s4838_s11 = sld [smem:[#allocation54_spill]]  ;;  %s3246_s18 = smov [#allocation20]  }
  0x16   :  { %s168_s4 = sshll.u32 %s3246_s18, 4  ;;  %s3247_s19 = smov [#allocation2]   ;;  %s169_s4 = int_to_ptr.vmem [resolvable:$true] %s168_s4 }
  0x17   :  { %171 = dma.hbm_to_vmem [thread:$0]  %s167_s0, 48, %s169_s4, [#allocation21]  }
  0x18   :  { %s44_s13 = sshll.u32 %s4750_s1, 4  ;;  %s53_s6 = sshll.u32 %s4751_s2, 4  ;;  %s45_s13 = int_to_ptr.vmem [resolvable:$true] %s44_s13  ;;  %s54_s6 = int_to_ptr.hbm [resolvable:$true] %s53_s6 }
  0x19   :  { %s3248_s23 = smov [#allocation5]   ;;  %s3249_s25 = smov [#allocation7]  }
  0x1a   :  { %47 = dma.vmem_to_smem %s45_s13, 32, %s3248_s23, [#allocation6]  }
  0x1b   :  { %s35_s17 = sshll.u32 %s4838_s11, 4  ;;  %s55_s26 = sshll.u32 %s3249_s25, 4  ;;  %s36_s17 = int_to_ptr.vmem [resolvable:$true] %s35_s17  ;;  %s56_s26 = int_to_ptr.vmem [resolvable:$true] %s55_s26 }
  0x1c   :  { %38 = dma.vmem_to_smem %s36_s17, 32, %s3247_s19, [#allocation4]  }
  0x1d   :  { %s78_s0 = sshll.u32 %s4754_s5, 4  ;;  %s102_s1 = sshll.u32 %s4756_s7, 4  ;;  %s79_s0 = int_to_ptr.hbm [resolvable:$true] %s78_s0  ;;  %s103_s1 = int_to_ptr.hbm [resolvable:$true] %s102_s1 }
  0x1e   :  { %58 = dma.hbm_to_vmem [thread:$0]  %s54_s6, 32, %s56_s26, [#allocation3]  }
  0x1f   :  { %s3250_s17 = smov [#allocation10]   ;;  %s3251_s2 = smov [#allocation13]  }
  0x20   :  { %s80_s18 = sshll.u32 %s3250_s17, 4  ;;  %s104_s4 = sshll.u32 %s3251_s2, 4  ;;  %s81_s18 = int_to_ptr.vmem [resolvable:$true] %s80_s18  ;;  %s105_s4 = int_to_ptr.vmem [resolvable:$true] %s104_s4 }
  0x21   :  { %86 = dma.hbm_to_vmem [thread:$0]  %s79_s0, 6144, %s81_s18, [#allocation9], %s3241_s29, %s3241_s29, %s3242_s30  }
  0x22   :  { %s3252_s19 = smov 128   ;;  %s3253_s5 = smov 8  }
  0x23   :  { %110 = dma.hbm_to_vmem [thread:$0]  %s103_s1, 2048, %s105_s4, [#allocation12], %s3252_s19, %s3252_s19, %s3253_s5  }
  0x24   :  { %s129_s13 = sshll.u32 %s4759_s10, 4  ;;  %s3254_s7 = smov [#allocation16]   ;;  %s130_s13 = int_to_ptr.hbm [resolvable:$true] %s129_s13 }
  0x25   :  { %s131_s22 = sshll.u32 %s3254_s7, 4  ;;  %s152_s23 = sshll.u32 %s4761_s12, 4  ;;  %s132_s22 = int_to_ptr.vmem [resolvable:$true] %s131_s22  ;;  %s153_s23 = int_to_ptr.hbm [resolvable:$true] %s152_s23 }
  0x26   :  { %134 = dma.hbm_to_vmem [thread:$0]  %s130_s13, 16, %s132_s22, [#allocation15]  }
  0x27   :  { %s3255_s25 = smov [#allocation19]   ;;  %s176_s0 = sshll.u32 %s4763_s14, 4  ;;  %s177_s0 = int_to_ptr.hbm [resolvable:$true] %s176_s0 }
  0x28   :  { %s154_s26 = sshll.u32 %s3255_s25, 4  ;;  %s190_s11 = sshll.u32 %s4764_s15, 4  ;;  %s155_s26 = int_to_ptr.vmem [resolvable:$true] %s154_s26  ;;  %s191_s11 = int_to_ptr.hbm [resolvable:$true] %s190_s11 }
  0x29   :  { %160 = dma.hbm_to_vmem [thread:$0]  %s153_s23, 6144, %s155_s26, [#allocation18], %s3241_s29, %s3241_s29, %s3242_s30  }
  0x2a   :  { %s3256_s1 = smov [#allocation22]   ;;  %s3257_s17 = smov [#allocation23]  }
  0x2b   :  { %s178_s12 = sshll.u32 %s3256_s1, 4  ;;  %s192_s18 = sshll.u32 %s3257_s17, 4  ;;  %s179_s12 = int_to_ptr.vmem [resolvable:$true] %s178_s12  ;;  %s193_s18 = int_to_ptr.vmem [resolvable:$true] %s192_s18 }
  0x2c   :  { %184 = dma.hbm_to_vmem [thread:$0]  %s177_s0, 2048, %s179_s12, [#allocation21], %s3252_s19, %s3252_s19, %s3253_s5  }
  0x2d   :  { %195 = dma.hbm_to_vmem [thread:$0]  %s191_s11, 16, %s193_s18, [#allocation24]  }
  0x2e   :  { %3222 = dma.done.wait [#allocation4], 32  }
  0x2f   :  { %3223 = vsyncadd [#allocation4], 4294967264 }
  0x30   :  { %3224 = dma.done.wait [#allocation6], 32  }
  0x31   :  { %3225 = vsyncadd [#allocation6], 4294967264 }
  0x32   :  { %3226 = dma.done.wait [#allocation3], 32  }
  0x33   :  { %3227 = vsyncadd [#allocation3], 4294967264 }
  0x34   :  { %3228 = dma.done.wait [#allocation9], 9216  }
  0x35   :  { %3229 = vsyncadd [#allocation9], 4294958080 }
  0x36   :  { %3230 = dma.done.wait [#allocation12], 2096  }
  0x37   :  { %3231 = vsyncadd [#allocation12], 4294965200 }
  0x38   :  { %3232 = dma.done.wait [#allocation15], 144  }
  0x39   :  { %3233 = vsyncadd [#allocation15], 4294967152 }
  0x3a   :  { %3234 = dma.done.wait [#allocation18], 9216  }
  0x3b   :  { %3235 = vsyncadd [#allocation18], 4294958080 }
  0x3c   :  { %3236 = dma.done.wait [#allocation21], 2096  }
  0x3d   :  { %3237 = vsyncadd [#allocation21], 4294965200 }
  0x3e   :  { %3238 = dma.done.wait [#allocation24], 16  }
  0x3f   :  { %3239 = vsyncadd [#allocation24], 4294967280 }
  0x40   :  { %252 = sfence }
  0x41   :  { %v254_v0 = vld [vmem:[%s4757_s8] sm:$0xff]  ;;  %v437_v1 = vld [vmem:[#allocation8 + $0xa8] sm:$0xff]  ;;  %s3401_s29 = sld [smem:[#allocation2]]  ;;  %v325_v3 = vlaneseq  ;;  %v434_v4 = vld [vmem:[#allocation8 + $0x90] sm:$0xff]  ;;  %vm257_vm0 = vcmask 64512   ;;  %vm440_vm9 = vcmask 523264  }
  0x42   :  { %v439_v2 = vld [vmem:[#allocation8 + $0xb8] sm:$0xff]  ;;  %299 = vmatpush.msra.mxu1 %v254_v0  ;;  %455 = vmatpush.msra.mxu2 %v437_v1  ;;  %v436_v5 = vld [vmem:[#allocation8 + $0xa0] sm:$0xff]  ;;  %s3403_s30 = sld [smem:[#allocation2 + $0x80]]  ;;  %v433_v8 = vld [vmem:[#allocation8 + $0x88] sm:$0xff]  ;;  %v4767_v51 = vmov 0.0  }
  0x43   :  { %v431_v6 = vld [vmem:[#allocation8 + $0x78] sm:$0xff]  ;;  %s3405_s2 = sld [smem:[#allocation2 + $0x1]]  ;;  %v3407_v7 = vshrl.u32 %v325_v3, 7  ;;  %v428_v9 = vld [vmem:[#allocation8 + $0x60] sm:$0xff]  ;;  %v430_v10 = vld [vmem:[#allocation8 + $0x70] sm:$0xff]  ;;  %v3448_v31 = vand.u32 127, %v325_v3 }
  0x44   :  { %501 = vmatpush.msrb.mxu1 %v439_v2  ;;  %456 = vmatpush.msra.mxu2 %v434_v4  ;;  %s3409_s8 = sld [smem:[#allocation2 + $0x81]]  ;;  %v256_v11 = vld [vmem:[#allocation14] sm:$0xff]  ;;  %v255_v13 = vld [vmem:[%s4752_s3] sm:$0x3]  ;;  %v422_v20 = vld [vmem:[#allocation8 + $0x30] sm:$0xff] }
  0x45   :  { %4839 = vst [vmem:[#allocation34_spill] sm:$0xff] %v3407_v7  ;;  %s3411_s4 = sld [smem:[#allocation2 + $0x2]]  ;;  %vm4794_vm1 = vcmp.eq.s32.totalorder %v3407_v7, 0  ;;  %vm4766_vm2 = vcmp.eq.s32.totalorder %v3407_v7, 1  ;;  %v425_v12 = vld [vmem:[#allocation8 + $0x48] sm:$0xff]  ;;  %276 = vmatpush.msra.mxu0 %v256_v11  ;;  %vm338_vm3 = vcmp.eq.s32.totalorder %v3407_v7, 2 }
  0x46   :  { %502 = vmatpush.msrb.mxu1 %v436_v5  ;;  %457 = vmatpush.msra.mxu2 %v431_v6  ;;  %s3414_s19 = sld [smem:[#allocation2 + $0x82]]  ;;  %v253_v14 = vld [vmem:[#allocation7] sm:$0x3]  ;;  %v3423_v17 = vld [vmem:[#allocation10 + $0x168] sm:$0xff]  ;;  %vm343_vm4 = vcmp.eq.s32.totalorder %v3407_v7, 3  ;;  %v424_v23 = vld [vmem:[#allocation8 + $0x40] sm:$0xff] }
  0x47   :  { %v330_v15 = vstv %s3401_s29  ;;  %v427_v16 = vld [vmem:[#allocation8 + $0x58] sm:$0xff]  ;;  %2614 = vmatmul.msk.f32.vlgmr.msra.gmra.mxu0 %vm257_vm0, %v255_v13  ;;  %s3425_s21 = sld [smem:[#allocation2 + $0x3]]  ;;  %2615 = vmatmul.msk.f32.vlgmr.msra.gmra.mxu1 %vm257_vm0, %v253_v14  ;;  %v3438_v24 = vld [vmem:[#allocation10 + $0x150] sm:$0xff]  ;;  %vm348_vm5 = vcmp.eq.s32.totalorder %v3407_v7, 4  ;;  %vm353_vm6 = vcmp.eq.s32.totalorder %v3407_v7, 5  ;;  %4840 = vst [vmem:[#allocation35_spill] sm:$0xff] %v3448_v31 }
  0x48   :  { %503 = vmatpush.msrb.mxu1 %v433_v8  ;;  %458 = vmatpush.msra.mxu2 %v428_v9  ;;  %v331_v18 = vsel %vm4794_vm1, %v330_v15, 0  ;;  %v335_v19 = vstv %s3403_s30  ;;  %s3430_s3 = sld [smem:[#allocation2 + $0x83]]  ;;  %v419_v27 = vld [vmem:[#allocation8 + $0x18] sm:$0xff]  ;;  %v438_v28 = vld [vmem:[#allocation8 + $0xb0] sm:$0xff]  ;;  %v421_v32 = vld [vmem:[#allocation8 + $0x28] sm:$0xff]  ;;  %vm358_vm7 = vcmp.eq.s32.totalorder %v3407_v7, 6 }
  0x49   :  { %v336_v21 = vsel %vm4766_vm2, %v335_v19, %v331_v18  ;;  %v340_v22 = vstv %s3405_s2  ;;  %679 = vmatpush.msrb.mxu0 %v3423_v17  ;;  %v3451_v33 = vld [vmem:[#allocation10 + $0x138] sm:$0xff]  ;;  %478 = vmatpush.msra.mxu3 %v438_v28  ;;  %s3457_s13 = sld [smem:[#allocation2 + $0x4]]  ;;  %v416_v37 = vld [vmem:[#allocation8] sm:$0xff]  ;;  %vm363_vm8 = vcmp.eq.s32.totalorder %v3407_v7, 7  ;;  %v3465_v40 = vadd.s32 8, %v3407_v7  ;;  %v418_v41 = vld [vmem:[#allocation8 + $0x10] sm:$0xff] }
  0x4a   :  { %504 = vmatpush.msrb.mxu1 %v430_v10  ;;  %459 = vmatpush.msra.mxu2 %v425_v12  ;;  %v341_v25 = vsel %vm338_vm3, %v340_v22, %v336_v21  ;;  %v345_v26 = vstv %s3409_s8  ;;  %v435_v34 = vld [vmem:[#allocation8 + $0x98] sm:$0xff]  ;;  %v432_v38 = vld [vmem:[#allocation8 + $0x80] sm:$0xff]  ;;  %s3462_s7 = sld [smem:[#allocation2 + $0x84]]  ;;  %v3468_v42 = vld [vmem:[#allocation10 + $0x170] sm:$0xff] }
  0x4b   :  { %v346_v29 = vsel %vm343_vm4, %v345_v26, %v341_v25  ;;  %v350_v30 = vstv %s3411_s4  ;;  %680 = vmatpush.msrb.mxu0 %v3438_v24  ;;  %4841 = vst [vmem:[#allocation36_spill] sm:$0xff] %v3465_v40  ;;  %v3470_v43 = vld [vmem:[#allocation10 + $0x120] sm:$0xff]  ;;  %479 = vmatpush.msra.mxu3 %v435_v34  ;;  %s3473_s22 = sld [smem:[#allocation2 + $0x5]]  ;;  %v429_v47 = vld [vmem:[#allocation8 + $0x68] sm:$0xff]  ;;  %v3481_v48 = vld [vmem:[#allocation10 + $0x158] sm:$0xff]  ;;  %vm369_vm10 = vcmp.eq.s32.totalorder %v3465_v40, 8 }
  0x4c   :  { %505 = vmatpush.msrb.mxu1 %v427_v16  ;;  %460 = vmatpush.msra.mxu2 %v422_v20  ;;  %v351_v35 = vsel %vm348_vm5, %v350_v30, %v346_v29  ;;  %v355_v36 = vstv %s3414_s19  ;;  %s3478_s24 = sld [smem:[#allocation2 + $0x85]]  ;;  %vm4805_vm12 = vcmp.eq.s32.totalorder %v3465_v40, 9  ;;  %v3494_v50 = vld [vmem:[#allocation10 + $0x140] sm:$0xff]  ;;  %v426_v53 = vld [vmem:[#allocation8 + $0x50] sm:$0xff]  ;;  %vm4802_vm13 = vcmp.eq.s32.totalorder %v3465_v40, 10  ;;  %v3513_v57 = vld [vmem:[#allocation10 + $0x128] sm:$0xff] }
  0x4d   :  { %v356_v39 = vsel %vm353_vm6, %v355_v36, %v351_v35  ;;  %681 = vmatpush.msrb.mxu0 %v3451_v33  ;;  %v360_v44 = vstv %s3425_s21  ;;  %480 = vmatpush.msra.mxu3 %v432_v38  ;;  %s3485_s6 = sld [smem:[#allocation2 + $0x6]]  ;;  %vm4799_vm14 = vcmp.eq.s32.totalorder %v3465_v40, 11  ;;  %v423_v58 = vld [vmem:[#allocation8 + $0x38] sm:$0xff]  ;;  %vm389_vm15 = vcmp.eq.s32.totalorder %v3465_v40, 12  ;;  %v3522_v61 = vld [vmem:[#allocation10 + $0x108] sm:$0xff]  ;;  %v3529_v0 = vld [vmem:[#allocation10 + $0x110] sm:$0xff] }
  0x4e   :  { %506 = vmatpush.msrb.mxu1 %v424_v23  ;;  %461 = vmatpush.msra.mxu2 %v419_v27  ;;  %v361_v45 = vsel %vm358_vm7, %v360_v44, %v356_v39  ;;  %v365_v46 = vstv %s3430_s3  ;;  %s3490_s23 = sld [smem:[#allocation2 + $0x86]]  ;;  %vm394_vm0 = vcmp.eq.s32.totalorder %v3465_v40, 13  ;;  %v420_v1 = vld [vmem:[#allocation8 + $0x20] sm:$0xff]  ;;  %v3537_v4 = vld [vmem:[#allocation10 + $0xf0] sm:$0xff]  ;;  %vm404_vm2 = vcmp.eq.s32.totalorder %v3465_v40, 15  ;;  %v3544_v8 = vld [vmem:[#allocation10 + $0xf8] sm:$0xff] }
  0x4f   :  { %682 = vmatpush.msrb.mxu0 %v3470_v43  ;;  %v366_v49 = vsel %vm363_vm8, %v365_v46, %v361_v45  ;;  %481 = vmatpush.msra.mxu3 %v429_v47  ;;  %s3499_s25 = sld [smem:[#allocation2 + $0x7]]  ;;  %v370_v54 = vstv %s3457_s13  ;;  %v417_v11 = vld [vmem:[#allocation8 + $0x8] sm:$0xff]  ;;  %v3551_v12 = vld [vmem:[#allocation10 + $0xd8] sm:$0xff]  ;;  %v3559_v16 = vld [vmem:[#allocation10 + $0xe0] sm:$0xff] }
  0x50   :  { %507 = vmatpush.msrb.mxu1 %v421_v32  ;;  %462 = vmatpush.msra.mxu2 %v416_v37  ;;  %vm410_vm11 = vcmp.eq.s32.totalorder %v3448_v31, %v366_v49  ;;  %s3506_s26 = sld [smem:[#allocation2 + $0x87]]  ;;  %v372_v55 = vsel %vm369_vm10, %v370_v54, 0  ;;  %v375_v56 = vstv %s3462_s7  ;;  %v3556_v15 = vld [vmem:[#allocation10 + $0x178] sm:$0xff]  ;;  %v3563_v19 = vld [vmem:[#allocation10 + $0xc8] sm:$0xff]  ;;  %v3569_v21 = vld [vmem:[#allocation10 + $0x160] sm:$0xff] }
  0x51   :  { %v3497_v52 = vsel %vm410_vm11, 1.0, %v4767_v51  ;;  %v377_v59 = vsel %vm4805_vm12, %v375_v56, %v372_v55  ;;  %v380_v60 = vstv %s3473_s22  ;;  %482 = vmatpush.msra.mxu3 %v426_v53  ;;  %vm399_vm11 = vcmp.eq.s32.totalorder %v3465_v40, 14  ;;  %683 = vmatpush.msrb.mxu0 %v3522_v61  ;;  %v3572_v22 = vld [vmem:[#allocation10 + $0xc0] sm:$0xff]  ;;  %v3576_v23 = vld [vmem:[#allocation10 + $0xb0] sm:$0xff]  ;;  %v3579_v25 = vld [vmem:[#allocation10 + $0x148] sm:$0xff]  ;;  %s1551_s27 = sld [smem:[#allocation5]] }
  0x52   :  { %508 = vmatpush.msrb.mxu1 %v418_v41  ;;  %592 = vmatpush.msrb.mxu2 %v3468_v42  ;;  %v382_v62 = vsel %vm4802_vm13, %v380_v60, %v377_v59  ;;  %v385_v63 = vstv %s3478_s24  ;;  %v3582_v26 = vld [vmem:[#allocation10 + $0xa8] sm:$0xff]  ;;  %v3586_v27 = vld [vmem:[#allocation10 + $0x98] sm:$0xff]  ;;  %v3588_v28 = vld [vmem:[#allocation10 + $0x130] sm:$0xff]  ;;  %s4147_s9 = sld [smem:[#allocation5 + $0x80]] }
  0x53   :  { %2637 = vmatmul.msk.f32.vlgmr.msrb.gmra.mxu1 %vm440_vm9, %v3497_v52  ;;  %2633 = vmatmul.msk.f32.vlgmr.msra.gmra.mxu2 %vm440_vm9, %v3497_v52  ;;  %v387_v2 = vsel %vm4799_vm14, %v385_v63, %v382_v62  ;;  %v390_v3 = vstv %s3485_s6  ;;  %v3593_v29 = vld [vmem:[#allocation10 + $0x90] sm:$0xff]  ;;  %v3597_v30 = vld [vmem:[#allocation10 + $0x80] sm:$0xff]  ;;  %v3599_v32 = vld [vmem:[#allocation10 + $0x118] sm:$0xff]  ;;  %s4149_s0 = sld [smem:[#allocation5 + $0x1]] }
  0x54   :  { %572 = vmatpush.msra.mxu1 %v3423_v17  ;;  %593 = vmatpush.msrb.mxu2 %v3481_v48  ;;  %v392_v5 = vsel %vm389_vm15, %v390_v3, %v387_v2  ;;  %v395_v6 = vstv %s3490_s23  ;;  %v3603_v34 = vld [vmem:[#allocation10 + $0x78] sm:$0xff]  ;;  %v3607_v35 = vld [vmem:[#allocation10 + $0x68] sm:$0xff]  ;;  %v3609_v36 = vld [vmem:[#allocation10 + $0x100] sm:$0xff]  ;;  %s4151_s10 = sld [smem:[#allocation5 + $0x81]] }
  0x55   :  { %483 = vmatpush.msra.mxu3 %v423_v58  ;;  %v397_v9 = vsel %vm394_vm0, %v395_v6, %v392_v5  ;;  %v400_v10 = vstv %s3499_s25  ;;  %684 = vmatpush.msrb.mxu0 %v3537_v4  ;;  %v3613_v37 = vld [vmem:[#allocation10 + $0x60] sm:$0xff]  ;;  %v3617_v38 = vld [vmem:[#allocation10 + $0x50] sm:$0xff]  ;;  %v3619_v39 = vld [vmem:[#allocation10 + $0xe8] sm:$0xff]  ;;  %s4153_s28 = sld [smem:[#allocation5 + $0x2]] }
  0x56   :  { %573 = vmatpush.msra.mxu1 %v3438_v24  ;;  %594 = vmatpush.msrb.mxu2 %v3494_v50  ;;  %v402_v13 = vsel %vm399_vm11, %v400_v10, %v397_v9  ;;  %v405_v14 = vstv %s3506_s26  ;;  %v3623_v41 = vld [vmem:[#allocation10 + $0x48] sm:$0xff]  ;;  %v3627_v44 = vld [vmem:[#allocation10 + $0x38] sm:$0xff]  ;;  %v3629_v45 = vld [vmem:[#allocation10 + $0xd0] sm:$0xff]  ;;  %s4160_s11 = sld [smem:[#allocation5 + $0x82]] }
  0x57   :  { %484 = vmatpush.msra.mxu3 %v420_v1  ;;  %v407_v18 = vsel %vm404_vm2, %v405_v14, %v402_v13  ;;  %685 = vmatpush.msrb.mxu0 %v3551_v12  ;;  %4842 = vst [vmem:[#allocation37_spill] sm:$0xff] %v3627_v44  ;;  %v3633_v46 = vld [vmem:[#allocation10 + $0x30] sm:$0xff]  ;;  %v3637_v47 = vld [vmem:[#allocation10 + $0x20] sm:$0xff]  ;;  %v3639_v49 = vld [vmem:[#allocation10 + $0xb8] sm:$0xff]  ;;  %s2660_s1 = sld [smem:[#allocation5 + $0x3]] }
  0x58   :  { %574 = vmatpush.msra.mxu1 %v3451_v33  ;;  %595 = vmatpush.msrb.mxu2 %v3513_v57  ;;  %vm411_vm15 = vcmp.eq.s32.totalorder %v3448_v31, %v407_v18  ;;  %4843 = vst [vmem:[#allocation38_spill] sm:$0xff] %v3633_v46  ;;  %v3647_v53 = vld [vmem:[#allocation10 + $0x8] sm:$0xff]  ;;  %v3649_v54 = vld [vmem:[#allocation10 + $0xa0] sm:$0xff]  ;;  %v3664_v58 = vld [vmem:[#allocation10 + $0x70] sm:$0xff]  ;;  %s2661_s12 = sld [smem:[#allocation5 + $0x83]] }
  0x59   :  { %485 = vmatpush.msra.mxu3 %v417_v11  ;;  %v2632_v20 = vsel %vm411_vm15, 1.0, %v4767_v51  ;;  %686 = vmatpush.msrb.mxu0 %v3572_v22  ;;  %4844 = vst [vmem:[#allocation39_spill] sm:$0xff] %v3637_v47  ;;  %v3653_v55 = vld [vmem:[#allocation10] sm:$0xff]  ;;  %v3657_v56 = vld [vmem:[#allocation10 + $0x88] sm:$0xff]  ;;  %v3668_v59 = vld [vmem:[#allocation10 + $0x58] sm:$0xff]  ;;  %s2662_s17 = sld [smem:[#allocation5 + $0x4]] }
  0x5a   :  { %575 = vmatpush.msra.mxu1 %v3470_v43  ;;  %596 = vmatpush.msrb.mxu2 %v3529_v0  ;;  %4846 = vst [vmem:[#allocation41_spill] sm:$0xff] %v3647_v53  ;;  %v3674_v60 = vld [vmem:[#allocation10 + $0x40] sm:$0xff]  ;;  %v3680_v62 = vld [vmem:[#allocation10 + $0x28] sm:$0xff]  ;;  %v3686_v63 = vld [vmem:[#allocation10 + $0x10] sm:$0xff]  ;;  %s2663_s18 = sld [smem:[#allocation5 + $0x84]] }
  0x5b   :  { %612 = vmatpush.msrb.mxu3 %v3556_v15  ;;  %2638 = vmatmul.msk.f32.gmra.mxu1 %vm440_vm9, %v2632_v20  ;;  %4847 = vst [vmem:[#allocation42_spill] sm:$0xff] %v3653_v55  ;;  %v564_v6 = vld [vmem:[#allocation11] sm:$0x7] }
  0x5c   :  { %576 = vmatpush.msra.mxu1 %v3522_v61  ;;  %597 = vmatpush.msrb.mxu2 %v3544_v8  ;;  %4848 = vst [vmem:[#allocation43_spill] sm:$0xff] %v3680_v62  ;;  %v3807_v10 = vperm.slane %v564_v6, 0  ;;  %v3810_v14 = vperm.slane %v564_v6, 1 }
  0x5d   :  { %2634 = vmatmul.msk.f32.gmra.mxu2 %vm440_vm9, %v2632_v20  ;;  %613 = vmatpush.msrb.mxu3 %v3569_v21  ;;  %4849 = vst [vmem:[#allocation44_spill] sm:$0xff] %v3686_v63 }
  0x5e   :  { %577 = vmatpush.msra.mxu1 %v3537_v4  ;;  %598 = vmatpush.msrb.mxu2 %v3559_v16  ;;  %4854 = vst [vmem:[#allocation49_spill] sm:$0xff] %v3807_v10 }
  0x5f   :  { %2635 = vmatmul.msk.f32.vlgmr.msra.gmra.mxu3 %vm440_vm9, %v3497_v52  ;;  %687 = vmatpush.msrb.mxu0 %v3582_v26  ;;  %v3643_v52 = vld [vmem:[#allocation10 + $0x18] sm:$0xff]  ;;  %4855 = vst [vmem:[#allocation50_spill] sm:$0xff] %v3810_v14 }
  0x60   :  { %578 = vmatpush.msra.mxu1 %v3551_v12  ;;  %599 = vmatpush.msrb.mxu2 %v3563_v19  ;;  %4845 = vst [vmem:[#allocation40_spill] sm:$0xff] %v3643_v52 }
  0x61   :  { %614 = vmatpush.msrb.mxu3 %v3579_v25  ;;  %688 = vmatpush.msrb.mxu0 %v3593_v29 }
  0x62   :  { %579 = vmatpush.msra.mxu1 %v3572_v22  ;;  %600 = vmatpush.msrb.mxu2 %v3576_v23 }
  0x63   :  { %615 = vmatpush.msrb.mxu3 %v3588_v28  ;;  %689 = vmatpush.msrb.mxu0 %v3603_v34 }
  0x64   :  { %580 = vmatpush.msra.mxu1 %v3582_v26  ;;  %601 = vmatpush.msrb.mxu2 %v3586_v27 }
  0x65   :  { %616 = vmatpush.msrb.mxu3 %v3599_v32  ;;  %690 = vmatpush.msrb.mxu0 %v3613_v37 }
  0x66   :  { %581 = vmatpush.msra.mxu1 %v3593_v29  ;;  %602 = vmatpush.msrb.mxu2 %v3597_v30 }
  0x67   :  { %617 = vmatpush.msrb.mxu3 %v3609_v36  ;;  %691 = vmatpush.msrb.mxu0 %v3623_v41 }
  0x68   :  { %582 = vmatpush.msra.mxu1 %v3603_v34  ;;  %603 = vmatpush.msrb.mxu2 %v3607_v35 }
  0x69   :  { %2636 = vmatmul.msk.f32.gmra.mxu3 %vm440_vm9, %v2632_v20  ;;  %692 = vmatpush.msrb.mxu0 %v3633_v46 }
  0x6a   :  { %583 = vmatpush.msra.mxu1 %v3613_v37  ;;  %604 = vmatpush.msrb.mxu2 %v3617_v38 }
  0x6b   :  { %618 = vmatpush.msrb.mxu3 %v3619_v39  ;;  %693 = vmatpush.msrb.mxu0 %v3643_v52 }
  0x6c   :  { %584 = vmatpush.msra.mxu1 %v3623_v41  ;;  %605 = vmatpush.msrb.mxu2 %v3627_v44 }
  0x6d   :  { %619 = vmatpush.msrb.mxu3 %v3629_v45  ;;  %694 = vmatpush.msrb.mxu0 %v3653_v55 }
  0x6e   :  { %585 = vmatpush.msra.mxu1 %v3633_v46  ;;  %606 = vmatpush.msrb.mxu2 %v3637_v47 }
  0x6f   :  { %620 = vmatpush.msrb.mxu3 %v3639_v49  ;;  %821 = vmatpush.msra.mxu0 %v3468_v42 }
  0x70   :  { %586 = vmatpush.msra.mxu1 %v3643_v52  ;;  %607 = vmatpush.msrb.mxu2 %v3647_v53 }
  0x71   :  { %621 = vmatpush.msrb.mxu3 %v3649_v54  ;;  %608 = vmatmul.f32.vlgmr.msrb.gmra.mxu2 %v4767_v51 }
  0x72   :  { %587 = vmatpush.msra.mxu1 %v3653_v55  ;;  %719 = vmatpush.msra.mxu2 %v3556_v15 }
  0x73   :  { %588 = vmatmul.f32.vlgmr.msra.gmra.mxu1 %v4767_v51  ;;  %622 = vmatpush.msrb.mxu3 %v3657_v56 }
  0x74   :  { %699 = vmatpush.msrb.mxu1 %v3468_v42  ;;  %720 = vmatpush.msra.mxu2 %v3569_v21 }
  0x75   :  { %623 = vmatpush.msrb.mxu3 %v3664_v58  ;;  %822 = vmatpush.msra.mxu0 %v3481_v48 }
  0x76   :  { %700 = vmatpush.msrb.mxu1 %v3481_v48  ;;  %721 = vmatpush.msra.mxu2 %v3579_v25 }
  0x77   :  { %624 = vmatpush.msrb.mxu3 %v3668_v59  ;;  %823 = vmatpush.msra.mxu0 %v3494_v50 }
  0x78   :  { %701 = vmatpush.msrb.mxu1 %v3494_v50  ;;  %722 = vmatpush.msra.mxu2 %v3588_v28 }
  0x79   :  { %625 = vmatpush.msrb.mxu3 %v3674_v60  ;;  %824 = vmatpush.msra.mxu0 %v3513_v57 }
  0x7a   :  { %702 = vmatpush.msrb.mxu1 %v3513_v57  ;;  %723 = vmatpush.msra.mxu2 %v3599_v32 }
  0x7b   :  { %626 = vmatpush.msrb.mxu3 %v3680_v62  ;;  %825 = vmatpush.msra.mxu0 %v3529_v0 }
  0x7c   :  { %703 = vmatpush.msrb.mxu1 %v3529_v0  ;;  %724 = vmatpush.msra.mxu2 %v3609_v36 }
  0x7d   :  { %627 = vmatpush.msrb.mxu3 %v3686_v63  ;;  %826 = vmatpush.msra.mxu0 %v3544_v8 }
  0x7e   :  { %628 = vmatmul.f32.vlgmr.msrb.gmra.mxu3 %v4767_v51  ;;  %704 = vmatpush.msrb.mxu1 %v3544_v8 }
  0x7f   :  { %801 = vmatpush.msra.mxu3 %v3423_v17  ;;  %725 = vmatpush.msra.mxu2 %v3619_v39 }
  0x80   :  { %705 = vmatpush.msrb.mxu1 %v3559_v16  ;;  %827 = vmatpush.msra.mxu0 %v3559_v16 }
  0x81   :  { %802 = vmatpush.msra.mxu3 %v3438_v24  ;;  %726 = vmatpush.msra.mxu2 %v3629_v45 }
  0x82   :  { %706 = vmatpush.msrb.mxu1 %v3563_v19  ;;  %828 = vmatpush.msra.mxu0 %v3563_v19 }
  0x83   :  { %803 = vmatpush.msra.mxu3 %v3451_v33  ;;  %727 = vmatpush.msra.mxu2 %v3639_v49 }
  0x84   :  { %707 = vmatpush.msrb.mxu1 %v3576_v23  ;;  %829 = vmatpush.msra.mxu0 %v3576_v23 }
  0x85   :  { %804 = vmatpush.msra.mxu3 %v3470_v43  ;;  %728 = vmatpush.msra.mxu2 %v3649_v54 }
  0x86   :  { %708 = vmatpush.msrb.mxu1 %v3586_v27  ;;  %830 = vmatpush.msra.mxu0 %v3586_v27 }
  0x87   :  { %805 = vmatpush.msra.mxu3 %v3522_v61  ;;  %729 = vmatpush.msra.mxu2 %v3657_v56 }
  0x88   :  { %709 = vmatpush.msrb.mxu1 %v3597_v30  ;;  %831 = vmatpush.msra.mxu0 %v3597_v30 }
  0x89   :  { %806 = vmatpush.msra.mxu3 %v3537_v4  ;;  %730 = vmatpush.msra.mxu2 %v3664_v58 }
  0x8a   :  { %710 = vmatpush.msrb.mxu1 %v3607_v35  ;;  %832 = vmatpush.msra.mxu0 %v3607_v35 }
  0x8b   :  { %807 = vmatpush.msra.mxu3 %v3551_v12  ;;  %731 = vmatpush.msra.mxu2 %v3668_v59 }
  0x8c   :  { %711 = vmatpush.msrb.mxu1 %v3617_v38  ;;  %833 = vmatpush.msra.mxu0 %v3617_v38 }
  0x8d   :  { %808 = vmatpush.msra.mxu3 %v3572_v22  ;;  %732 = vmatpush.msra.mxu2 %v3674_v60 }
  0x8e   :  { %712 = vmatpush.msrb.mxu1 %v3627_v44  ;;  %834 = vmatpush.msra.mxu0 %v3627_v44 }
  0x8f   :  { %809 = vmatpush.msra.mxu3 %v3582_v26  ;;  %733 = vmatpush.msra.mxu2 %v3680_v62 }
  0x90   :  { %713 = vmatpush.msrb.mxu1 %v3637_v47  ;;  %835 = vmatpush.msra.mxu0 %v3637_v47 }
  0x91   :  { %810 = vmatpush.msra.mxu3 %v3593_v29  ;;  %734 = vmatpush.msra.mxu2 %v3686_v63 }
  0x92   :  { %714 = vmatpush.msrb.mxu1 %v3647_v53  ;;  %836 = vmatpush.msra.mxu0 %v3647_v53 }
  0x93   :  { %811 = vmatpush.msra.mxu3 %v3603_v34  ;;  %922 = vmatpush.msrb.mxu2 %v3423_v17 }
  0x94   :  { %841 = vmatpush.msra.mxu1 %v3556_v15 }
  0x95   :  { %812 = vmatpush.msra.mxu3 %v3613_v37  ;;  %923 = vmatpush.msrb.mxu2 %v3438_v24 }
  0x96   :  { %842 = vmatpush.msra.mxu1 %v3569_v21 }
  0x97   :  { %813 = vmatpush.msra.mxu3 %v3623_v41  ;;  %924 = vmatpush.msrb.mxu2 %v3451_v33 }
  0x98   :  { %843 = vmatpush.msra.mxu1 %v3579_v25 }
  0x99   :  { %814 = vmatpush.msra.mxu3 %v3633_v46  ;;  %925 = vmatpush.msrb.mxu2 %v3470_v43 }
  0x9a   :  { %844 = vmatpush.msra.mxu1 %v3588_v28 }
  0x9b   :  { %815 = vmatpush.msra.mxu3 %v3643_v52  ;;  %926 = vmatpush.msrb.mxu2 %v3522_v61 }
  0x9c   :  { %845 = vmatpush.msra.mxu1 %v3599_v32 }
  0x9d   :  { %816 = vmatpush.msra.mxu3 %v3653_v55  ;;  %927 = vmatpush.msrb.mxu2 %v3537_v4 }
  0x9e   :  { %846 = vmatpush.msra.mxu1 %v3609_v36 }
  0x9f   :  { %942 = vmatpush.msrb.mxu3 %v3468_v42  ;;  %928 = vmatpush.msrb.mxu2 %v3551_v12 }
  0xa0   :  { %847 = vmatpush.msra.mxu1 %v3619_v39 }
  0xa1   :  { %943 = vmatpush.msrb.mxu3 %v3481_v48  ;;  %929 = vmatpush.msrb.mxu2 %v3572_v22 }
  0xa2   :  { %848 = vmatpush.msra.mxu1 %v3629_v45 }
  0xa3   :  { %944 = vmatpush.msrb.mxu3 %v3494_v50  ;;  %930 = vmatpush.msrb.mxu2 %v3582_v26 }
  0xa4   :  { %849 = vmatpush.msra.mxu1 %v3639_v49 }
  0xa5   :  { %945 = vmatpush.msrb.mxu3 %v3513_v57  ;;  %931 = vmatpush.msrb.mxu2 %v3593_v29 }
  0xa6   :  { %850 = vmatpush.msra.mxu1 %v3649_v54 }
  0xa7   :  { %946 = vmatpush.msrb.mxu3 %v3529_v0  ;;  %932 = vmatpush.msrb.mxu2 %v3603_v34 }
  0xa8   :  { %851 = vmatpush.msra.mxu1 %v3657_v56 }
  0xa9   :  { %947 = vmatpush.msrb.mxu3 %v3544_v8  ;;  %933 = vmatpush.msrb.mxu2 %v3613_v37 }
  0xaa   :  { %852 = vmatpush.msra.mxu1 %v3664_v58 }
  0xab   :  { %948 = vmatpush.msrb.mxu3 %v3559_v16  ;;  %934 = vmatpush.msrb.mxu2 %v3623_v41 }
  0xac   :  { %853 = vmatpush.msra.mxu1 %v3668_v59 }
  0xad   :  { %949 = vmatpush.msrb.mxu3 %v3563_v19  ;;  %935 = vmatpush.msrb.mxu2 %v3633_v46 }
  0xae   :  { %854 = vmatpush.msra.mxu1 %v3674_v60 }
  0xaf   :  { %950 = vmatpush.msrb.mxu3 %v3576_v23  ;;  %936 = vmatpush.msrb.mxu2 %v3643_v52 }
  0xb0   :  { %855 = vmatpush.msra.mxu1 %v3680_v62 }
  0xb1   :  { %951 = vmatpush.msrb.mxu3 %v3586_v27  ;;  %937 = vmatpush.msrb.mxu2 %v3653_v55 }
  0xb2   :  { %856 = vmatpush.msra.mxu1 %v3686_v63 }
  0xb3   :  { %952 = vmatpush.msrb.mxu3 %v3597_v30 }
  0xb5   :  { %953 = vmatpush.msrb.mxu3 %v3607_v35 }
  0xb7   :  { %954 = vmatpush.msrb.mxu3 %v3617_v38 }
  0xb9   :  { %955 = vmatpush.msrb.mxu3 %v3627_v44 }
  0xbb   :  { %956 = vmatpush.msrb.mxu3 %v3637_v47 }
  0xbd   :  { %957 = vmatpush.msrb.mxu3 %v3647_v53 }
  0xc4   :  { %v3797_v1 = vpop.f32.mrf.mxu1 }
  0xc5   :  { %4850 = vst [vmem:[#allocation45_spill] sm:$0xff] %v3797_v1 }
  0xd0   :  { %v3799_v2 = vpop.f32.mrf.mxu1 }
  0xd6   :  { %v3801_v3 = vpop.f32.mrf.mxu2 }
  0xd7   :  { %4851 = vst [vmem:[#allocation46_spill] sm:$0xff] %v3801_v3 }
  0xd8   :  { %v3803_v5 = vpop.f32.mrf.mxu1 }
  0xd9   :  { %4852 = vst [vmem:[#allocation47_spill] sm:$0xff] %v3803_v5 }
  0xe0   :  { %v3805_v9 = vpop.f32.mrf.mxu2 }
  0xe1   :  { %4853 = vst [vmem:[#allocation48_spill] sm:$0xff] %v3805_v9 }
  0xe2   :  { %v3813_v1 = vpop.f32.mrf.mxu3 }
  0xe3   :  { %4856 = vst [vmem:[#allocation51_spill] sm:$0xff] %v3813_v1 }
  0xec   :  { %v3817_v53 = vpop.f32.mrf.mxu3 }
  0xed   :  { %4857 = vst [vmem:[#allocation52_spill] sm:$0xff] %v3817_v53 }
  0xf0   :  { %v589_v11 = vpop.f32.mrf.mxu1 }
  0xf1   :  { %v590_v13 = vadd.f32 %v589_v11, %v3807_v10 }
  0xf3   :  { %v632_v18 = vadd.f32 %v590_v13, %v3801_v3  ;;  %v3819_v3 = vperm.slane %v564_v6, 2 }
  0xf4   :  { %v609_v51 = vpop.f32.mrf.mxu2 }
  0xf5   :  { %v2639_v20 = vmul.f32 -1.442695, %v632_v18  ;;  %v610_v40 = vadd.f32 %v609_v51, %v3810_v14 }
  0xf7   :  { %2705 = vpow2.f32 %v2639_v20  ;;  %v633_v31 = vadd.f32 %v610_v40, %v3813_v1 }
  0xf9   :  { %v2640_v7 = vmul.f32 -1.442695, %v633_v31 }
  0xfb   :  { %2707 = vpow2.f32 %v2640_v7 }
  0xfd   :  { %v2706_v5 = vpop.eup %2705 }
  0xfe   :  { %v640_v9 = vadd.f32 1.0, %v2706_v5 }
 0x100   :  { %2709 = vrcp.f32 %v640_v9  ;;  %v653_v51 = vand.u32 2147483648, %v640_v9  ;;  %v651_v31 = vand.u32 2147483647, %v640_v9  ;;  %vm647_vm0 = vweird.f32 %v640_v9 }
 0x101   :  { %v2708_v11 = vpop.eup %2707  ;;  %v629_v63 = vpop.f32.mrf.mxu3 }
 0x102   :  { %v641_v10 = vadd.f32 1.0, %v2708_v11  ;;  %v630_v40 = vadd.f32 %v629_v63, %v3819_v3  ;;  %v654_v53 = vor.u32 1.1754944e-38, %v653_v51  ;;  %vm652_vm15 = vcmp.eq.f32.partialorder %v651_v31, 8.507059e+37 }
 0x104   :  { %2711 = vrcp.f32 %v641_v10  ;;  %v668_v52 = vand.u32 2147483648, %v641_v10  ;;  %vm662_vm14 = vweird.f32 %v641_v10 }
 0x106   :  { %v2710_v13 = vpop.eup %2709  ;;  %v669_v63 = vor.u32 1.1754944e-38, %v668_v52  ;;  %v4861_v52 = vld [vmem:[#allocation40_spill] sm:$0xff] }
 0x107   :  { %v643_v18 = vmul.f32 %v2710_v13, %v640_v9  ;;  %vm648_vm2 = vweird.f32 %v2710_v13 }
 0x108   :  { %vm649_vm11 = vmor %vm647_vm0, %vm648_vm2 }
 0x109   :  { %v644_v55 = vsub.f32 1.0, %v643_v18 }
 0x10a   :  { %v2712_v20 = vpop.eup %2711 }
 0x10b   :  { %v645_v14 = vmul.f32 %v2710_v13, %v644_v55  ;;  %v658_v7 = vmul.f32 %v2712_v20, %v641_v10  ;;  %vm663_vm1 = vweird.f32 %v2712_v20  ;;  %v666_v55 = vand.u32 2147483647, %v641_v10  ;;  %v4864_v10 = vld [vmem:[#allocation42_spill] sm:$0xff] }
 0x10c   :  { %vm664_vm13 = vmor %vm662_vm14, %vm663_vm1 }
 0x10d   :  { %v646_v5 = vadd.f32 %v2710_v13, %v645_v14  ;;  %v659_v11 = vsub.f32 1.0, %v658_v7  ;;  %vm667_vm12 = vcmp.eq.f32.partialorder %v666_v55, 8.507059e+37  ;;  %v3876_v7 = vpop.f32.mrf.mxu0 }
 0x10e   :  { %4866 = vst [vmem:[#allocation53_spill] sm:$0xff] %v3876_v7 }
 0x10f   :  { %v650_v1 = vsel %vm649_vm11, %v2710_v13, %v646_v5  ;;  %v660_v6 = vmul.f32 %v2712_v20, %v659_v11  ;;  %v4867_v11 = vld [vmem:[#allocation49_spill] sm:$0xff] }
 0x110   :  { %v655_v47 = vsel %vm652_vm15, %v654_v53, %v650_v1  ;;  %v4863_v1 = vld [vmem:[#allocation44_spill] sm:$0xff] }
 0x111   :  { %v672_v18 = vmul.f32 %v655_v47, %v630_v40  ;;  %v661_v62 = vadd.f32 %v2712_v20, %v660_v6  ;;  %v4860_v47 = vld [vmem:[#allocation43_spill] sm:$0xff] }
 0x113   :  { %v673_v44 = vadd.f32 %v672_v18, %v3799_v2  ;;  %v665_v46 = vsel %vm664_vm13, %v2712_v20, %v661_v62  ;;  %v4862_v62 = vld [vmem:[#allocation39_spill] sm:$0xff]  ;;  %v4865_v20 = vld [vmem:[#allocation41_spill] sm:$0xff]  ;;  %v4868_v18 = vld [vmem:[#allocation50_spill] sm:$0xff] }
 0x114   :  { %v670_v9 = vsel %vm667_vm12, %v669_v63, %v665_v46  ;;  %v4859_v46 = vld [vmem:[#allocation37_spill] sm:$0xff] }
 0x115   :  { %2713 = vtanh.f32 %v673_v44  ;;  %v675_v14 = vsub.f32 1.0, %v670_v9  ;;  %v677_v31 = vmul.f32 0.0, %v670_v9  ;;  %v4858_v44 = vld [vmem:[#allocation38_spill] sm:$0xff] }
 0x11b   :  { %v2714_v51 = vpop.eup %2713 }
 0x11c   :  { %v676_v13 = vmul.f32 %v2714_v51, %v675_v14  ;;  %v4869_v14 = vld [vmem:[#allocation46_spill] sm:$0xff] }
 0x11e   :  { %v3823_v53 = vadd.f32 %v677_v31, %v676_v13  ;;  %v4870_v13 = vld [vmem:[#allocation51_spill] sm:$0xff] }
 0x120   :  { %695 = vmatmul.f32.vlgmr.msrb.gmra.mxu0 %v3823_v53  ;;  %715 = vmatmul.f32.vlgmr.msrb.gmra.mxu1 %v3823_v53 }
 0x121   :  { %735 = vmatmul.f32.vlgmr.msra.gmra.mxu2 %v3823_v53  ;;  %962 = vmatpush.msrb.mxu0 %v3556_v15 }
 0x122   :  { %1043 = vmatpush.msrb.mxu1 %v3423_v17  ;;  %1063 = vmatpush.msra.mxu2 %v3468_v42 }
 0x123   :  { %963 = vmatpush.msrb.mxu0 %v3569_v21 }
 0x124   :  { %1044 = vmatpush.msrb.mxu1 %v3438_v24  ;;  %1064 = vmatpush.msra.mxu2 %v3481_v48 }
 0x125   :  { %964 = vmatpush.msrb.mxu0 %v3579_v25 }
 0x126   :  { %1045 = vmatpush.msrb.mxu1 %v3451_v33  ;;  %1065 = vmatpush.msra.mxu2 %v3494_v50 }
 0x127   :  { %965 = vmatpush.msrb.mxu0 %v3588_v28 }
 0x128   :  { %1046 = vmatpush.msrb.mxu1 %v3470_v43  ;;  %1066 = vmatpush.msra.mxu2 %v3513_v57 }
 0x129   :  { %966 = vmatpush.msrb.mxu0 %v3599_v32 }
 0x12a   :  { %1047 = vmatpush.msrb.mxu1 %v3522_v61  ;;  %1067 = vmatpush.msra.mxu2 %v3529_v0 }
 0x12b   :  { %967 = vmatpush.msrb.mxu0 %v3609_v36 }
 0x12c   :  { %1048 = vmatpush.msrb.mxu1 %v3537_v4  ;;  %1068 = vmatpush.msra.mxu2 %v3544_v8 }
 0x12d   :  { %968 = vmatpush.msrb.mxu0 %v3619_v39 }
 0x12e   :  { %1049 = vmatpush.msrb.mxu1 %v3551_v12  ;;  %1069 = vmatpush.msra.mxu2 %v3559_v16 }
 0x12f   :  { %969 = vmatpush.msrb.mxu0 %v3629_v45 }
 0x130   :  { %1050 = vmatpush.msrb.mxu1 %v3572_v22  ;;  %1070 = vmatpush.msra.mxu2 %v3563_v19 }
 0x131   :  { %970 = vmatpush.msrb.mxu0 %v3639_v49 }
 0x132   :  { %1051 = vmatpush.msrb.mxu1 %v3582_v26  ;;  %1071 = vmatpush.msra.mxu2 %v3576_v23 }
 0x133   :  { %971 = vmatpush.msrb.mxu0 %v3649_v54 }
 0x134   :  { %1052 = vmatpush.msrb.mxu1 %v3593_v29  ;;  %1072 = vmatpush.msra.mxu2 %v3586_v27 }
 0x135   :  { %972 = vmatpush.msrb.mxu0 %v3657_v56 }
 0x136   :  { %1053 = vmatpush.msrb.mxu1 %v3603_v34  ;;  %1073 = vmatpush.msra.mxu2 %v3597_v30 }
 0x137   :  { %973 = vmatpush.msrb.mxu0 %v3664_v58 }
 0x138   :  { %1054 = vmatpush.msrb.mxu1 %v3613_v37  ;;  %1074 = vmatpush.msra.mxu2 %v3607_v35 }
 0x139   :  { %974 = vmatpush.msrb.mxu0 %v3668_v59 }
 0x13a   :  { %1055 = vmatpush.msrb.mxu1 %v3623_v41  ;;  %1075 = vmatpush.msra.mxu2 %v3617_v38 }
 0x13b   :  { %975 = vmatpush.msrb.mxu0 %v3674_v60 }
 0x13c   :  { %1056 = vmatpush.msrb.mxu1 %v4858_v44  ;;  %1076 = vmatpush.msra.mxu2 %v4859_v46 }
 0x13d   :  { %976 = vmatpush.msrb.mxu0 %v4860_v47 }
 0x13e   :  { %1057 = vmatpush.msrb.mxu1 %v4861_v52  ;;  %1077 = vmatpush.msra.mxu2 %v4862_v62 }
 0x13f   :  { %977 = vmatpush.msrb.mxu0 %v4863_v1 }
 0x140   :  { %1058 = vmatpush.msrb.mxu1 %v4864_v10  ;;  %1078 = vmatpush.msra.mxu2 %v4865_v20 }
 0x19d   :  { %v696_v40 = vpop.f32.mrf.mxu0  ;;  %v716_v5 = vpop.f32.mrf.mxu1 }
 0x19e   :  { %v697_v6 = vadd.f32 %v696_v40, %v4867_v11  ;;  %v717_v55 = vadd.f32 %v716_v5, %v4868_v18 }
 0x1a0   :  { %v741_v63 = vrot.slane %v697_v6, 6  ;;  %v742_v9 = vrot.slane %v717_v55, 6 }
 0x1a2   :  { %v745_v51 = vadd.f32 %v741_v63, %v4869_v14  ;;  %v746_v31 = vadd.f32 %v742_v9, %v4870_v13 }
 0x1a4   :  { %v2641_v62 = vmul.f32 -1.442695, %v745_v51  ;;  %v2642_v1 = vmul.f32 -1.442695, %v746_v31  ;;  %v736_v6 = vpop.f32.mrf.mxu2 }
 0x1a5   :  { %v737_v9 = vadd.f32 %v736_v6, %v3819_v3 }
 0x1a6   :  { %2715 = vpow2.f32 %v2641_v62 }
 0x1a7   :  { %2717 = vpow2.f32 %v2642_v1  ;;  %v786_v14 = vrot.slane %v737_v9, 6 }
 0x1ac   :  { %v2716_v10 = vpop.eup %2715 }
 0x1ad   :  { %v2718_v20 = vpop.eup %2717  ;;  %v753_v52 = vadd.f32 1.0, %v2716_v10 }
 0x1ae   :  { %v754_v7 = vadd.f32 1.0, %v2718_v20 }
 0x1af   :  { %2719 = vrcp.f32 %v753_v52  ;;  %v766_v63 = vand.u32 2147483648, %v753_v52  ;;  %v764_v62 = vand.u32 2147483647, %v753_v52  ;;  %vm760_vm12 = vweird.f32 %v753_v52 }
 0x1b0   :  { %2721 = vrcp.f32 %v754_v7  ;;  %vm775_vm0 = vweird.f32 %v754_v7 }
 0x1b1   :  { %v767_v10 = vor.u32 1.1754944e-38, %v766_v63  ;;  %vm765_vm14 = vcmp.eq.f32.partialorder %v764_v62, 8.507059e+37 }
 0x1b5   :  { %v2720_v47 = vpop.eup %2719 }
 0x1b6   :  { %v2722_v40 = vpop.eup %2721  ;;  %v756_v11 = vmul.f32 %v2720_v47, %v753_v52  ;;  %vm761_vm1 = vweird.f32 %v2720_v47 }
 0x1b7   :  { %v771_v5 = vmul.f32 %v2722_v40, %v754_v7  ;;  %vm762_vm13 = vmor %vm760_vm12, %vm761_vm1  ;;  %vm776_vm2 = vweird.f32 %v2722_v40 }
 0x1b8   :  { %v757_v55 = vsub.f32 1.0, %v756_v11  ;;  %v781_v11 = vand.u32 2147483648, %v754_v7  ;;  %vm777_vm11 = vmor %vm775_vm0, %vm776_vm2 }
 0x1b9   :  { %v772_v18 = vsub.f32 1.0, %v771_v5  ;;  %v779_v5 = vand.u32 2147483647, %v754_v7 }
 0x1ba   :  { %v758_v51 = vmul.f32 %v2720_v47, %v757_v55 }
 0x1bb   :  { %v773_v1 = vmul.f32 %v2722_v40, %v772_v18  ;;  %v782_v18 = vor.u32 1.1754944e-38, %v781_v11  ;;  %vm780_vm15 = vcmp.eq.f32.partialorder %v779_v5, 8.507059e+37 }
 0x1bc   :  { %v759_v31 = vadd.f32 %v2720_v47, %v758_v51 }
 0x1bd   :  { %v774_v46 = vadd.f32 %v2722_v40, %v773_v1 }
 0x1be   :  { %v763_v20 = vsel %vm762_vm13, %v2720_v47, %v759_v31  ;;  %v794_v47 = vrot.slane %v3823_v53, 6 }
 0x1bf   :  { %v768_v13 = vsel %vm765_vm14, %v767_v10, %v763_v20  ;;  %v778_v55 = vsel %vm777_vm11, %v2722_v40, %v774_v46 }
 0x1c0   :  { %v788_v44 = vmul.f32 %v786_v14, %v768_v13  ;;  %v783_v52 = vsel %vm780_vm15, %v782_v18, %v778_v55  ;;  %v4882_v13 = vld [vmem:[#allocation46_spill] sm:$0xff] }
 0x1c1   :  { %v791_v51 = vsub.f32 1.0, %v783_v52  ;;  %v796_v62 = vmul.f32 %v794_v47, %v783_v52 }
 0x1c2   :  { %v789_v6 = vadd.f32 %v788_v44, %v3799_v2  ;;  %v4881_v44 = vld [vmem:[#allocation49_spill] sm:$0xff] }
 0x1c4   :  { %2723 = vtanh.f32 %v789_v6 }
 0x1ca   :  { %v2724_v63 = vpop.eup %2723 }
 0x1cb   :  { %v792_v9 = vmul.f32 %v2724_v63, %v791_v51 }
 0x1cd   :  { %v3885_v1 = vadd.f32 %v796_v62, %v792_v9 }
 0x1cf   :  { %v799_v14 = vrot.slane %v3885_v1, 2 }
 0x1d1   :  { %817 = vmatmul.f32.vlgmr.msra.gmra.mxu3 %v799_v14  ;;  %837 = vmatmul.f32.vlgmr.msra.gmra.mxu0 %v799_v14 }
 0x1d2   :  { %857 = vmatmul.f32.vlgmr.msra.gmra.mxu1 %v799_v14  ;;  %1083 = vmatpush.msra.mxu3 %v3556_v15 }
 0x1d3   :  { %1150 = vmatpush.msra.mxu0 %v3423_v17  ;;  %1170 = vmatpush.msra.mxu1 %v3468_v42  ;;  %v4871_v17 = vld [vmem:[#allocation38_spill] sm:$0xff]  ;;  %v4874_v42 = vld [vmem:[#allocation40_spill] sm:$0xff] }
 0x1d4   :  { %1084 = vmatpush.msra.mxu3 %v3569_v21 }
 0x1d5   :  { %1151 = vmatpush.msra.mxu0 %v3438_v24  ;;  %1171 = vmatpush.msra.mxu1 %v3481_v48  ;;  %v4872_v24 = vld [vmem:[#allocation37_spill] sm:$0xff]  ;;  %v4876_v48 = vld [vmem:[#allocation44_spill] sm:$0xff] }
 0x1d6   :  { %1085 = vmatpush.msra.mxu3 %v3579_v25 }
 0x1d7   :  { %1152 = vmatpush.msra.mxu0 %v3451_v33  ;;  %1172 = vmatpush.msra.mxu1 %v3494_v50  ;;  %v4873_v33 = vld [vmem:[#allocation43_spill] sm:$0xff]  ;;  %v4877_v50 = vld [vmem:[#allocation42_spill] sm:$0xff] }
 0x1d8   :  { %1086 = vmatpush.msra.mxu3 %v3588_v28 }
 0x1d9   :  { %1153 = vmatpush.msra.mxu0 %v3470_v43  ;;  %1173 = vmatpush.msra.mxu1 %v3513_v57  ;;  %v4875_v43 = vld [vmem:[#allocation39_spill] sm:$0xff]  ;;  %v4878_v57 = vld [vmem:[#allocation41_spill] sm:$0xff] }
 0x1da   :  { %1087 = vmatpush.msra.mxu3 %v3599_v32 }
 0x1db   :  { %1154 = vmatpush.msra.mxu0 %v3522_v61  ;;  %1174 = vmatpush.msra.mxu1 %v3529_v0  ;;  %v4879_v0 = vld [vmem:[#allocation50_spill] sm:$0xff] }
 0x1dc   :  { %1088 = vmatpush.msra.mxu3 %v3609_v36 }
 0x1dd   :  { %1155 = vmatpush.msra.mxu0 %v3537_v4  ;;  %1175 = vmatpush.msra.mxu1 %v3544_v8 }
 0x1de   :  { %1089 = vmatpush.msra.mxu3 %v3619_v39 }
 0x1df   :  { %1156 = vmatpush.msra.mxu0 %v3551_v12  ;;  %1176 = vmatpush.msra.mxu1 %v3559_v16  ;;  %v4880_v12 = vld [vmem:[#allocation51_spill] sm:$0xff] }
 0x1e0   :  { %1090 = vmatpush.msra.mxu3 %v3629_v45 }
 0x1e1   :  { %1157 = vmatpush.msra.mxu0 %v3572_v22  ;;  %1177 = vmatpush.msra.mxu1 %v3563_v19 }
 0x1e2   :  { %1091 = vmatpush.msra.mxu3 %v3639_v49 }
 0x1e3   :  { %1158 = vmatpush.msra.mxu0 %v3582_v26  ;;  %1178 = vmatpush.msra.mxu1 %v3576_v23 }
 0x1e4   :  { %1092 = vmatpush.msra.mxu3 %v3649_v54 }
 0x1e5   :  { %1159 = vmatpush.msra.mxu0 %v3593_v29  ;;  %1179 = vmatpush.msra.mxu1 %v3586_v27 }
 0x1e6   :  { %1093 = vmatpush.msra.mxu3 %v3657_v56 }
 0x1e7   :  { %1160 = vmatpush.msra.mxu0 %v3603_v34  ;;  %1180 = vmatpush.msra.mxu1 %v3597_v30 }
 0x1e8   :  { %1094 = vmatpush.msra.mxu3 %v3664_v58 }
 0x1e9   :  { %1161 = vmatpush.msra.mxu0 %v3613_v37  ;;  %1181 = vmatpush.msra.mxu1 %v3607_v35 }
 0x1ea   :  { %1095 = vmatpush.msra.mxu3 %v3668_v59 }
 0x1eb   :  { %1162 = vmatpush.msra.mxu0 %v3623_v41  ;;  %1182 = vmatpush.msra.mxu1 %v3617_v38 }
 0x1ec   :  { %1096 = vmatpush.msra.mxu3 %v3674_v60 }
 0x1ed   :  { %1163 = vmatpush.msra.mxu0 %v4871_v17  ;;  %1183 = vmatpush.msra.mxu1 %v4872_v24 }
 0x1ee   :  { %1097 = vmatpush.msra.mxu3 %v4873_v33 }
 0x1ef   :  { %1164 = vmatpush.msra.mxu0 %v4874_v42  ;;  %1184 = vmatpush.msra.mxu1 %v4875_v43 }
 0x1f0   :  { %1098 = vmatpush.msra.mxu3 %v4876_v48 }
 0x1f1   :  { %1165 = vmatpush.msra.mxu0 %v4877_v50  ;;  %1185 = vmatpush.msra.mxu1 %v4878_v57 }
 0x24e   :  { %v838_v61 = vpop.f32.mrf.mxu0 }
 0x24f   :  { %v839_v4 = vadd.f32 %v838_v61, %v4879_v0  ;;  %v858_v47 = vpop.f32.mrf.mxu1 }
 0x250   :  { %v859_v62 = vadd.f32 %v858_v47, %v3819_v3 }
 0x251   :  { %v864_v8 = vrot.slane %v839_v4, 4 }
 0x253   :  { %v868_v16 = vadd.f32 %v864_v8, %v4880_v12 }
 0x254   :  { %v818_v19 = vpop.f32.mrf.mxu3 }
 0x255   :  { %v2644_v53 = vmul.f32 -1.442695, %v868_v16  ;;  %v819_v46 = vadd.f32 %v818_v19, %v4881_v44  ;;  %v908_v19 = vrot.slane %v859_v62, 4 }
 0x257   :  { %2725 = vpow2.f32 %v2644_v53  ;;  %v863_v7 = vrot.slane %v819_v46, 4 }
 0x259   :  { %v867_v40 = vadd.f32 %v863_v7, %v4882_v13 }
 0x25b   :  { %v2643_v31 = vmul.f32 -1.442695, %v867_v40 }
 0x25d   :  { %v2726_v10 = vpop.eup %2725  ;;  %2727 = vpow2.f32 %v2643_v31 }
 0x25e   :  { %v876_v20 = vadd.f32 1.0, %v2726_v10 }
 0x260   :  { %2729 = vrcp.f32 %v876_v20  ;;  %v903_v40 = vand.u32 2147483648, %v876_v20  ;;  %vm897_vm0 = vweird.f32 %v876_v20  ;;  %v901_v10 = vand.u32 2147483647, %v876_v20 }
 0x262   :  { %vm902_vm15 = vcmp.eq.f32.partialorder %v901_v10, 8.507059e+37 }
 0x263   :  { %v2728_v11 = vpop.eup %2727 }
 0x264   :  { %v875_v5 = vadd.f32 1.0, %v2728_v11 }
 0x266   :  { %2731 = vrcp.f32 %v875_v5  ;;  %v2730_v6 = vpop.eup %2729  ;;  %v888_v9 = vand.u32 2147483648, %v875_v5  ;;  %v886_v61 = vand.u32 2147483647, %v875_v5  ;;  %vm882_vm12 = vweird.f32 %v875_v5 }
 0x267   :  { %v893_v55 = vmul.f32 %v2730_v6, %v876_v20  ;;  %vm898_vm2 = vweird.f32 %v2730_v6  ;;  %v3947_v20 = vld [vmem:[#allocation10 + $0x168] sm:$0xff] }
 0x268   :  { %v889_v16 = vor.u32 1.1754944e-38, %v888_v9  ;;  %vm887_vm14 = vcmp.eq.f32.partialorder %v886_v61, 8.507059e+37  ;;  %vm899_vm11 = vmor %vm897_vm0, %vm898_vm2  ;;  %v3957_v61 = vld [vmem:[#allocation10 + $0x158] sm:$0xff] }
 0x269   :  { %v894_v51 = vsub.f32 1.0, %v893_v55 }
 0x26b   :  { %v895_v4 = vmul.f32 %v2730_v6, %v894_v51  ;;  %v915_v51 = vrot.slane %v3885_v1, 6  ;;  %v3954_v1 = vld [vmem:[#allocation10 + $0x150] sm:$0xff] }
 0x26c   :  { %v2732_v18 = vpop.eup %2731 }
 0x26d   :  { %v878_v52 = vmul.f32 %v2732_v18, %v875_v5  ;;  %vm883_vm1 = vweird.f32 %v2732_v18  ;;  %v896_v7 = vadd.f32 %v2730_v6, %v895_v4  ;;  %v3964_v4 = vld [vmem:[#allocation10 + $0x140] sm:$0xff] }
 0x26e   :  { %vm884_vm13 = vmor %vm882_vm12, %vm883_vm1 }
 0x26f   :  { %v879_v63 = vsub.f32 1.0, %v878_v52  ;;  %v900_v55 = vsel %vm899_vm11, %v2730_v6, %v896_v7  ;;  %v904_v52 = vor.u32 1.1754944e-38, %v903_v40  ;;  %v3950_v6 = vld [vmem:[#allocation10 + $0x170] sm:$0xff] }
 0x271   :  { %v880_v14 = vmul.f32 %v2732_v18, %v879_v63  ;;  %v905_v5 = vsel %vm902_vm15, %v904_v52, %v900_v55 }
 0x272   :  { %v913_v47 = vsub.f32 1.0, %v905_v5  ;;  %v917_v9 = vmul.f32 %v915_v51, %v905_v5 }
 0x273   :  { %v881_v8 = vadd.f32 %v2732_v18, %v880_v14 }
 0x275   :  { %v885_v53 = vsel %vm884_vm13, %v2732_v18, %v881_v8  ;;  %v3971_v8 = vld [vmem:[#allocation10 + $0x128] sm:$0xff] }
 0x276   :  { %v890_v46 = vsel %vm887_vm14, %v889_v16, %v885_v53  ;;  %v3978_v16 = vld [vmem:[#allocation10 + $0x110] sm:$0xff]  ;;  %v3992_v53 = vld [vmem:[#allocation10 + $0xe0] sm:$0xff] }
 0x277   :  { %v910_v31 = vmul.f32 %v908_v19, %v890_v46  ;;  %v3985_v19 = vld [vmem:[#allocation10 + $0xf8] sm:$0xff] }
 0x279   :  { %v911_v11 = vadd.f32 %v910_v31, %v3799_v2 }
 0x27b   :  { %2733 = vtanh.f32 %v911_v11 }
 0x281   :  { %v2734_v18 = vpop.eup %2733 }
 0x282   :  { %v914_v63 = vmul.f32 %v2734_v18, %v913_v47 }
 0x284   :  { %v3943_v62 = vadd.f32 %v917_v9, %v914_v63 }
 0x286   :  { %v920_v14 = vrot.slane %v3943_v62, 4  ;;  %v1036_v47 = vrot.slane %v3943_v62, 6  ;;  %v4041_v62 = vld [vmem:[#allocation10 + $0x160] sm:$0xff] }
 0x288   :  { %938 = vmatmul.f32.vlgmr.msrb.gmra.mxu2 %v920_v14  ;;  %958 = vmatmul.f32.vlgmr.msrb.gmra.mxu3 %v920_v14 }
 0x289   :  { %978 = vmatmul.f32.vlgmr.msrb.gmra.mxu0 %v920_v14  ;;  %1190 = vmatpush.msrb.mxu2 %v3556_v15  ;;  %v3961_v15 = vld [vmem:[#allocation10 + $0x138] sm:$0xff] }
 0x28a   :  { %1272 = vmatpush.msrb.mxu3 %v3947_v20  ;;  %1292 = vmatpush.msrb.mxu0 %v3950_v6 }
 0x28b   :  { %1191 = vmatpush.msrb.mxu2 %v3569_v21  ;;  %v3968_v21 = vld [vmem:[#allocation10 + $0x120] sm:$0xff] }
 0x28c   :  { %1273 = vmatpush.msrb.mxu3 %v3954_v1  ;;  %1293 = vmatpush.msrb.mxu0 %v3957_v61 }
 0x28d   :  { %1192 = vmatpush.msrb.mxu2 %v3579_v25  ;;  %v3975_v25 = vld [vmem:[#allocation10 + $0x108] sm:$0xff] }
 0x28e   :  { %1274 = vmatpush.msrb.mxu3 %v3961_v15  ;;  %1294 = vmatpush.msrb.mxu0 %v3964_v4 }
 0x28f   :  { %1193 = vmatpush.msrb.mxu2 %v3588_v28  ;;  %v3982_v28 = vld [vmem:[#allocation10 + $0xf0] sm:$0xff] }
 0x290   :  { %1275 = vmatpush.msrb.mxu3 %v3968_v21  ;;  %1295 = vmatpush.msrb.mxu0 %v3971_v8 }
 0x291   :  { %1194 = vmatpush.msrb.mxu2 %v3599_v32  ;;  %v3989_v32 = vld [vmem:[#allocation10 + $0xd8] sm:$0xff] }
 0x292   :  { %1276 = vmatpush.msrb.mxu3 %v3975_v25  ;;  %1296 = vmatpush.msrb.mxu0 %v3978_v16 }
 0x293   :  { %1195 = vmatpush.msrb.mxu2 %v3609_v36  ;;  %v3997_v36 = vld [vmem:[#allocation10 + $0xc8] sm:$0xff] }
 0x294   :  { %1277 = vmatpush.msrb.mxu3 %v3982_v28  ;;  %1297 = vmatpush.msrb.mxu0 %v3985_v19 }
 0x295   :  { %1196 = vmatpush.msrb.mxu2 %v3619_v39 }
 0x296   :  { %1278 = vmatpush.msrb.mxu3 %v3989_v32  ;;  %1298 = vmatpush.msrb.mxu0 %v3992_v53 }
 0x297   :  { %1197 = vmatpush.msrb.mxu2 %v3629_v45 }
 0x298   :  { %1279 = vmatpush.msrb.mxu3 %v3572_v22  ;;  %1299 = vmatpush.msrb.mxu0 %v3997_v36 }
 0x299   :  { %1198 = vmatpush.msrb.mxu2 %v3639_v49 }
 0x29a   :  { %1280 = vmatpush.msrb.mxu3 %v3582_v26  ;;  %1300 = vmatpush.msrb.mxu0 %v3576_v23 }
 0x29b   :  { %1199 = vmatpush.msrb.mxu2 %v3649_v54 }
 0x29c   :  { %1281 = vmatpush.msrb.mxu3 %v3593_v29  ;;  %1301 = vmatpush.msrb.mxu0 %v3586_v27 }
 0x29d   :  { %1200 = vmatpush.msrb.mxu2 %v3657_v56 }
 0x29e   :  { %1282 = vmatpush.msrb.mxu3 %v3603_v34  ;;  %1302 = vmatpush.msrb.mxu0 %v3597_v30 }
 0x29f   :  { %1201 = vmatpush.msrb.mxu2 %v3664_v58 }
 0x2a0   :  { %1283 = vmatpush.msrb.mxu3 %v3613_v37  ;;  %1303 = vmatpush.msrb.mxu0 %v3607_v35 }
 0x2a1   :  { %1202 = vmatpush.msrb.mxu2 %v3668_v59 }
 0x2a2   :  { %1284 = vmatpush.msrb.mxu3 %v3623_v41  ;;  %1304 = vmatpush.msrb.mxu0 %v3617_v38 }
 0x2a3   :  { %1203 = vmatpush.msrb.mxu2 %v3674_v60 }
 0x2a4   :  { %1285 = vmatpush.msrb.mxu3 %v4871_v17  ;;  %1305 = vmatpush.msrb.mxu0 %v4872_v24 }
 0x2a5   :  { %1204 = vmatpush.msrb.mxu2 %v4873_v33 }
 0x2a6   :  { %1286 = vmatpush.msrb.mxu3 %v4874_v42  ;;  %1306 = vmatpush.msrb.mxu0 %v4875_v43 }
 0x2a7   :  { %1205 = vmatpush.msrb.mxu2 %v4876_v48 }
 0x2a8   :  { %1287 = vmatpush.msrb.mxu3 %v4877_v50  ;;  %1307 = vmatpush.msrb.mxu0 %v4878_v57 }
 0x306   :  { %v979_v59 = vpop.f32.mrf.mxu0 }
 0x307   :  { %v980_v42 = vadd.f32 %v979_v59, %v3819_v3  ;;  %v2902_v59 = vld [vmem:[#allocation10 + $0x8] sm:$0xff] }
 0x30b   :  { %v939_v22 = vpop.f32.mrf.mxu2  ;;  %v959_v23 = vpop.f32.mrf.mxu3 }
 0x30c   :  { %v940_v26 = vadd.f32 %v939_v22, %v4881_v44  ;;  %v960_v27 = vadd.f32 %v959_v23, %v4879_v0 }
 0x30e   :  { %v984_v29 = vrot.slane %v940_v26, 2  ;;  %v985_v30 = vrot.slane %v960_v27, 2  ;;  %v4046_v26 = vld [vmem:[#allocation10 + $0x148] sm:$0xff]  ;;  %v4051_v27 = vld [vmem:[#allocation10 + $0x130] sm:$0xff] }
 0x310   :  { %v988_v34 = vadd.f32 %v984_v29, %v4882_v13  ;;  %v989_v35 = vadd.f32 %v985_v30, %v4880_v12  ;;  %v1029_v13 = vrot.slane %v980_v42, 2  ;;  %v2889_v29 = vld [vmem:[#allocation10 + $0x60] sm:$0xff]  ;;  %v2890_v30 = vld [vmem:[#allocation10 + $0x68] sm:$0xff] }
 0x312   :  { %v2645_v37 = vmul.f32 -1.442695, %v988_v34  ;;  %v2646_v38 = vmul.f32 -1.442695, %v989_v35  ;;  %v4087_v34 = vld [vmem:[#allocation10 + $0x58] sm:$0xff]  ;;  %v2892_v35 = vld [vmem:[#allocation10 + $0x48] sm:$0xff] }
 0x314   :  { %2735 = vpow2.f32 %v2645_v37  ;;  %v2893_v37 = vld [vmem:[#allocation10 + $0x50] sm:$0xff] }
 0x315   :  { %2737 = vpow2.f32 %v2646_v38  ;;  %v4090_v38 = vld [vmem:[#allocation10 + $0x40] sm:$0xff] }
 0x31a   :  { %v2736_v39 = vpop.eup %2735 }
 0x31b   :  { %v2738_v41 = vpop.eup %2737  ;;  %v996_v45 = vadd.f32 1.0, %v2736_v39  ;;  %v2895_v39 = vld [vmem:[#allocation10 + $0x30] sm:$0xff] }
 0x31c   :  { %v997_v49 = vadd.f32 1.0, %v2738_v41  ;;  %v2896_v41 = vld [vmem:[#allocation10 + $0x38] sm:$0xff] }
 0x31d   :  { %2739 = vrcp.f32 %v996_v45  ;;  %v1009_v24 = vand.u32 2147483648, %v996_v45  ;;  %v1007_v48 = vand.u32 2147483647, %v996_v45  ;;  %vm1003_vm12 = vweird.f32 %v996_v45 }
 0x31e   :  { %2741 = vrcp.f32 %v997_v49  ;;  %v1024_v31 = vand.u32 2147483648, %v997_v49  ;;  %vm1018_vm0 = vweird.f32 %v997_v49  ;;  %v1022_v11 = vand.u32 2147483647, %v997_v49 }
 0x31f   :  { %v1010_v12 = vor.u32 1.1754944e-38, %v1009_v24  ;;  %vm1008_vm14 = vcmp.eq.f32.partialorder %v1007_v48, 8.507059e+37  ;;  %v4883_v24 = vld [vmem:[#allocation48_spill] sm:$0xff] }
 0x320   :  { %v1025_v5 = vor.u32 1.1754944e-38, %v1024_v31  ;;  %vm1023_vm15 = vcmp.eq.f32.partialorder %v1022_v11, 8.507059e+37 }
 0x323   :  { %v2740_v54 = vpop.eup %2739 }
 0x324   :  { %v2742_v56 = vpop.eup %2741  ;;  %v999_v58 = vmul.f32 %v2740_v54, %v996_v45  ;;  %vm1004_vm1 = vweird.f32 %v2740_v54  ;;  %v4093_v45 = vld [vmem:[#allocation10 + $0x28] sm:$0xff] }
 0x325   :  { %v1014_v60 = vmul.f32 %v2742_v56, %v997_v49  ;;  %vm1005_vm13 = vmor %vm1003_vm12, %vm1004_vm1  ;;  %vm1019_vm2 = vweird.f32 %v2742_v56  ;;  %v2898_v49 = vld [vmem:[#allocation10 + $0x18] sm:$0xff] }
 0x326   :  { %v1000_v17 = vsub.f32 1.0, %v999_v58  ;;  %vm1020_vm11 = vmor %vm1018_vm0, %vm1019_vm2  ;;  %v2901_v58 = vld [vmem:[#allocation10] sm:$0xff] }
 0x327   :  { %v1015_v33 = vsub.f32 1.0, %v1014_v60 }
 0x328   :  { %v1001_v43 = vmul.f32 %v2740_v54, %v1000_v17 }
 0x329   :  { %v1016_v50 = vmul.f32 %v2742_v56, %v1015_v33 }
 0x32a   :  { %v1002_v57 = vadd.f32 %v2740_v54, %v1001_v43 }
 0x32b   :  { %v1017_v40 = vadd.f32 %v2742_v56, %v1016_v50  ;;  %v4884_v50 = vld [vmem:[#allocation52_spill] sm:$0xff] }
 0x32c   :  { %v1006_v46 = vsel %vm1005_vm13, %v2740_v54, %v1002_v57  ;;  %v2899_v54 = vld [vmem:[#allocation10 + $0x20] sm:$0xff] }
 0x32d   :  { %v1011_v7 = vsel %vm1008_vm14, %v1010_v12, %v1006_v46  ;;  %v1021_v52 = vsel %vm1020_vm11, %v2742_v56, %v1017_v40  ;;  %v4096_v56 = vld [vmem:[#allocation10 + $0x10] sm:$0xff] }
 0x32e   :  { %v1031_v10 = vmul.f32 %v1029_v13, %v1011_v7  ;;  %v1026_v51 = vsel %vm1023_vm15, %v1025_v5, %v1021_v52 }
 0x32f   :  { %v1034_v18 = vsub.f32 1.0, %v1026_v51  ;;  %v1038_v14 = vmul.f32 %v1036_v47, %v1026_v51 }
 0x330   :  { %v1032_v55 = vadd.f32 %v1031_v10, %v3799_v2  ;;  %v4036_v2 = vld [vmem:[#allocation10 + $0x178] sm:$0xff] }
 0x332   :  { %2743 = vtanh.f32 %v1032_v55 }
 0x338   :  { %v2744_v63 = vpop.eup %2743 }
 0x339   :  { %v1035_v9 = vmul.f32 %v2744_v63, %v1034_v18 }
 0x33b   :  { %v1039_v22 = vadd.f32 %v1038_v14, %v1035_v9 }
 0x33d   :  { %v4031_v23 = vrot.slane %v1039_v22, 6 }
 0x33f   :  { %1059 = vmatmul.f32.vlgmr.msrb.gmra.mxu1 %v4031_v23  ;;  %1079 = vmatmul.f32.vlgmr.msra.gmra.mxu2 %v4031_v23 }
 0x340   :  { %1099 = vmatmul.f32.vlgmr.msra.gmra.mxu3 %v4031_v23  ;;  %1312 = vmatpush.msrb.mxu1 %v4036_v2 }
 0x341   :  { %1393 = vmatpush.msra.mxu2 %v3947_v20  ;;  %1413 = vmatpush.msra.mxu3 %v3950_v6  ;;  %v4056_v20 = vld [vmem:[#allocation10 + $0x118] sm:$0xff]  ;;  %v4061_v6 = vld [vmem:[#allocation10 + $0x100] sm:$0xff] }
 0x342   :  { %1313 = vmatpush.msrb.mxu1 %v4041_v62 }
 0x343   :  { %1394 = vmatpush.msra.mxu2 %v3954_v1  ;;  %1414 = vmatpush.msra.mxu3 %v3957_v61  ;;  %v4066_v1 = vld [vmem:[#allocation10 + $0xe8] sm:$0xff]  ;;  %v4071_v61 = vld [vmem:[#allocation10 + $0xd0] sm:$0xff] }
 0x344   :  { %1314 = vmatpush.msrb.mxu1 %v4046_v26 }
 0x345   :  { %1395 = vmatpush.msra.mxu2 %v3961_v15  ;;  %1415 = vmatpush.msra.mxu3 %v3964_v4  ;;  %v2878_v15 = vld [vmem:[#allocation10 + $0xc0] sm:$0xff]  ;;  %v4075_v4 = vld [vmem:[#allocation10 + $0xb8] sm:$0xff] }
 0x346   :  { %1315 = vmatpush.msrb.mxu1 %v4051_v27 }
 0x347   :  { %1396 = vmatpush.msra.mxu2 %v3968_v21  ;;  %1416 = vmatpush.msra.mxu3 %v3971_v8  ;;  %v2880_v21 = vld [vmem:[#allocation10 + $0xa8] sm:$0xff]  ;;  %v2881_v8 = vld [vmem:[#allocation10 + $0xb0] sm:$0xff] }
 0x348   :  { %1316 = vmatpush.msrb.mxu1 %v4056_v20 }
 0x349   :  { %1397 = vmatpush.msra.mxu2 %v3975_v25  ;;  %1417 = vmatpush.msra.mxu3 %v3978_v16  ;;  %v4078_v25 = vld [vmem:[#allocation10 + $0xa0] sm:$0xff]  ;;  %v2883_v16 = vld [vmem:[#allocation10 + $0x90] sm:$0xff] }
 0x34a   :  { %1317 = vmatpush.msrb.mxu1 %v4061_v6 }
 0x34b   :  { %1398 = vmatpush.msra.mxu2 %v3982_v28  ;;  %1418 = vmatpush.msra.mxu3 %v3985_v19  ;;  %v2884_v28 = vld [vmem:[#allocation10 + $0x98] sm:$0xff]  ;;  %v4081_v19 = vld [vmem:[#allocation10 + $0x88] sm:$0xff] }
 0x34c   :  { %1318 = vmatpush.msrb.mxu1 %v4066_v1 }
 0x34d   :  { %1399 = vmatpush.msra.mxu2 %v3989_v32  ;;  %1419 = vmatpush.msra.mxu3 %v3992_v53  ;;  %v2886_v32 = vld [vmem:[#allocation10 + $0x78] sm:$0xff]  ;;  %v2887_v53 = vld [vmem:[#allocation10 + $0x80] sm:$0xff] }
 0x34e   :  { %1319 = vmatpush.msrb.mxu1 %v4071_v61 }
 0x34f   :  { %1400 = vmatpush.msra.mxu2 %v2878_v15  ;;  %1420 = vmatpush.msra.mxu3 %v3997_v36  ;;  %v4084_v36 = vld [vmem:[#allocation10 + $0x70] sm:$0xff] }
 0x350   :  { %1320 = vmatpush.msrb.mxu1 %v4075_v4 }
 0x351   :  { %1401 = vmatpush.msra.mxu2 %v2880_v21  ;;  %1421 = vmatpush.msra.mxu3 %v2881_v8 }
 0x352   :  { %1321 = vmatpush.msrb.mxu1 %v4078_v25 }
 0x353   :  { %1402 = vmatpush.msra.mxu2 %v2883_v16  ;;  %1422 = vmatpush.msra.mxu3 %v2884_v28 }
 0x354   :  { %1322 = vmatpush.msrb.mxu1 %v4081_v19 }
 0x355   :  { %1403 = vmatpush.msra.mxu2 %v2886_v32  ;;  %1423 = vmatpush.msra.mxu3 %v2887_v53  ;;  %v4885_v53 = vld [vmem:[#allocation47_spill] sm:$0xff] }
 0x356   :  { %1323 = vmatpush.msrb.mxu1 %v4084_v36 }
 0x357   :  { %1404 = vmatpush.msra.mxu2 %v2889_v29  ;;  %1424 = vmatpush.msra.mxu3 %v2890_v30 }
 0x358   :  { %1324 = vmatpush.msrb.mxu1 %v4087_v34 }
 0x359   :  { %1405 = vmatpush.msra.mxu2 %v2892_v35  ;;  %1425 = vmatpush.msra.mxu3 %v2893_v37 }
 0x35a   :  { %1325 = vmatpush.msrb.mxu1 %v4090_v38 }
 0x35b   :  { %1406 = vmatpush.msra.mxu2 %v2895_v39  ;;  %1426 = vmatpush.msra.mxu3 %v2896_v41 }
 0x35c   :  { %1326 = vmatpush.msrb.mxu1 %v4093_v45 }
 0x35d   :  { %1407 = vmatpush.msra.mxu2 %v2898_v49  ;;  %1427 = vmatpush.msra.mxu3 %v2899_v54 }
 0x35e   :  { %1327 = vmatpush.msrb.mxu1 %v4096_v56 }
 0x35f   :  { %1408 = vmatpush.msra.mxu2 %v2901_v58  ;;  %1428 = vmatpush.msra.mxu3 %v2902_v59 }
 0x3bc   :  { %v1060_v60 = vpop.f32.mrf.mxu1 }
 0x3bd   :  { %v1061_v17 = vadd.f32 %v1060_v60, %v4881_v44 }
 0x3bf   :  { %v1103_v33 = vadd.f32 %v1061_v17, %v4883_v24 }
 0x3c1   :  { %v2647_v42 = vmul.f32 -1.442695, %v1103_v33 }
 0x3c2   :  { %v1080_v43 = vpop.f32.mrf.mxu2 }
 0x3c3   :  { %2745 = vpow2.f32 %v2647_v42  ;;  %v1081_v48 = vadd.f32 %v1080_v43, %v4879_v0  ;;  %v1100_v47 = vpop.f32.mrf.mxu3 }
 0x3c4   :  { %v1101_v22 = vadd.f32 %v1100_v47, %v3819_v3 }
 0x3c5   :  { %v1104_v57 = vadd.f32 %v1081_v48, %v4884_v50 }
 0x3c7   :  { %v2648_v12 = vmul.f32 -1.442695, %v1104_v57 }
 0x3c9   :  { %v2746_v13 = vpop.eup %2745  ;;  %2747 = vpow2.f32 %v2648_v12 }
 0x3ca   :  { %v1111_v46 = vadd.f32 1.0, %v2746_v13 }
 0x3cc   :  { %2749 = vrcp.f32 %v1111_v46  ;;  %v1124_v55 = vand.u32 2147483648, %v1111_v46  ;;  %v1122_v5 = vand.u32 2147483647, %v1111_v46  ;;  %vm1118_vm12 = vweird.f32 %v1111_v46 }
 0x3ce   :  { %v1125_v9 = vor.u32 1.1754944e-38, %v1124_v55  ;;  %vm1123_vm14 = vcmp.eq.f32.partialorder %v1122_v5, 8.507059e+37 }
 0x3cf   :  { %v2748_v7 = vpop.eup %2747 }
 0x3d0   :  { %v1112_v40 = vadd.f32 1.0, %v2748_v7 }
 0x3d2   :  { %v2750_v31 = vpop.eup %2749  ;;  %2751 = vrcp.f32 %v1112_v40  ;;  %v1139_v28 = vand.u32 2147483648, %v1112_v40  ;;  %v1137_v32 = vand.u32 2147483647, %v1112_v40  ;;  %vm1133_vm0 = vweird.f32 %v1112_v40 }
 0x3d3   :  { %v1114_v10 = vmul.f32 %v2750_v31, %v1111_v46  ;;  %vm1119_vm1 = vweird.f32 %v2750_v31 }
 0x3d4   :  { %vm1120_vm13 = vmor %vm1118_vm12, %vm1119_vm1  ;;  %v1140_v37 = vor.u32 1.1754944e-38, %v1139_v28  ;;  %vm1138_vm15 = vcmp.eq.f32.partialorder %v1137_v32, 8.507059e+37 }
 0x3d5   :  { %v1115_v11 = vsub.f32 1.0, %v1114_v10 }
 0x3d7   :  { %v1116_v52 = vmul.f32 %v2750_v31, %v1115_v11 }
 0x3d8   :  { %v2752_v51 = vpop.eup %2751 }
 0x3d9   :  { %v1129_v18 = vmul.f32 %v2752_v51, %v1112_v40  ;;  %v1117_v63 = vadd.f32 %v2750_v31, %v1116_v52  ;;  %vm1134_vm2 = vweird.f32 %v2752_v51 }
 0x3da   :  { %vm1135_vm11 = vmor %vm1133_vm0, %vm1134_vm2 }
 0x3db   :  { %v1130_v14 = vsub.f32 1.0, %v1129_v18  ;;  %v1121_v15 = vsel %vm1120_vm13, %v2750_v31, %v1117_v63 }
 0x3dc   :  { %v1126_v21 = vsel %vm1123_vm14, %v1125_v9, %v1121_v15 }
 0x3dd   :  { %v1143_v8 = vmul.f32 %v1126_v21, %v1101_v22  ;;  %v1131_v16 = vmul.f32 %v2752_v51, %v1130_v14 }
 0x3df   :  { %v1144_v29 = vadd.f32 %v1143_v8, %v4885_v53  ;;  %v1132_v30 = vadd.f32 %v2752_v51, %v1131_v16 }
 0x3e1   :  { %2753 = vtanh.f32 %v1144_v29  ;;  %v1136_v35 = vsel %vm1135_vm11, %v2752_v51, %v1132_v30 }
 0x3e2   :  { %v1141_v39 = vsel %vm1138_vm15, %v1140_v37, %v1136_v35 }
 0x3e3   :  { %v1146_v41 = vsub.f32 1.0, %v1141_v39  ;;  %v1148_v58 = vmul.f32 %v1141_v39, %v4031_v23 }
 0x3e7   :  { %v2754_v49 = vpop.eup %2753 }
 0x3e8   :  { %v1147_v54 = vmul.f32 %v2754_v49, %v1146_v41 }
 0x3ea   :  { %v4106_v59 = vadd.f32 %v1148_v58, %v1147_v54 }
 0x3ec   :  { %1166 = vmatmul.f32.vlgmr.msra.gmra.mxu0 %v4106_v59  ;;  %1186 = vmatmul.f32.vlgmr.msra.gmra.mxu1 %v4106_v59  ;;  %v1265_v14 = vrot.slane %v4106_v59, 6 }
 0x3ed   :  { %1206 = vmatmul.f32.vlgmr.msrb.gmra.mxu2 %v4106_v59  ;;  %1433 = vmatpush.msra.mxu0 %v4036_v2 }
 0x3ef   :  { %1434 = vmatpush.msra.mxu0 %v4041_v62 }
 0x3f1   :  { %1435 = vmatpush.msra.mxu0 %v4046_v26 }
 0x3f3   :  { %1436 = vmatpush.msra.mxu0 %v4051_v27 }
 0x3f5   :  { %1437 = vmatpush.msra.mxu0 %v4056_v20 }
 0x3f7   :  { %1438 = vmatpush.msra.mxu0 %v4061_v6 }
 0x3f9   :  { %1439 = vmatpush.msra.mxu0 %v4066_v1 }
 0x3fb   :  { %1440 = vmatpush.msra.mxu0 %v4071_v61 }
 0x3fd   :  { %1441 = vmatpush.msra.mxu0 %v4075_v4 }
 0x3ff   :  { %1442 = vmatpush.msra.mxu0 %v4078_v25 }
 0x401   :  { %1443 = vmatpush.msra.mxu0 %v4081_v19 }
 0x403   :  { %1444 = vmatpush.msra.mxu0 %v4084_v36 }
 0x405   :  { %1445 = vmatpush.msra.mxu0 %v4087_v34 }
 0x407   :  { %1446 = vmatpush.msra.mxu0 %v4090_v38 }
 0x409   :  { %1447 = vmatpush.msra.mxu0 %v4093_v45 }
 0x40b   :  { %1448 = vmatpush.msra.mxu0 %v4096_v56 }
 0x469   :  { %v1167_v23 = vpop.f32.mrf.mxu0  ;;  %v1187_v2 = vpop.f32.mrf.mxu1 }
 0x46a   :  { %v1168_v62 = vadd.f32 %v1167_v23, %v4881_v44  ;;  %v1188_v26 = vadd.f32 %v1187_v2, %v4879_v0 }
 0x46c   :  { %v1212_v27 = vrot.slane %v1168_v62, 6  ;;  %v1213_v20 = vrot.slane %v1188_v26, 6 }
 0x46e   :  { %v1216_v6 = vadd.f32 %v1212_v27, %v4883_v24  ;;  %v1217_v1 = vadd.f32 %v1213_v20, %v4884_v50 }
 0x470   :  { %v2649_v61 = vmul.f32 -1.442695, %v1216_v6  ;;  %v2650_v4 = vmul.f32 -1.442695, %v1217_v1  ;;  %v1207_v17 = vpop.f32.mrf.mxu2 }
 0x471   :  { %v1208_v48 = vadd.f32 %v1207_v17, %v3819_v3 }
 0x472   :  { %2755 = vpow2.f32 %v2649_v61 }
 0x473   :  { %2757 = vpow2.f32 %v2650_v4  ;;  %v1257_v31 = vrot.slane %v1208_v48, 6 }
 0x478   :  { %v2756_v25 = vpop.eup %2755 }
 0x479   :  { %v2758_v19 = vpop.eup %2757  ;;  %v1224_v36 = vadd.f32 1.0, %v2756_v25 }
 0x47a   :  { %v1225_v34 = vadd.f32 1.0, %v2758_v19 }
 0x47b   :  { %2759 = vrcp.f32 %v1224_v36  ;;  %v1237_v43 = vand.u32 2147483648, %v1224_v36  ;;  %v1235_v12 = vand.u32 2147483647, %v1224_v36  ;;  %vm1231_vm12 = vweird.f32 %v1224_v36 }
 0x47c   :  { %2761 = vrcp.f32 %v1225_v34  ;;  %v1252_v52 = vand.u32 2147483648, %v1225_v34  ;;  %vm1246_vm0 = vweird.f32 %v1225_v34  ;;  %v1250_v5 = vand.u32 2147483647, %v1225_v34 }
 0x47d   :  { %v1238_v7 = vor.u32 1.1754944e-38, %v1237_v43  ;;  %vm1236_vm14 = vcmp.eq.f32.partialorder %v1235_v12, 8.507059e+37 }
 0x47e   :  { %v1253_v18 = vor.u32 1.1754944e-38, %v1252_v52  ;;  %vm1251_vm15 = vcmp.eq.f32.partialorder %v1250_v5, 8.507059e+37  ;;  %v1526_v5 = vld [vmem:[#allocation13 + $0x78] sm:$0xff] }
 0x47f   :  { %1530 = vmatpush.msra.mxu1 %v1526_v5 }
 0x481   :  { %v2760_v38 = vpop.eup %2759 }
 0x482   :  { %v2762_v45 = vpop.eup %2761  ;;  %v1227_v56 = vmul.f32 %v2760_v38, %v1224_v36  ;;  %vm1232_vm1 = vweird.f32 %v2760_v38 }
 0x483   :  { %v1242_v60 = vmul.f32 %v2762_v45, %v1225_v34  ;;  %vm1233_vm13 = vmor %vm1231_vm12, %vm1232_vm1  ;;  %vm1247_vm2 = vweird.f32 %v2762_v45 }
 0x484   :  { %v1228_v33 = vsub.f32 1.0, %v1227_v56  ;;  %vm1248_vm11 = vmor %vm1246_vm0, %vm1247_vm2 }
 0x485   :  { %v1243_v42 = vsub.f32 1.0, %v1242_v60 }
 0x486   :  { %v1229_v57 = vmul.f32 %v2760_v38, %v1228_v33 }
 0x487   :  { %v1244_v13 = vmul.f32 %v2762_v45, %v1243_v42 }
 0x488   :  { %v1230_v46 = vadd.f32 %v2760_v38, %v1229_v57 }
 0x489   :  { %v1245_v11 = vadd.f32 %v2762_v45, %v1244_v13 }
 0x48a   :  { %v1234_v40 = vsel %vm1233_vm13, %v2760_v38, %v1230_v46 }
 0x48b   :  { %v1239_v10 = vsel %vm1236_vm14, %v1238_v7, %v1234_v40  ;;  %v1249_v47 = vsel %vm1248_vm11, %v2762_v45, %v1245_v11 }
 0x48c   :  { %v1259_v55 = vmul.f32 %v1257_v31, %v1239_v10  ;;  %v1254_v63 = vsel %vm1251_vm15, %v1253_v18, %v1249_v47  ;;  %v1524_v47 = vld [vmem:[#allocation13 + $0x68] sm:$0xff]  ;;  %v1523_v18 = vld [vmem:[#allocation13 + $0x60] sm:$0xff] }
 0x48d   :  { %v1262_v9 = vsub.f32 1.0, %v1254_v63  ;;  %v1267_v21 = vmul.f32 %v1265_v14, %v1254_v63  ;;  %v1522_v63 = vld [vmem:[#allocation13 + $0x58] sm:$0xff] }
 0x48e   :  { %v1260_v51 = vadd.f32 %v1259_v55, %v4885_v53 }
 0x490   :  { %2763 = vtanh.f32 %v1260_v51  ;;  %v1525_v51 = vld [vmem:[#allocation13 + $0x70] sm:$0xff] }
 0x491   :  { %1531 = vmatpush.msra.mxu1 %v1525_v51  ;;  %v1608_v51 = vld [vmem:[#allocation17 + $0x58] sm:$0xff] }
 0x493   :  { %1532 = vmatpush.msra.mxu1 %v1524_v47 }
 0x495   :  { %1533 = vmatpush.msra.mxu1 %v1523_v18 }
 0x496   :  { %v2764_v22 = vpop.eup %2763 }
 0x497   :  { %v1263_v15 = vmul.f32 %v2764_v22, %v1262_v9  ;;  %1534 = vmatpush.msra.mxu1 %v1522_v63  ;;  %v1521_v9 = vld [vmem:[#allocation13 + $0x50] sm:$0xff] }
 0x499   :  { %v1268_v8 = vadd.f32 %v1267_v21, %v1263_v15  ;;  %1535 = vmatpush.msra.mxu1 %v1521_v9  ;;  %v1603_v9 = vld [vmem:[#allocation17 + $0x30] sm:$0xff] }
 0x49b   :  { %v1270_v16 = vrot.slane %v1268_v8, 2  ;;  %v1386_v7 = vrot.slane %v1268_v8, 6  ;;  %v1520_v8 = vld [vmem:[#allocation13 + $0x48] sm:$0xff] }
 0x49c   :  { %1536 = vmatpush.msra.mxu1 %v1520_v8  ;;  %v4186_v8 = vld [vmem:[#allocation19 + $0x168] sm:$0xff] }
 0x49d   :  { %1288 = vmatmul.f32.vlgmr.msrb.gmra.mxu3 %v1270_v16  ;;  %1308 = vmatmul.f32.vlgmr.msrb.gmra.mxu0 %v1270_v16 }
 0x49e   :  { %1328 = vmatmul.f32.vlgmr.msrb.gmra.mxu1 %v1270_v16  ;;  %v1519_v16 = vld [vmem:[#allocation13 + $0x40] sm:$0xff] }
 0x49f   :  { %1537 = vmatpush.msra.mxu1 %v1519_v16 }
 0x51a   :  { %v1309_v28 = vpop.f32.mrf.mxu0 }
 0x51b   :  { %v1310_v32 = vadd.f32 %v1309_v28, %v4879_v0  ;;  %v1329_v1 = vpop.f32.mrf.mxu1 }
 0x51c   :  { %v1330_v25 = vadd.f32 %v1329_v1, %v3819_v3  ;;  %v1615_v1 = vld [vmem:[#allocation17 + $0x90] sm:$0xff] }
 0x51d   :  { %v1335_v29 = vrot.slane %v1310_v32, 4 }
 0x51e   :  { %v1379_v56 = vrot.slane %v1330_v25, 4 }
 0x51f   :  { %v1339_v30 = vadd.f32 %v1335_v29, %v4884_v50  ;;  %v1518_v29 = vld [vmem:[#allocation13 + $0x38] sm:$0xff] }
 0x520   :  { %v1289_v35 = vpop.f32.mrf.mxu3  ;;  %1538 = vmatpush.msra.mxu1 %v1518_v29 }
 0x521   :  { %v2652_v37 = vmul.f32 -1.442695, %v1339_v30  ;;  %v1290_v39 = vadd.f32 %v1289_v35, %v4881_v44 }
 0x523   :  { %2765 = vpow2.f32 %v2652_v37  ;;  %v1334_v41 = vrot.slane %v1290_v39, 4  ;;  %v1517_v37 = vld [vmem:[#allocation13 + $0x30] sm:$0xff] }
 0x524   :  { %1539 = vmatpush.msra.mxu1 %v1517_v37 }
 0x525   :  { %v1338_v49 = vadd.f32 %v1334_v41, %v4883_v24 }
 0x527   :  { %v2651_v54 = vmul.f32 -1.442695, %v1338_v49  ;;  %v1516_v49 = vld [vmem:[#allocation13 + $0x28] sm:$0xff] }
 0x528   :  { %1540 = vmatpush.msra.mxu1 %v1516_v49  ;;  %v4887_v49 = vld [vmem:[#allocation35_spill] sm:$0xff] }
 0x529   :  { %v2766_v58 = vpop.eup %2765  ;;  %2767 = vpow2.f32 %v2651_v54  ;;  %v1513_v54 = vld [vmem:[#allocation13 + $0x10] sm:$0xff] }
 0x52a   :  { %v1347_v59 = vadd.f32 1.0, %v2766_v58 }
 0x52c   :  { %2769 = vrcp.f32 %v1347_v59  ;;  %v1374_v42 = vand.u32 2147483648, %v1347_v59  ;;  %vm1368_vm0 = vweird.f32 %v1347_v59  ;;  %v1372_v48 = vand.u32 2147483647, %v1347_v59 }
 0x52e   :  { %v1375_v13 = vor.u32 1.1754944e-38, %v1374_v42  ;;  %vm1373_vm15 = vcmp.eq.f32.partialorder %v1372_v48, 8.507059e+37  ;;  %v1610_v48 = vld [vmem:[#allocation17 + $0x68] sm:$0xff] }
 0x52f   :  { %v2768_v23 = vpop.eup %2767 }
 0x530   :  { %v1346_v2 = vadd.f32 1.0, %v2768_v23 }
 0x532   :  { %2771 = vrcp.f32 %v1346_v2  ;;  %v2770_v62 = vpop.eup %2769  ;;  %v1359_v4 = vand.u32 2147483648, %v1346_v2  ;;  %v1357_v36 = vand.u32 2147483647, %v1346_v2  ;;  %vm1353_vm12 = vweird.f32 %v1346_v2 }
 0x533   :  { %v1364_v26 = vmul.f32 %v2770_v62, %v1347_v59  ;;  %vm1369_vm2 = vweird.f32 %v2770_v62 }
 0x534   :  { %v1360_v45 = vor.u32 1.1754944e-38, %v1359_v4  ;;  %vm1358_vm14 = vcmp.eq.f32.partialorder %v1357_v36, 8.507059e+37  ;;  %vm1370_vm11 = vmor %vm1368_vm0, %vm1369_vm2  ;;  %v1617_v4 = vld [vmem:[#allocation17 + $0xa0] sm:$0xff]  ;;  %v1567_v36 = vstv %s4149_s0 }
 0x535   :  { %v1365_v6 = vsub.f32 1.0, %v1364_v26  ;;  %v1619_v26 = vld [vmem:[#allocation17 + $0xb0] sm:$0xff] }
 0x536   :  { %1658 = vmatpush.msrb.mxu3 %v1619_v26 }
 0x537   :  { %v1366_v34 = vmul.f32 %v2770_v62, %v1365_v6  ;;  %v1564_v6 = vstv %s4147_s9 }
 0x538   :  { %v2772_v27 = vpop.eup %2771 }
 0x539   :  { %v1349_v20 = vmul.f32 %v2772_v27, %v1346_v2  ;;  %vm1354_vm1 = vweird.f32 %v2772_v27  ;;  %v1367_v33 = vadd.f32 %v2770_v62, %v1366_v34  ;;  %v1511_v2 = vld [vmem:[#allocation13] sm:$0xff] }
 0x53a   :  { %vm1355_vm13 = vmor %vm1353_vm12, %vm1354_vm1  ;;  %v1612_v34 = vld [vmem:[#allocation17 + $0x78] sm:$0xff] }
 0x53b   :  { %v1350_v61 = vsub.f32 1.0, %v1349_v20  ;;  %v1371_v12 = vsel %vm1370_vm11, %v2770_v62, %v1367_v33  ;;  %v1618_v62 = vld [vmem:[#allocation17 + $0xa8] sm:$0xff]  ;;  %v1561_v20 = vstv %s1551_s27  ;;  %v1573_v33 = vstv %s4153_s28 }
 0x53c   :  { %v1376_v46 = vsel %vm1373_vm15, %v1375_v13, %v1371_v12  ;;  %1635 = vmatpush.msrb.mxu2 %v1618_v62 }
 0x53d   :  { %v1351_v19 = vmul.f32 %v2772_v27, %v1350_v61  ;;  %v1384_v40 = vsub.f32 1.0, %v1376_v46  ;;  %v1388_v11 = vmul.f32 %v1386_v7, %v1376_v46  ;;  %v1616_v61 = vld [vmem:[#allocation17 + $0x98] sm:$0xff]  ;;  %v1611_v7 = vld [vmem:[#allocation17 + $0x70] sm:$0xff] }
 0x53e   :  { %1636 = vmatpush.msrb.mxu2 %v1615_v1  ;;  %1659 = vmatpush.msrb.mxu3 %v1616_v61  ;;  %v4216_v1 = vld [vmem:[#allocation19 + $0x158] sm:$0xff]  ;;  %v4218_v61 = vld [vmem:[#allocation19 + $0x160] sm:$0xff] }
 0x53f   :  { %v1352_v38 = vadd.f32 %v2772_v27, %v1351_v19  ;;  %v1562_v19 = vsel %vm338_vm3, %v1561_v20, 0 }
 0x540   :  { %1637 = vmatpush.msrb.mxu2 %v1612_v34  ;;  %v4235_v34 = vld [vmem:[#allocation19 + $0x148] sm:$0xff] }
 0x541   :  { %v1356_v60 = vsel %vm1355_vm13, %v2772_v27, %v1352_v38  ;;  %v1620_v27 = vld [vmem:[#allocation17 + $0xb8] sm:$0xff]  ;;  %v1613_v38 = vld [vmem:[#allocation17 + $0x80] sm:$0xff] }
 0x542   :  { %v1361_v17 = vsel %vm1358_vm14, %v1360_v45, %v1356_v60  ;;  %1681 = vmatpush.msrb.mxu0 %v1620_v27  ;;  %v1565_v45 = vsel %vm343_vm4, %v1564_v6, %v1562_v19  ;;  %v1614_v60 = vld [vmem:[#allocation17 + $0x88] sm:$0xff]  ;;  %1660 = vmatpush.msrb.mxu3 %v1613_v38  ;;  %v4888_v27 = vmov 0.0  }
 0x543   :  { %v1381_v43 = vmul.f32 %v1379_v56, %v1361_v17  ;;  %v1570_v56 = vstv %s4151_s10  ;;  %v1568_v17 = vsel %vm348_vm5, %v1567_v36, %v1565_v45  ;;  %v4233_v36 = vld [vmem:[#allocation19 + $0x140] sm:$0xff]  ;;  %v4244_v45 = vld [vmem:[#allocation19 + $0x128] sm:$0xff] }
 0x544   :  { %1682 = vmatpush.msrb.mxu0 %v1617_v4  ;;  %1661 = vmatpush.msrb.mxu3 %v1610_v48  ;;  %v4359_v4 = vld [vmem:[#allocation19 + $0x38] sm:$0xff] }
 0x545   :  { %v1382_v57 = vadd.f32 %v1381_v43, %v4885_v53  ;;  %v1609_v43 = vld [vmem:[#allocation17 + $0x60] sm:$0xff]  ;;  %4896 = vst [vmem:[#allocation37_spill] sm:$0xff] %v4359_v4 }
 0x546   :  { %1683 = vmatpush.msrb.mxu0 %v1614_v60  ;;  %1638 = vmatpush.msrb.mxu2 %v1609_v43  ;;  %v4262_v43 = vld [vmem:[#allocation19 + $0xf0] sm:$0xff] }
 0x547   :  { %2773 = vtanh.f32 %v1382_v57  ;;  %v1571_v57 = vsel %vm353_vm6, %v1570_v56, %v1568_v17  ;;  %v4246_v56 = vld [vmem:[#allocation19 + $0x130] sm:$0xff]  ;;  %v4252_v17 = vld [vmem:[#allocation19 + $0x108] sm:$0xff] }
 0x548   :  { %1684 = vmatpush.msrb.mxu0 %v1611_v7  ;;  %v4273_v7 = vld [vmem:[#allocation19 + $0xd8] sm:$0xff] }
 0x54a   :  { %1685 = vmatpush.msrb.mxu0 %v1608_v51  ;;  %v4288_v51 = vld [vmem:[#allocation19 + $0xd0] sm:$0xff] }
 0x54d   :  { %v2774_v31 = vpop.eup %2773 }
 0x54e   :  { %v1385_v10 = vmul.f32 %v2774_v31, %v1384_v40  ;;  %v1606_v31 = vld [vmem:[#allocation17 + $0x48] sm:$0xff] }
 0x54f   :  { %1639 = vmatpush.msrb.mxu2 %v1606_v31 }
 0x550   :  { %v4140_v55 = vadd.f32 %v1388_v11, %v1385_v10  ;;  %v1607_v10 = vld [vmem:[#allocation17 + $0x50] sm:$0xff]  ;;  %v1574_v11 = vsel %vm358_vm7, %v1573_v33, %v1571_v57 }
 0x551   :  { %1662 = vmatpush.msrb.mxu3 %v1607_v10  ;;  %1640 = vmatpush.msrb.mxu2 %v1603_v9  ;;  %v4255_v33 = vld [vmem:[#allocation19 + $0x110] sm:$0xff]  ;;  %v4278_v10 = vld [vmem:[#allocation19 + $0xe8] sm:$0xff]  ;;  %v4301_v9 = vld [vmem:[#allocation19 + $0xb8] sm:$0xff] }
 0x552   :  { %v1391_v52 = vrot.slane %v4140_v55, 4  ;;  %v1507_v48 = vrot.slane %v4140_v55, 6  ;;  %v4276_v55 = vld [vmem:[#allocation19 + $0xe0] sm:$0xff] }
 0x554   :  { %1409 = vmatmul.f32.vlgmr.msra.gmra.mxu2 %v1391_v52  ;;  %1429 = vmatmul.f32.vlgmr.msra.gmra.mxu3 %v1391_v52 }
 0x555   :  { %1449 = vmatmul.f32.vlgmr.msra.gmra.mxu0 %v1391_v52  ;;  %v1576_v52 = vstv %s4160_s11 }
 0x556   :  { %v1577_v16 = vsel %vm363_vm8, %v1576_v52, %v1574_v11  ;;  %v4283_v11 = vld [vmem:[#allocation19 + $0xc0] sm:$0xff] }
 0x557   :  { %vm1591_vm14 = vcmp.eq.s32.totalorder %v4887_v49, %v1577_v16  ;;  %v4316_v16 = vld [vmem:[#allocation19 + $0x80] sm:$0xff] }
 0x558   :  { %v4211_v20 = vsel %vm1591_vm14, 1.0, %v4888_v27 }
 0x5d2   :  { %v1450_v13 = vpop.f32.mrf.mxu0 }
 0x5d3   :  { %v1451_v47 = vadd.f32 %v1450_v13, %v3819_v3  ;;  %v4268_v13 = vld [vmem:[#allocation19 + $0x100] sm:$0xff] }
 0x5d7   :  { %v1410_v14 = vpop.f32.mrf.mxu2  ;;  %v1430_v22 = vpop.f32.mrf.mxu3 }
 0x5d8   :  { %v1411_v15 = vadd.f32 %v1410_v14, %v4881_v44  ;;  %v1431_v21 = vadd.f32 %v1430_v22, %v4879_v0  ;;  %v1515_v44 = vld [vmem:[#allocation13 + $0x20] sm:$0xff]  ;;  %v1514_v0 = vld [vmem:[#allocation13 + $0x18] sm:$0xff] }
 0x5d9   :  { %1541 = vmatpush.msra.mxu1 %v1515_v44  ;;  %v1604_v14 = vld [vmem:[#allocation17 + $0x38] sm:$0xff]  ;;  %v1500_v44 = vrot.slane %v1451_v47, 2 }
 0x5da   :  { %v1455_v28 = vrot.slane %v1411_v15, 2  ;;  %v1456_v32 = vrot.slane %v1431_v21, 2  ;;  %v1605_v21 = vld [vmem:[#allocation17 + $0x40] sm:$0xff]  ;;  %1663 = vmatpush.msrb.mxu3 %v1604_v14  ;;  %v4305_v14 = vld [vmem:[#allocation19 + $0x90] sm:$0xff] }
 0x5db   :  { %1542 = vmatpush.msra.mxu1 %v1514_v0  ;;  %1686 = vmatpush.msrb.mxu0 %v1605_v21  ;;  %v4314_v21 = vld [vmem:[#allocation19 + $0x78] sm:$0xff] }
 0x5dc   :  { %v1459_v30 = vadd.f32 %v1455_v28, %v4883_v24  ;;  %v1460_v35 = vadd.f32 %v1456_v32, %v4884_v50  ;;  %v1512_v50 = vld [vmem:[#allocation13 + $0x8] sm:$0xff] }
 0x5dd   :  { %1543 = vmatpush.msra.mxu1 %v1513_v54  ;;  %v1600_v28 = vld [vmem:[#allocation17 + $0x18] sm:$0xff]  ;;  %v1601_v32 = vld [vmem:[#allocation17 + $0x20] sm:$0xff]  ;;  %v1599_v54 = vld [vmem:[#allocation17 + $0x10] sm:$0xff] }
 0x5de   :  { %v2653_v39 = vmul.f32 -1.442695, %v1459_v30  ;;  %v2654_v41 = vmul.f32 -1.442695, %v1460_v35  ;;  %v1602_v30 = vld [vmem:[#allocation17 + $0x28] sm:$0xff]  ;;  %v4193_v35 = vld [vmem:[#allocation19 + $0x150] sm:$0xff]  ;;  %1641 = vmatpush.msrb.mxu2 %v1600_v28  ;;  %1664 = vmatpush.msrb.mxu3 %v1601_v32  ;;  %v1579_v28 = vstv %s2660_s1 }
 0x5df   :  { %1544 = vmatpush.msra.mxu1 %v1512_v50  ;;  %1687 = vmatpush.msrb.mxu0 %v1602_v30  ;;  %v4891_v32 = vld [vmem:[#allocation36_spill] sm:$0xff]  ;;  %v1582_v30 = vstv %s2661_s12 }
 0x5e0   :  { %2775 = vpow2.f32 %v2653_v39  ;;  %v1597_v39 = vld [vmem:[#allocation17] sm:$0xff]  ;;  %vm4894_vm14 = vcmp.eq.s32.totalorder %v4891_v32, 11 }
 0x5e1   :  { %2777 = vpow2.f32 %v2654_v41  ;;  %1545 = vmatpush.msra.mxu1 %v1511_v2  ;;  %v1598_v41 = vld [vmem:[#allocation17 + $0x8] sm:$0xff]  ;;  %v4204_v2 = vld [vmem:[#allocation19 + $0x178] sm:$0xff]  ;;  %1642 = vmatpush.msrb.mxu2 %v1597_v39  ;;  %v1585_v39 = vstv %s2662_s17 }
 0x5e2   :  { %1665 = vmatpush.msrb.mxu3 %v1598_v41  ;;  %1688 = vmatpush.msrb.mxu0 %v1599_v54  ;;  %v4337_v54 = vld [vmem:[#allocation19 + $0x60] sm:$0xff] }
 0x5e3   :  { %1859 = vmatpush.msrb.mxu1 %v4186_v8  ;;  %1752 = vmatpush.msra.mxu2 %v4186_v8 }
 0x5e4   :  { %1792 = vmatpush.msra.mxu0 %v4204_v2  ;;  %2668 = vmatmul.msk.f32.vlgmr.msrb.gmra.mxu3 %vm440_vm9, %v4211_v20 }
 0x5e5   :  { %1860 = vmatpush.msrb.mxu1 %v4193_v35  ;;  %1753 = vmatpush.msra.mxu2 %v4193_v35 }
 0x5e6   :  { %v2776_v24 = vpop.eup %2775  ;;  %1793 = vmatpush.msra.mxu0 %v4218_v61  ;;  %2666 = vmatmul.msk.f32.vlgmr.msrb.gmra.mxu2 %vm440_vm9, %v4211_v20 }
 0x5e7   :  { %v2778_v58 = vpop.eup %2777  ;;  %v4155_v59 = vadd.f32 1.0, %v2776_v24  ;;  %v4198_v24 = vld [vmem:[#allocation19 + $0x138] sm:$0xff]  ;;  %2670 = vmatmul.msk.f32.vlgmr.msrb.gmra.mxu0 %vm440_vm9, %v4211_v20  ;;  %v4351_v20 = vld [vmem:[#allocation19 + $0x50] sm:$0xff] }
 0x5e8   :  { %v4157_v23 = vadd.f32 1.0, %v2778_v58  ;;  %1861 = vmatpush.msrb.mxu1 %v4198_v24  ;;  %1754 = vmatpush.msra.mxu2 %v4198_v24 }
 0x5e9   :  { %2779 = vrcp.f32 %v4155_v59  ;;  %v1480_v18 = vand.u32 2147483648, %v4155_v59  ;;  %v1478_v15 = vand.u32 2147483647, %v4155_v59  ;;  %vm1474_vm12 = vweird.f32 %v4155_v59  ;;  %1794 = vmatpush.msra.mxu0 %v4235_v34 }
 0x5ea   :  { %2781 = vrcp.f32 %v4157_v23  ;;  %v1495_v62 = vand.u32 2147483648, %v4157_v23  ;;  %vm1489_vm11 = vweird.f32 %v4157_v23  ;;  %v1493_v6 = vand.u32 2147483647, %v4157_v23 }
 0x5eb   :  { %v1481_v37 = vor.u32 1.1754944e-38, %v1480_v18  ;;  %vm1479_vm2 = vcmp.eq.f32.partialorder %v1478_v15, 8.507059e+37  ;;  %1795 = vmatpush.msra.mxu0 %v4246_v56  ;;  %v4294_v18 = vld [vmem:[#allocation19 + $0xa8] sm:$0xff]  ;;  %v4311_v15 = vld [vmem:[#allocation19 + $0xa0] sm:$0xff] }
 0x5ec   :  { %v1496_v38 = vor.u32 1.1754944e-38, %v1495_v62 }
 0x5ef   :  { %v2780_v42 = vpop.eup %2779 }
 0x5f0   :  { %v4175_v12 = vpop.eup %2781  ;;  %v1470_v46 = vmul.f32 %v2780_v42, %v4155_v59  ;;  %vm1475_vm1 = vweird.f32 %v2780_v42  ;;  %v4202_v59 = vld [vmem:[#allocation19 + $0x170] sm:$0xff] }
 0x5f1   :  { %v1485_v40 = vmul.f32 %v4175_v12, %v4157_v23  ;;  %vm1476_vm13 = vmor %vm1474_vm12, %vm1475_vm1  ;;  %vm1490_vm0 = vweird.f32 %v4175_v12  ;;  %1772 = vmatpush.msra.mxu3 %v4202_v59  ;;  %vm1494_vm1 = vcmp.eq.f32.partialorder %v1493_v6, 8.507059e+37  ;;  %vm4892_vm12 = vcmp.eq.s32.totalorder %v4891_v32, 9  ;;  %v4353_v6 = vld [vmem:[#allocation19 + $0x58] sm:$0xff] }
 0x5f2   :  { %v1471_v5 = vsub.f32 1.0, %v1470_v46  ;;  %vm4222_vm15 = vmor %vm1489_vm11, %vm1490_vm0 }
 0x5f3   :  { %v1486_v63 = vsub.f32 1.0, %v1485_v40  ;;  %1773 = vmatpush.msra.mxu3 %v4216_v1 }
 0x5f4   :  { %v1472_v22 = vmul.f32 %v2780_v42, %v1471_v5  ;;  %v4286_v5 = vld [vmem:[#allocation19 + $0xc8] sm:$0xff] }
 0x5f5   :  { %v1487_v3 = vmul.f32 %v4175_v12, %v1486_v63  ;;  %1774 = vmatpush.msra.mxu3 %v4233_v36  ;;  %v4296_v63 = vld [vmem:[#allocation19 + $0xb0] sm:$0xff] }
 0x5f6   :  { %v1473_v29 = vadd.f32 %v2780_v42, %v1472_v22  ;;  %v4307_v22 = vld [vmem:[#allocation19 + $0x98] sm:$0xff] }
 0x5f7   :  { %v1488_v58 = vadd.f32 %v4175_v12, %v1487_v3  ;;  %1775 = vmatpush.msra.mxu3 %v4244_v45  ;;  %v4321_v3 = vld [vmem:[#allocation19 + $0x88] sm:$0xff] }
 0x5f8   :  { %v1477_v0 = vsel %vm1476_vm13, %v2780_v42, %v1473_v29  ;;  %v4257_v42 = vld [vmem:[#allocation19 + $0x118] sm:$0xff]  ;;  %v1581_v29 = vsel %vm369_vm10, %v1579_v28, 0  ;;  %vm4893_vm13 = vcmp.eq.s32.totalorder %v4891_v32, 10 }
 0x5f9   :  { %v1482_v50 = vsel %vm1479_vm2, %v1481_v37, %v1477_v0  ;;  %v1492_v23 = vsel %vm4222_vm15, %v4175_v12, %v1488_v58  ;;  %v4266_v12 = vld [vmem:[#allocation19 + $0xf8] sm:$0xff]  ;;  %1776 = vmatpush.msra.mxu3 %v4255_v33  ;;  %1796 = vmatpush.msra.mxu0 %v4257_v42  ;;  %v1584_v37 = vsel %vm4892_vm12, %v1582_v30, %v1581_v29  ;;  %v4341_v58 = vld [vmem:[#allocation19 + $0x70] sm:$0xff] }
 0x5fa   :  { %v1502_v26 = vmul.f32 %v1500_v44, %v1482_v50  ;;  %v1497_v60 = vsel %vm1494_vm1, %v1496_v38, %v1492_v23  ;;  %v1587_v41 = vsel %vm4893_vm13, %v1585_v39, %v1584_v37  ;;  %v1588_v44 = vstv %s2663_s18  ;;  %v4339_v50 = vld [vmem:[#allocation19 + $0x68] sm:$0xff]  ;;  %v4368_v23 = vld [vmem:[#allocation19 + $0x20] sm:$0xff] }
 0x5fb   :  { %v1505_v57 = vsub.f32 1.0, %v1497_v60  ;;  %v1509_v31 = vmul.f32 %v1507_v48, %v1497_v60  ;;  %1777 = vmatpush.msra.mxu3 %v4266_v12  ;;  %1797 = vmatpush.msra.mxu0 %v4268_v13  ;;  %v1590_v0 = vsel %vm4894_vm14, %v1588_v44, %v1587_v41  ;;  %4898 = vst [vmem:[#allocation40_spill] sm:$0xff] %v4368_v23  ;;  %v4373_v38 = vld [vmem:[#allocation19 + $0x28] sm:$0xff]  ;;  %v4376_v60 = vld [vmem:[#allocation19] sm:$0xff] }
 0x5fc   :  { %v1503_v19 = vadd.f32 %v1502_v26, %v4885_v53  ;;  %v4241_v53 = vld [vmem:[#allocation19 + $0x120] sm:$0xff]  ;;  %vm1592_vm2 = vcmp.eq.s32.totalorder %v4887_v49, %v1590_v0  ;;  %v4349_v26 = vld [vmem:[#allocation19 + $0x48] sm:$0xff]  ;;  %v4357_v49 = vld [vmem:[#allocation19 + $0x30] sm:$0xff]  ;;  %4899 = vst [vmem:[#allocation39_spill] sm:$0xff] %v4373_v38 }
 0x5fd   :  { %1755 = vmatpush.msra.mxu2 %v4241_v53  ;;  %1862 = vmatpush.msrb.mxu1 %v4241_v53  ;;  %v2665_v62 = vsel %vm1592_vm2, 1.0, %v4888_v27  ;;  %4895 = vst [vmem:[#allocation38_spill] sm:$0xff] %v4357_v49  ;;  %v4363_v27 = vld [vmem:[#allocation19 + $0x40] sm:$0xff]  ;;  %v4378_v48 = vld [vmem:[#allocation19 + $0x8] sm:$0xff] }
 0x5fe   :  { %2783 = vtanh.f32 %v1503_v19  ;;  %1778 = vmatpush.msra.mxu3 %v4276_v55  ;;  %1798 = vmatpush.msra.mxu0 %v4278_v10  ;;  %v4366_v19 = vld [vmem:[#allocation19 + $0x18] sm:$0xff]  ;;  %4900 = vst [vmem:[#allocation44_spill] sm:$0xff] %v4376_v60  ;;  %v1744_v0 = vld [vmem:[#allocation20] sm:$0x7] }
 0x5ff   :  { %1756 = vmatpush.msra.mxu2 %v4252_v17  ;;  %1863 = vmatpush.msrb.mxu1 %v4252_v17  ;;  %4897 = vst [vmem:[#allocation43_spill] sm:$0xff] %v4366_v19 }
 0x600   :  { %1779 = vmatpush.msra.mxu3 %v4286_v5  ;;  %1799 = vmatpush.msra.mxu0 %v4288_v51  ;;  %4901 = vst [vmem:[#allocation42_spill] sm:$0xff] %v4378_v48 }
 0x601   :  { %1757 = vmatpush.msra.mxu2 %v4262_v43  ;;  %1864 = vmatpush.msrb.mxu1 %v4262_v43 }
 0x602   :  { %1780 = vmatpush.msra.mxu3 %v4296_v63  ;;  %1800 = vmatpush.msra.mxu0 %v4301_v9 }
 0x603   :  { %1758 = vmatpush.msra.mxu2 %v4273_v7  ;;  %1865 = vmatpush.msrb.mxu1 %v4273_v7 }
 0x604   :  { %v2784_v46 = vpop.eup %2783  ;;  %1781 = vmatpush.msra.mxu3 %v4307_v22  ;;  %1801 = vmatpush.msra.mxu0 %v4311_v15 }
 0x605   :  { %v1506_v40 = vmul.f32 %v2784_v46, %v1505_v57  ;;  %1759 = vmatpush.msra.mxu2 %v4283_v11  ;;  %1866 = vmatpush.msrb.mxu1 %v4283_v11  ;;  %v4383_v57 = vld [vmem:[#allocation19 + $0x10] sm:$0xff]  ;;  %v4903_v46 = vld [vmem:[#allocation53_spill] sm:$0xff] }
 0x606   :  { %1782 = vmatpush.msra.mxu3 %v4316_v16  ;;  %1802 = vmatpush.msra.mxu0 %v4321_v3  ;;  %4902 = vst [vmem:[#allocation41_spill] sm:$0xff] %v4383_v57 }
 0x607   :  { %v1510_v52 = vadd.f32 %v1509_v31, %v1506_v40  ;;  %1760 = vmatpush.msra.mxu2 %v4294_v18  ;;  %1867 = vmatpush.msrb.mxu1 %v4294_v18  ;;  %v4904_v40 = vld [vmem:[#allocation45_spill] sm:$0xff] }
 0x608   :  { %1783 = vmatpush.msra.mxu3 %v4339_v50  ;;  %1803 = vmatpush.msra.mxu0 %v4341_v58  ;;  %v302_v31 = vadd.f32 %v4904_v40, %v4903_v46  ;;  %v4521_v46 = vperm.slane %v1744_v0, 1 }
 0x609   :  { %v1528_v47 = vrot.slane %v1510_v52, 6  ;;  %1761 = vmatpush.msra.mxu2 %v4305_v14  ;;  %1868 = vmatpush.msrb.mxu1 %v4305_v14  ;;  %v2703_v52 = vld [vmem:[#allocation16] ss:$0 sm:$0xff] }
 0x60a   :  { %2667 = vmatmul.msk.f32.gmra.mxu2 %vm440_vm9, %v2665_v62  ;;  %2669 = vmatmul.msk.f32.gmra.mxu3 %vm440_vm9, %v2665_v62  ;;  %4910 = vst [vmem:[#allocation52_spill] sm:$0xff] %v4521_v46 }
 0x60b   :  { %1546 = vmatmul.f32.vlgmr.msra.gmra.mxu1 %v1528_v47  ;;  %1762 = vmatpush.msra.mxu2 %v4314_v21  ;;  %v308_v47 = vadd.f32 %v2703_v52, %v302_v31 }
 0x60c   :  { %1869 = vmatpush.msrb.mxu1 %v4314_v21  ;;  %2671 = vmatmul.msk.f32.gmra.mxu0 %vm440_vm9, %v2665_v62  ;;  %v4519_v62 = vperm.slane %v1744_v0, 0 }
 0x60d   :  { %1763 = vmatpush.msra.mxu2 %v4337_v54  ;;  %1784 = vmatpush.msra.mxu3 %v4351_v20 }
 0x60e   :  { %1804 = vmatpush.msra.mxu0 %v4353_v6  ;;  %1870 = vmatpush.msrb.mxu1 %v4337_v54  ;;  %4909 = vst [vmem:[#allocation48_spill] sm:$0xff] %v4519_v62 }
 0x60f   :  { %1764 = vmatpush.msra.mxu2 %v4349_v26  ;;  %1785 = vmatpush.msra.mxu3 %v4359_v4 }
 0x610   :  { %1805 = vmatpush.msra.mxu0 %v4363_v27  ;;  %1871 = vmatpush.msrb.mxu1 %v4349_v26 }
 0x611   :  { %1765 = vmatpush.msra.mxu2 %v4357_v49  ;;  %1786 = vmatpush.msra.mxu3 %v4368_v23 }
 0x612   :  { %1806 = vmatpush.msra.mxu0 %v4373_v38  ;;  %1872 = vmatpush.msrb.mxu1 %v4357_v49 }
 0x613   :  { %1766 = vmatpush.msra.mxu2 %v4366_v19  ;;  %1787 = vmatpush.msra.mxu3 %v4378_v48 }
 0x614   :  { %1807 = vmatpush.msra.mxu0 %v4383_v57  ;;  %1873 = vmatpush.msrb.mxu1 %v4366_v19 }
 0x615   :  { %1767 = vmatpush.msra.mxu2 %v4376_v60  ;;  %1899 = vmatpush.msrb.mxu3 %v4204_v2 }
 0x616   :  { %1981 = vmatpush.msrb.mxu0 %v4186_v8  ;;  %1874 = vmatpush.msrb.mxu1 %v4376_v60 }
 0x617   :  { %1879 = vmatpush.msrb.mxu2 %v4202_v59  ;;  %1900 = vmatpush.msrb.mxu3 %v4218_v61 }
 0x618   :  { %2001 = vmatpush.msra.mxu1 %v4202_v59  ;;  %1982 = vmatpush.msrb.mxu0 %v4193_v35 }
 0x619   :  { %1880 = vmatpush.msrb.mxu2 %v4216_v1  ;;  %1901 = vmatpush.msrb.mxu3 %v4235_v34 }
 0x61a   :  { %2002 = vmatpush.msra.mxu1 %v4216_v1  ;;  %1983 = vmatpush.msrb.mxu0 %v4198_v24 }
 0x61b   :  { %1881 = vmatpush.msrb.mxu2 %v4233_v36  ;;  %1902 = vmatpush.msrb.mxu3 %v4246_v56 }
 0x61c   :  { %2003 = vmatpush.msra.mxu1 %v4233_v36  ;;  %1984 = vmatpush.msrb.mxu0 %v4241_v53 }
 0x61d   :  { %1882 = vmatpush.msrb.mxu2 %v4244_v45  ;;  %1903 = vmatpush.msrb.mxu3 %v4257_v42 }
 0x61e   :  { %2004 = vmatpush.msra.mxu1 %v4244_v45  ;;  %1985 = vmatpush.msrb.mxu0 %v4252_v17 }
 0x61f   :  { %1883 = vmatpush.msrb.mxu2 %v4255_v33  ;;  %1904 = vmatpush.msrb.mxu3 %v4268_v13 }
 0x620   :  { %2005 = vmatpush.msra.mxu1 %v4255_v33  ;;  %1986 = vmatpush.msrb.mxu0 %v4262_v43 }
 0x621   :  { %1884 = vmatpush.msrb.mxu2 %v4266_v12  ;;  %1905 = vmatpush.msrb.mxu3 %v4278_v10 }
 0x622   :  { %2006 = vmatpush.msra.mxu1 %v4266_v12  ;;  %1987 = vmatpush.msrb.mxu0 %v4273_v7 }
 0x623   :  { %1885 = vmatpush.msrb.mxu2 %v4276_v55  ;;  %1906 = vmatpush.msrb.mxu3 %v4288_v51 }
 0x624   :  { %2007 = vmatpush.msra.mxu1 %v4276_v55  ;;  %1988 = vmatpush.msrb.mxu0 %v4283_v11 }
 0x625   :  { %1886 = vmatpush.msrb.mxu2 %v4286_v5  ;;  %1907 = vmatpush.msrb.mxu3 %v4301_v9 }
 0x626   :  { %2008 = vmatpush.msra.mxu1 %v4286_v5  ;;  %1989 = vmatpush.msrb.mxu0 %v4294_v18 }
 0x627   :  { %1887 = vmatpush.msrb.mxu2 %v4296_v63  ;;  %1908 = vmatpush.msrb.mxu3 %v4311_v15 }
 0x628   :  { %2009 = vmatpush.msra.mxu1 %v4296_v63  ;;  %1990 = vmatpush.msrb.mxu0 %v4305_v14 }
 0x629   :  { %1888 = vmatpush.msrb.mxu2 %v4307_v22  ;;  %1909 = vmatpush.msrb.mxu3 %v4321_v3 }
 0x62a   :  { %2010 = vmatpush.msra.mxu1 %v4307_v22  ;;  %1991 = vmatpush.msrb.mxu0 %v4314_v21 }
 0x62b   :  { %1889 = vmatpush.msrb.mxu2 %v4316_v16  ;;  %1910 = vmatpush.msrb.mxu3 %v4341_v58 }
 0x62c   :  { %2011 = vmatpush.msra.mxu1 %v4316_v16  ;;  %1992 = vmatpush.msrb.mxu0 %v4337_v54 }
 0x62d   :  { %1890 = vmatpush.msrb.mxu2 %v4339_v50  ;;  %1911 = vmatpush.msrb.mxu3 %v4353_v6 }
 0x62e   :  { %2012 = vmatpush.msra.mxu1 %v4339_v50  ;;  %1993 = vmatpush.msrb.mxu0 %v4349_v26 }
 0x62f   :  { %1891 = vmatpush.msrb.mxu2 %v4351_v20  ;;  %1912 = vmatpush.msrb.mxu3 %v4363_v27 }
 0x630   :  { %2013 = vmatpush.msra.mxu1 %v4351_v20  ;;  %1994 = vmatpush.msrb.mxu0 %v4357_v49 }
 0x631   :  { %1892 = vmatpush.msrb.mxu2 %v4359_v4  ;;  %1913 = vmatpush.msrb.mxu3 %v4373_v38 }
 0x632   :  { %2014 = vmatpush.msra.mxu1 %v4359_v4  ;;  %1995 = vmatpush.msrb.mxu0 %v4366_v19 }
 0x633   :  { %1893 = vmatpush.msrb.mxu2 %v4368_v23  ;;  %1914 = vmatpush.msrb.mxu3 %v4383_v57 }
 0x634   :  { %2015 = vmatpush.msra.mxu1 %v4368_v23  ;;  %1996 = vmatpush.msrb.mxu0 %v4376_v60 }
 0x635   :  { %1894 = vmatpush.msrb.mxu2 %v4378_v48 }
 0x636   :  { %2016 = vmatpush.msra.mxu1 %v4378_v48 }
 0x667   :  { %v4513_v39 = vpop.f32.mrf.mxu3 }
 0x668   :  { %4906 = vst [vmem:[#allocation51_spill] sm:$0xff] %v4513_v39 }
 0x669   :  { %v4511_v37 = vpop.f32.mrf.mxu2 }
 0x66a   :  { %4905 = vst [vmem:[#allocation50_spill] sm:$0xff] %v4511_v37 }
 0x688   :  { %v1547_v28 = vpop.f32.mrf.mxu1 }
 0x689   :  { %v1548_v29 = vadd.f32 %v1547_v28, %v308_v47 }
 0x68b   :  { %2785 = vtanh.f32 %v1548_v29 }
 0x68d   :  { %v4515_v41 = vpop.f32.mrf.mxu2  ;;  %v4517_v44 = vpop.f32.mrf.mxu3 }
 0x68e   :  { %4907 = vst [vmem:[#allocation49_spill] sm:$0xff] %v4515_v41  ;;  %v4527_v41 = vpop.f32.mrf.mxu0 }
 0x68f   :  { %4908 = vst [vmem:[#allocation46_spill] sm:$0xff] %v4517_v44 }
 0x691   :  { %v4449_v30 = vpop.eup %2785 }
 0x692   :  { %1768 = vmatmul.f32.vlgmr.msra.gmra.mxu2 %v4449_v30  ;;  %1788 = vmatmul.f32.vlgmr.msra.gmra.mxu3 %v4449_v30 }
 0x693   :  { %1808 = vmatmul.f32.vlgmr.msra.gmra.mxu0 %v4449_v30  ;;  %2021 = vmatpush.msra.mxu2 %v4204_v2 }
 0x694   :  { %2102 = vmatpush.msra.mxu3 %v4186_v8  ;;  %2122 = vmatpush.msra.mxu0 %v4202_v59 }
 0x695   :  { %2022 = vmatpush.msra.mxu2 %v4218_v61 }
 0x696   :  { %2103 = vmatpush.msra.mxu3 %v4193_v35  ;;  %2123 = vmatpush.msra.mxu0 %v4216_v1 }
 0x697   :  { %2023 = vmatpush.msra.mxu2 %v4235_v34 }
 0x698   :  { %2104 = vmatpush.msra.mxu3 %v4198_v24  ;;  %2124 = vmatpush.msra.mxu0 %v4233_v36 }
 0x699   :  { %2024 = vmatpush.msra.mxu2 %v4246_v56 }
 0x69a   :  { %2105 = vmatpush.msra.mxu3 %v4241_v53  ;;  %2125 = vmatpush.msra.mxu0 %v4244_v45 }
 0x69b   :  { %2025 = vmatpush.msra.mxu2 %v4257_v42 }
 0x69c   :  { %2106 = vmatpush.msra.mxu3 %v4252_v17  ;;  %2126 = vmatpush.msra.mxu0 %v4255_v33 }
 0x69d   :  { %2026 = vmatpush.msra.mxu2 %v4268_v13 }
 0x69e   :  { %2107 = vmatpush.msra.mxu3 %v4262_v43  ;;  %2127 = vmatpush.msra.mxu0 %v4266_v12 }
 0x69f   :  { %2027 = vmatpush.msra.mxu2 %v4278_v10 }
 0x6a0   :  { %2108 = vmatpush.msra.mxu3 %v4273_v7  ;;  %2128 = vmatpush.msra.mxu0 %v4276_v55 }
 0x6a1   :  { %2028 = vmatpush.msra.mxu2 %v4288_v51 }
 0x6a2   :  { %2109 = vmatpush.msra.mxu3 %v4283_v11  ;;  %2129 = vmatpush.msra.mxu0 %v4286_v5 }
 0x6a3   :  { %2029 = vmatpush.msra.mxu2 %v4301_v9 }
 0x6a4   :  { %2110 = vmatpush.msra.mxu3 %v4294_v18  ;;  %2130 = vmatpush.msra.mxu0 %v4296_v63 }
 0x6a5   :  { %2030 = vmatpush.msra.mxu2 %v4311_v15 }
 0x6a6   :  { %2111 = vmatpush.msra.mxu3 %v4305_v14  ;;  %2131 = vmatpush.msra.mxu0 %v4307_v22 }
 0x6a7   :  { %2031 = vmatpush.msra.mxu2 %v4321_v3 }
 0x6a8   :  { %2112 = vmatpush.msra.mxu3 %v4314_v21  ;;  %2132 = vmatpush.msra.mxu0 %v4316_v16 }
 0x6a9   :  { %2032 = vmatpush.msra.mxu2 %v4341_v58 }
 0x6aa   :  { %2113 = vmatpush.msra.mxu3 %v4337_v54  ;;  %2133 = vmatpush.msra.mxu0 %v4339_v50 }
 0x6ab   :  { %2033 = vmatpush.msra.mxu2 %v4353_v6 }
 0x6ac   :  { %2114 = vmatpush.msra.mxu3 %v4349_v26  ;;  %2134 = vmatpush.msra.mxu0 %v4351_v20 }
 0x6ad   :  { %2034 = vmatpush.msra.mxu2 %v4363_v27 }
 0x6ae   :  { %2115 = vmatpush.msra.mxu3 %v4357_v49  ;;  %2135 = vmatpush.msra.mxu0 %v4359_v4 }
 0x6af   :  { %2035 = vmatpush.msra.mxu2 %v4373_v38 }
 0x6b0   :  { %2116 = vmatpush.msra.mxu3 %v4366_v19  ;;  %2136 = vmatpush.msra.mxu0 %v4368_v23  ;;  %v4529_v23 = vpop.f32.mrf.mxu0 }
 0x6b1   :  { %2036 = vmatpush.msra.mxu2 %v4383_v57  ;;  %4911 = vst [vmem:[#allocation47_spill] sm:$0xff] %v4529_v23 }
 0x6b2   :  { %2117 = vmatpush.msra.mxu3 %v4376_v60  ;;  %2137 = vmatpush.msra.mxu0 %v4378_v48 }
 0x715   :  { %v1769_v40 = vpop.f32.mrf.mxu2  ;;  %v1789_v31 = vpop.f32.mrf.mxu3 }
 0x716   :  { %v1770_v52 = vadd.f32 %v1769_v40, %v4519_v62  ;;  %v1790_v47 = vadd.f32 %v1789_v31, %v4521_v46 }
 0x718   :  { %v1812_v28 = vadd.f32 %v1770_v52, %v4511_v37  ;;  %v1813_v29 = vadd.f32 %v1790_v47, %v4513_v39  ;;  %v1809_v39 = vpop.f32.mrf.mxu0 }
 0x71a   :  { %v2672_v32 = vmul.f32 -1.442695, %v1812_v28  ;;  %v2673_v25 = vmul.f32 -1.442695, %v1813_v29  ;;  %v4531_v29 = vperm.slane %v1744_v0, 2 }
 0x71c   :  { %2787 = vpow2.f32 %v2672_v32  ;;  %4912 = vst [vmem:[#allocation35_spill] sm:$0xff] %v4531_v29  ;;  %v1810_v23 = vadd.f32 %v1809_v39, %v4531_v29 }
 0x71d   :  { %2789 = vpow2.f32 %v2673_v25 }
 0x722   :  { %v2788_v44 = vpop.eup %2787 }
 0x723   :  { %v2790_v48 = vpop.eup %2789  ;;  %v1820_v60 = vadd.f32 1.0, %v2788_v44 }
 0x724   :  { %v1821_v57 = vadd.f32 1.0, %v2790_v48 }
 0x725   :  { %2791 = vrcp.f32 %v1820_v60  ;;  %v1833_v47 = vand.u32 2147483648, %v1820_v60  ;;  %v1831_v25 = vand.u32 2147483647, %v1820_v60  ;;  %vm1827_vm0 = vweird.f32 %v1820_v60 }
 0x726   :  { %2793 = vrcp.f32 %v1821_v57  ;;  %vm1842_vm12 = vweird.f32 %v1821_v57  ;;  %v1846_v0 = vand.u32 2147483647, %v1821_v57 }
 0x727   :  { %v1834_v48 = vor.u32 1.1754944e-38, %v1833_v47  ;;  %vm1832_vm15 = vcmp.eq.f32.partialorder %v1831_v25, 8.507059e+37 }
 0x728   :  { %vm1847_vm14 = vcmp.eq.f32.partialorder %v1846_v0, 8.507059e+37 }
 0x72b   :  { %v2792_v40 = vpop.eup %2791 }
 0x72c   :  { %v2794_v31 = vpop.eup %2793  ;;  %v1823_v46 = vmul.f32 %v2792_v40, %v1820_v60  ;;  %vm1828_vm9 = vweird.f32 %v2792_v40 }
 0x72d   :  { %v1838_v52 = vmul.f32 %v2794_v31, %v1821_v57  ;;  %vm1829_vm11 = vmor %vm1827_vm0, %vm1828_vm9  ;;  %vm1843_vm1 = vweird.f32 %v2794_v31 }
 0x72e   :  { %v1824_v37 = vsub.f32 1.0, %v1823_v46  ;;  %vm1844_vm13 = vmor %vm1842_vm12, %vm1843_vm1 }
 0x72f   :  { %v1839_v28 = vsub.f32 1.0, %v1838_v52  ;;  %v1848_v52 = vand.u32 2147483648, %v1821_v57  ;;  %v4917_v57 = vld [vmem:[#allocation40_spill] sm:$0xff] }
 0x730   :  { %v1825_v32 = vmul.f32 %v2792_v40, %v1824_v37 }
 0x731   :  { %v1840_v62 = vmul.f32 %v2794_v31, %v1839_v28  ;;  %v1849_v28 = vor.u32 1.1754944e-38, %v1848_v52  ;;  %v4922_v52 = vld [vmem:[#allocation50_spill] sm:$0xff] }
 0x732   :  { %v1826_v44 = vadd.f32 %v2792_v40, %v1825_v32 }
 0x733   :  { %v1841_v4 = vadd.f32 %v2794_v31, %v1840_v62  ;;  %v4919_v62 = vld [vmem:[#allocation44_spill] sm:$0xff] }
 0x734   :  { %v1830_v19 = vsel %vm1829_vm11, %v2792_v40, %v1826_v44  ;;  %v4921_v44 = vld [vmem:[#allocation48_spill] sm:$0xff] }
 0x735   :  { %v1835_v38 = vsel %vm1832_vm15, %v1834_v48, %v1830_v19  ;;  %v1845_v49 = vsel %vm1844_vm13, %v2794_v31, %v1841_v4  ;;  %v4914_v4 = vld [vmem:[#allocation37_spill] sm:$0xff]  ;;  %v4920_v31 = vld [vmem:[#allocation42_spill] sm:$0xff] }
 0x736   :  { %v1852_v46 = vmul.f32 %v1835_v38, %v1810_v23  ;;  %v1850_v60 = vsel %vm1847_vm14, %v1849_v28, %v1845_v49  ;;  %v4913_v49 = vld [vmem:[#allocation38_spill] sm:$0xff]  ;;  %v4915_v23 = vld [vmem:[#allocation39_spill] sm:$0xff] }
 0x737   :  { %v1855_v47 = vsub.f32 1.0, %v1850_v60  ;;  %v1857_v40 = vmul.f32 %v4449_v30, %v1850_v60  ;;  %v4916_v38 = vld [vmem:[#allocation43_spill] sm:$0xff]  ;;  %v4918_v30 = vld [vmem:[#allocation41_spill] sm:$0xff]  ;;  %v4923_v60 = vld [vmem:[#allocation52_spill] sm:$0xff] }
 0x738   :  { %v1853_v37 = vadd.f32 %v1852_v46, %v4527_v41 }
 0x73a   :  { %2795 = vtanh.f32 %v1853_v37 }
 0x740   :  { %v2796_v32 = vpop.eup %2795 }
 0x741   :  { %v1856_v39 = vmul.f32 %v2796_v32, %v1855_v47 }
 0x743   :  { %v4536_v19 = vadd.f32 %v1857_v40, %v1856_v39  ;;  %v4924_v39 = vld [vmem:[#allocation51_spill] sm:$0xff] }
 0x745   :  { %1875 = vmatmul.f32.vlgmr.msrb.gmra.mxu1 %v4536_v19  ;;  %1895 = vmatmul.f32.vlgmr.msrb.gmra.mxu2 %v4536_v19 }
 0x746   :  { %1915 = vmatmul.f32.vlgmr.msrb.gmra.mxu3 %v4536_v19  ;;  %2142 = vmatpush.msrb.mxu1 %v4204_v2 }
 0x747   :  { %2223 = vmatpush.msrb.mxu2 %v4186_v8  ;;  %2243 = vmatpush.msrb.mxu3 %v4202_v59 }
 0x748   :  { %2143 = vmatpush.msrb.mxu1 %v4218_v61 }
 0x749   :  { %2224 = vmatpush.msrb.mxu2 %v4193_v35  ;;  %2244 = vmatpush.msrb.mxu3 %v4216_v1 }
 0x74a   :  { %2144 = vmatpush.msrb.mxu1 %v4235_v34 }
 0x74b   :  { %2225 = vmatpush.msrb.mxu2 %v4198_v24  ;;  %2245 = vmatpush.msrb.mxu3 %v4233_v36 }
 0x74c   :  { %2145 = vmatpush.msrb.mxu1 %v4246_v56 }
 0x74d   :  { %2226 = vmatpush.msrb.mxu2 %v4241_v53  ;;  %2246 = vmatpush.msrb.mxu3 %v4244_v45 }
 0x74e   :  { %2146 = vmatpush.msrb.mxu1 %v4257_v42 }
 0x74f   :  { %2227 = vmatpush.msrb.mxu2 %v4252_v17  ;;  %2247 = vmatpush.msrb.mxu3 %v4255_v33 }
 0x750   :  { %2147 = vmatpush.msrb.mxu1 %v4268_v13 }
 0x751   :  { %2228 = vmatpush.msrb.mxu2 %v4262_v43  ;;  %2248 = vmatpush.msrb.mxu3 %v4266_v12 }
 0x752   :  { %2148 = vmatpush.msrb.mxu1 %v4278_v10 }
 0x753   :  { %2229 = vmatpush.msrb.mxu2 %v4273_v7  ;;  %2249 = vmatpush.msrb.mxu3 %v4276_v55 }
 0x754   :  { %2149 = vmatpush.msrb.mxu1 %v4288_v51 }
 0x755   :  { %2230 = vmatpush.msrb.mxu2 %v4283_v11  ;;  %2250 = vmatpush.msrb.mxu3 %v4286_v5 }
 0x756   :  { %2150 = vmatpush.msrb.mxu1 %v4301_v9 }
 0x757   :  { %2231 = vmatpush.msrb.mxu2 %v4294_v18  ;;  %2251 = vmatpush.msrb.mxu3 %v4296_v63 }
 0x758   :  { %2151 = vmatpush.msrb.mxu1 %v4311_v15 }
 0x759   :  { %2232 = vmatpush.msrb.mxu2 %v4305_v14  ;;  %2252 = vmatpush.msrb.mxu3 %v4307_v22 }
 0x75a   :  { %2152 = vmatpush.msrb.mxu1 %v4321_v3 }
 0x75b   :  { %2233 = vmatpush.msrb.mxu2 %v4314_v21  ;;  %2253 = vmatpush.msrb.mxu3 %v4316_v16 }
 0x75c   :  { %2153 = vmatpush.msrb.mxu1 %v4341_v58 }
 0x75d   :  { %2234 = vmatpush.msrb.mxu2 %v4337_v54  ;;  %2254 = vmatpush.msrb.mxu3 %v4339_v50 }
 0x75e   :  { %2154 = vmatpush.msrb.mxu1 %v4353_v6 }
 0x75f   :  { %2235 = vmatpush.msrb.mxu2 %v4349_v26  ;;  %2255 = vmatpush.msrb.mxu3 %v4351_v20 }
 0x760   :  { %2155 = vmatpush.msrb.mxu1 %v4363_v27 }
 0x761   :  { %2236 = vmatpush.msrb.mxu2 %v4913_v49  ;;  %2256 = vmatpush.msrb.mxu3 %v4914_v4 }
 0x762   :  { %2156 = vmatpush.msrb.mxu1 %v4915_v23 }
 0x763   :  { %2237 = vmatpush.msrb.mxu2 %v4916_v38  ;;  %2257 = vmatpush.msrb.mxu3 %v4917_v57 }
 0x764   :  { %2157 = vmatpush.msrb.mxu1 %v4918_v30 }
 0x765   :  { %2238 = vmatpush.msrb.mxu2 %v4919_v62  ;;  %2258 = vmatpush.msrb.mxu3 %v4920_v31 }
 0x7c2   :  { %v1876_v25 = vpop.f32.mrf.mxu1 }
 0x7c3   :  { %v1877_v48 = vadd.f32 %v1876_v25, %v4921_v44 }
 0x7c5   :  { %v1921_v46 = vrot.slane %v1877_v48, 6 }
 0x7c7   :  { %v1925_v0 = vadd.f32 %v1921_v46, %v4922_v52 }
 0x7c8   :  { %v1896_v37 = vpop.f32.mrf.mxu2 }
 0x7c9   :  { %v2674_v28 = vmul.f32 -1.442695, %v1925_v0  ;;  %v1897_v47 = vadd.f32 %v1896_v37, %v4923_v60  ;;  %v1916_v48 = vpop.f32.mrf.mxu3 }
 0x7ca   :  { %v1917_v0 = vadd.f32 %v1916_v48, %v4531_v29 }
 0x7cb   :  { %2797 = vpow2.f32 %v2674_v28  ;;  %v1922_v32 = vrot.slane %v1897_v47, 6 }
 0x7cd   :  { %v1926_v40 = vadd.f32 %v1922_v32, %v4924_v39 }
 0x7cf   :  { %v2675_v57 = vmul.f32 -1.442695, %v1926_v40 }
 0x7d1   :  { %v2798_v30 = vpop.eup %2797  ;;  %2799 = vpow2.f32 %v2675_v57 }
 0x7d2   :  { %v1933_v62 = vadd.f32 1.0, %v2798_v30 }
 0x7d4   :  { %2801 = vrcp.f32 %v1933_v62  ;;  %v1946_v52 = vand.u32 2147483648, %v1933_v62  ;;  %v1944_v28 = vand.u32 2147483647, %v1933_v62  ;;  %vm1940_vm9 = vweird.f32 %v1933_v62 }
 0x7d6   :  { %v1947_v57 = vor.u32 1.1754944e-38, %v1946_v52  ;;  %vm1945_vm11 = vcmp.eq.f32.partialorder %v1944_v28, 8.507059e+37 }
 0x7d7   :  { %v2800_v31 = vpop.eup %2799 }
 0x7d8   :  { %v1934_v38 = vadd.f32 1.0, %v2800_v31  ;;  %v1966_v31 = vrot.slane %v1917_v0, 6 }
 0x7da   :  { %v2802_v23 = vpop.eup %2801  ;;  %2803 = vrcp.f32 %v1934_v38  ;;  %v1959_v49 = vand.u32 2147483647, %v1934_v38  ;;  %vm1955_vm1 = vweird.f32 %v1934_v38 }
 0x7db   :  { %v1936_v25 = vmul.f32 %v2802_v23, %v1933_v62  ;;  %vm1941_vm2 = vweird.f32 %v2802_v23 }
 0x7dc   :  { %vm1942_vm0 = vmor %vm1940_vm9, %vm1941_vm2  ;;  %vm1960_vm13 = vcmp.eq.f32.partialorder %v1959_v49, 8.507059e+37 }
 0x7dd   :  { %v1937_v46 = vsub.f32 1.0, %v1936_v25  ;;  %v1961_v25 = vand.u32 2147483648, %v1934_v38 }
 0x7df   :  { %v1938_v37 = vmul.f32 %v2802_v23, %v1937_v46  ;;  %v1962_v29 = vor.u32 1.1754944e-38, %v1961_v25 }
 0x7e0   :  { %v2804_v47 = vpop.eup %2803 }
 0x7e1   :  { %v1951_v32 = vmul.f32 %v2804_v47, %v1934_v38  ;;  %v1939_v40 = vadd.f32 %v2802_v23, %v1938_v37  ;;  %vm1956_vm15 = vweird.f32 %v2804_v47 }
 0x7e2   :  { %vm1957_vm12 = vmor %vm1955_vm1, %vm1956_vm15 }
 0x7e3   :  { %v1952_v30 = vsub.f32 1.0, %v1951_v32  ;;  %v1943_v39 = vsel %vm1942_vm0, %v2802_v23, %v1939_v40  ;;  %v1974_v23 = vrot.slane %v4536_v19, 6  ;;  %v2453_v32 = vperm.slane %v4536_v19, 0  ;;  %v4940_v40 = vld [vmem:[#allocation35_spill] sm:$0xff] }
 0x7e4   :  { %v1948_v60 = vsel %vm1945_vm11, %v1947_v57, %v1943_v39 }
 0x7e5   :  { %v1953_v44 = vmul.f32 %v2804_v47, %v1952_v30  ;;  %v1968_v4 = vmul.f32 %v1966_v31, %v1948_v60 }
 0x7e7   :  { %v1954_v48 = vadd.f32 %v2804_v47, %v1953_v44  ;;  %v1969_v46 = vadd.f32 %v1968_v4, %v4527_v41  ;;  %v4925_v44 = vld [vmem:[#allocation34_spill] sm:$0xff] }
 0x7e8   :  { %vm4926_vm14 = vcmp.eq.s32.totalorder %v4925_v44, 0  ;;  %vm4927_vm2 = vcmp.eq.s32.totalorder %v4925_v44, 1 }
 0x7e9   :  { %v1958_v37 = vsel %vm1957_vm12, %v2804_v47, %v1954_v48  ;;  %2805 = vtanh.f32 %v1969_v46  ;;  %v2454_v47 = vsel %vm4926_vm14, %v2453_v32, 0.0 }
 0x7ea   :  { %v1963_v62 = vsel %vm1960_vm13, %v1962_v29, %v1958_v37 }
 0x7eb   :  { %v1971_v52 = vsub.f32 1.0, %v1963_v62  ;;  %v1976_v28 = vmul.f32 %v1974_v23, %v1963_v62 }
 0x7ef   :  { %v2806_v0 = vpop.eup %2805 }
 0x7f0   :  { %v1972_v39 = vmul.f32 %v2806_v0, %v1971_v52 }
 0x7f2   :  { %v4597_v60 = vadd.f32 %v1976_v28, %v1972_v39 }
 0x7f4   :  { %v1979_v38 = vrot.slane %v4597_v60, 2  ;;  %v2460_v4 = vperm.slane %v4597_v60, 2 }
 0x7f6   :  { %1997 = vmatmul.f32.vlgmr.msrb.gmra.mxu0 %v1979_v38  ;;  %2017 = vmatmul.f32.vlgmr.msra.gmra.mxu1 %v1979_v38  ;;  %v4605_v29 = vsel %vm4927_vm2, %v2460_v4, %v2454_v47 }
 0x7f7   :  { %2037 = vmatmul.f32.vlgmr.msra.gmra.mxu2 %v1979_v38  ;;  %2263 = vmatpush.msrb.mxu0 %v4204_v2  ;;  %v4932_v2 = vld [vmem:[#allocation40_spill] sm:$0xff] }
 0x7f8   :  { %2330 = vmatpush.msra.mxu1 %v4186_v8  ;;  %2350 = vmatpush.msra.mxu2 %v4202_v59  ;;  %v4928_v8 = vld [vmem:[#allocation38_spill] sm:$0xff]  ;;  %v4931_v59 = vld [vmem:[#allocation43_spill] sm:$0xff] }
 0x7f9   :  { %2264 = vmatpush.msrb.mxu0 %v4218_v61  ;;  %v4934_v61 = vld [vmem:[#allocation44_spill] sm:$0xff] }
 0x7fa   :  { %2331 = vmatpush.msra.mxu1 %v4193_v35  ;;  %2351 = vmatpush.msra.mxu2 %v4216_v1  ;;  %v4929_v35 = vld [vmem:[#allocation37_spill] sm:$0xff] }
 0x7fb   :  { %2265 = vmatpush.msrb.mxu0 %v4235_v34  ;;  %v4933_v1 = vld [vmem:[#allocation41_spill] sm:$0xff] }
 0x7fc   :  { %2332 = vmatpush.msra.mxu1 %v4198_v24  ;;  %2352 = vmatpush.msra.mxu2 %v4233_v36  ;;  %v4930_v24 = vld [vmem:[#allocation39_spill] sm:$0xff]  ;;  %v4935_v36 = vld [vmem:[#allocation42_spill] sm:$0xff] }
 0x7fd   :  { %2266 = vmatpush.msrb.mxu0 %v4246_v56 }
 0x7fe   :  { %2333 = vmatpush.msra.mxu1 %v4241_v53  ;;  %2353 = vmatpush.msra.mxu2 %v4244_v45  ;;  %v4936_v45 = vld [vmem:[#allocation48_spill] sm:$0xff] }
 0x7ff   :  { %2267 = vmatpush.msrb.mxu0 %v4257_v42 }
 0x800   :  { %2334 = vmatpush.msra.mxu1 %v4252_v17  ;;  %2354 = vmatpush.msra.mxu2 %v4255_v33  ;;  %v4937_v17 = vld [vmem:[#allocation52_spill] sm:$0xff] }
 0x801   :  { %2268 = vmatpush.msrb.mxu0 %v4268_v13 }
 0x802   :  { %2335 = vmatpush.msra.mxu1 %v4262_v43  ;;  %2355 = vmatpush.msra.mxu2 %v4266_v12  ;;  %v4938_v12 = vld [vmem:[#allocation50_spill] sm:$0xff] }
 0x803   :  { %2269 = vmatpush.msrb.mxu0 %v4278_v10 }
 0x804   :  { %2336 = vmatpush.msra.mxu1 %v4273_v7  ;;  %2356 = vmatpush.msra.mxu2 %v4276_v55  ;;  %v4939_v7 = vld [vmem:[#allocation51_spill] sm:$0xff] }
 0x805   :  { %2270 = vmatpush.msrb.mxu0 %v4288_v51 }
 0x806   :  { %2337 = vmatpush.msra.mxu1 %v4283_v11  ;;  %2357 = vmatpush.msra.mxu2 %v4286_v5 }
 0x807   :  { %2271 = vmatpush.msrb.mxu0 %v4301_v9 }
 0x808   :  { %2338 = vmatpush.msra.mxu1 %v4294_v18  ;;  %2358 = vmatpush.msra.mxu2 %v4296_v63 }
 0x809   :  { %2272 = vmatpush.msrb.mxu0 %v4311_v15 }
 0x80a   :  { %2339 = vmatpush.msra.mxu1 %v4305_v14  ;;  %2359 = vmatpush.msra.mxu2 %v4307_v22 }
 0x80b   :  { %2273 = vmatpush.msrb.mxu0 %v4321_v3 }
 0x80c   :  { %2340 = vmatpush.msra.mxu1 %v4314_v21  ;;  %2360 = vmatpush.msra.mxu2 %v4316_v16 }
 0x80d   :  { %2274 = vmatpush.msrb.mxu0 %v4341_v58 }
 0x80e   :  { %2341 = vmatpush.msra.mxu1 %v4337_v54  ;;  %2361 = vmatpush.msra.mxu2 %v4339_v50 }
 0x80f   :  { %2275 = vmatpush.msrb.mxu0 %v4353_v6 }
 0x810   :  { %2342 = vmatpush.msra.mxu1 %v4349_v26  ;;  %2362 = vmatpush.msra.mxu2 %v4351_v20 }
 0x811   :  { %2276 = vmatpush.msrb.mxu0 %v4363_v27 }
 0x812   :  { %2343 = vmatpush.msra.mxu1 %v4928_v8  ;;  %2363 = vmatpush.msra.mxu2 %v4929_v35  ;;  %v2095_v35 = vrot.slane %v4597_v60, 6 }
 0x813   :  { %2277 = vmatpush.msrb.mxu0 %v4930_v24 }
 0x814   :  { %2344 = vmatpush.msra.mxu1 %v4931_v59  ;;  %2364 = vmatpush.msra.mxu2 %v4932_v2 }
 0x815   :  { %2278 = vmatpush.msrb.mxu0 %v4933_v1 }
 0x816   :  { %2345 = vmatpush.msra.mxu1 %v4934_v61  ;;  %2365 = vmatpush.msra.mxu2 %v4935_v36 }
 0x873   :  { %v1998_v34 = vpop.f32.mrf.mxu0  ;;  %v2018_v53 = vpop.f32.mrf.mxu1 }
 0x874   :  { %v1999_v56 = vadd.f32 %v1998_v34, %v4936_v45  ;;  %v2019_v33 = vadd.f32 %v2018_v53, %v4937_v17 }
 0x876   :  { %v2043_v42 = vrot.slane %v1999_v56, 4  ;;  %v2044_v43 = vrot.slane %v2019_v33, 4  ;;  %v2903_v33 = vld [vmem:[#allocation19 + $0x178] sm:$0xff] }
 0x878   :  { %v2047_v13 = vadd.f32 %v2043_v42, %v4938_v12  ;;  %v2048_v55 = vadd.f32 %v2044_v43, %v4939_v7  ;;  %v2904_v42 = vld [vmem:[#allocation19 + $0x160] sm:$0xff]  ;;  %v2905_v43 = vld [vmem:[#allocation19 + $0x148] sm:$0xff] }
 0x87a   :  { %v2676_v10 = vmul.f32 -1.442695, %v2047_v13  ;;  %v2677_v11 = vmul.f32 -1.442695, %v2048_v55  ;;  %v2038_v50 = vpop.f32.mrf.mxu2  ;;  %v2906_v13 = vld [vmem:[#allocation19 + $0x130] sm:$0xff]  ;;  %v2907_v55 = vld [vmem:[#allocation19 + $0x118] sm:$0xff] }
 0x87b   :  { %v2039_v57 = vadd.f32 %v2038_v50, %v4940_v40 }
 0x87c   :  { %2807 = vpow2.f32 %v2676_v10  ;;  %v2908_v10 = vld [vmem:[#allocation19 + $0x100] sm:$0xff] }
 0x87d   :  { %2809 = vpow2.f32 %v2677_v11  ;;  %v2088_v62 = vrot.slane %v2039_v57, 4  ;;  %v2909_v11 = vld [vmem:[#allocation19 + $0xe8] sm:$0xff] }
 0x882   :  { %v2808_v5 = vpop.eup %2807 }
 0x883   :  { %v2810_v18 = vpop.eup %2809  ;;  %v2055_v63 = vadd.f32 1.0, %v2808_v5 }
 0x884   :  { %v2056_v14 = vadd.f32 1.0, %v2810_v18 }
 0x885   :  { %2811 = vrcp.f32 %v2055_v63  ;;  %v2068_v49 = vand.u32 2147483648, %v2055_v63  ;;  %v2066_v31 = vand.u32 2147483647, %v2055_v63  ;;  %vm2062_vm0 = vweird.f32 %v2055_v63 }
 0x886   :  { %2813 = vrcp.f32 %v2056_v14  ;;  %v2083_v0 = vand.u32 2147483648, %v2056_v14  ;;  %vm2077_vm12 = vweird.f32 %v2056_v14  ;;  %v2081_v28 = vand.u32 2147483647, %v2056_v14 }
 0x887   :  { %v2069_v46 = vor.u32 1.1754944e-38, %v2068_v49  ;;  %vm2067_vm15 = vcmp.eq.f32.partialorder %v2066_v31, 8.507059e+37 }
 0x888   :  { %v2084_v4 = vor.u32 1.1754944e-38, %v2083_v0  ;;  %vm2082_vm14 = vcmp.eq.f32.partialorder %v2081_v28, 8.507059e+37 }
 0x88b   :  { %v2812_v22 = vpop.eup %2811 }
 0x88c   :  { %v2814_v21 = vpop.eup %2813  ;;  %v2058_v16 = vmul.f32 %v2812_v22, %v2055_v63  ;;  %vm2063_vm9 = vweird.f32 %v2812_v22 }
 0x88d   :  { %v2073_v54 = vmul.f32 %v2814_v21, %v2056_v14  ;;  %vm2064_vm11 = vmor %vm2062_vm0, %vm2063_vm9  ;;  %vm2078_vm1 = vweird.f32 %v2814_v21 }
 0x88e   :  { %v2059_v26 = vsub.f32 1.0, %v2058_v16  ;;  %vm2079_vm13 = vmor %vm2077_vm12, %vm2078_vm1 }
 0x88f   :  { %v2074_v20 = vsub.f32 1.0, %v2073_v54 }
 0x890   :  { %v2060_v30 = vmul.f32 %v2812_v22, %v2059_v26 }
 0x891   :  { %v2075_v25 = vmul.f32 %v2814_v21, %v2074_v20 }
 0x892   :  { %v2061_v48 = vadd.f32 %v2812_v22, %v2060_v30 }
 0x893   :  { %v2076_v23 = vadd.f32 %v2814_v21, %v2075_v25 }
 0x894   :  { %v2065_v37 = vsel %vm2064_vm11, %v2812_v22, %v2061_v48 }
 0x895   :  { %v2070_v52 = vsel %vm2067_vm15, %v2069_v46, %v2065_v37  ;;  %v2080_v38 = vsel %vm2079_vm13, %v2814_v21, %v2076_v23 }
 0x896   :  { %v2090_v39 = vmul.f32 %v2088_v62, %v2070_v52  ;;  %v2085_v47 = vsel %vm2082_vm14, %v2084_v4, %v2080_v38 }
 0x897   :  { %v2093_v8 = vsub.f32 1.0, %v2085_v47  ;;  %v2097_v61 = vmul.f32 %v2095_v35, %v2085_v47 }
 0x898   :  { %v2091_v32 = vadd.f32 %v2090_v39, %v4527_v41 }
 0x89a   :  { %2815 = vtanh.f32 %v2091_v32 }
 0x8a0   :  { %v2816_v59 = vpop.eup %2815 }
 0x8a1   :  { %v2094_v2 = vmul.f32 %v2816_v59, %v2093_v8 }
 0x8a3   :  { %v4662_v36 = vadd.f32 %v2097_v61, %v2094_v2 }
 0x8a5   :  { %v2100_v34 = vrot.slane %v4662_v36, 4  ;;  %v2467_v53 = vperm.slane %v4662_v36, 4  ;;  %v2216_v47 = vrot.slane %v4662_v36, 6  ;;  %v2509_v2 = vperm.slane %v4662_v36, 5 }
 0x8a7   :  { %2118 = vmatmul.f32.vlgmr.msra.gmra.mxu3 %v2100_v34  ;;  %2138 = vmatmul.f32.vlgmr.msra.gmra.mxu0 %v2100_v34  ;;  %v4669_v56 = vsel %vm338_vm3, %v2467_v53, %v4605_v29 }
 0x8a8   :  { %2158 = vmatmul.f32.vlgmr.msrb.gmra.mxu1 %v2100_v34  ;;  %2370 = vmatpush.msra.mxu3 %v2903_v33 }
 0x8aa   :  { %2371 = vmatpush.msra.mxu3 %v2904_v42  ;;  %v4941_v42 = vld [vmem:[#allocation36_spill] sm:$0xff] }
 0x8ab   :  { %vm4942_vm13 = vcmp.eq.s32.totalorder %v4941_v42, 9 }
 0x8ac   :  { %2372 = vmatpush.msra.mxu3 %v2905_v43 }
 0x8ae   :  { %2373 = vmatpush.msra.mxu3 %v2906_v13 }
 0x8b0   :  { %2374 = vmatpush.msra.mxu3 %v2907_v55 }
 0x8b2   :  { %2375 = vmatpush.msra.mxu3 %v2908_v10 }
 0x8b4   :  { %2376 = vmatpush.msra.mxu3 %v2909_v11 }
 0x8b6   :  { %2377 = vmatpush.msra.mxu3 %v4288_v51 }
 0x8b8   :  { %2378 = vmatpush.msra.mxu3 %v4301_v9 }
 0x8ba   :  { %2379 = vmatpush.msra.mxu3 %v4311_v15 }
 0x8bc   :  { %2380 = vmatpush.msra.mxu3 %v4321_v3 }
 0x8be   :  { %2381 = vmatpush.msra.mxu3 %v4341_v58 }
 0x8c0   :  { %2382 = vmatpush.msra.mxu3 %v4353_v6 }
 0x8c2   :  { %2383 = vmatpush.msra.mxu3 %v4363_v27 }
 0x8c4   :  { %2384 = vmatpush.msra.mxu3 %v4930_v24 }
 0x8c6   :  { %2385 = vmatpush.msra.mxu3 %v4933_v1 }
 0x924   :  { %v2139_v29 = vpop.f32.mrf.mxu0 }
 0x925   :  { %v2140_v5 = vadd.f32 %v2139_v29, %v4937_v17  ;;  %v2159_v50 = vpop.f32.mrf.mxu1  ;;  %v4943_v29 = vld [vmem:[#allocation49_spill] sm:$0xff] }
 0x926   :  { %v2160_v49 = vadd.f32 %v2159_v50, %v4940_v40 }
 0x927   :  { %v2165_v51 = vrot.slane %v2140_v5, 2 }
 0x928   :  { %v2209_v48 = vrot.slane %v2160_v49, 2 }
 0x929   :  { %v2169_v9 = vadd.f32 %v2165_v51, %v4939_v7  ;;  %v4944_v51 = vld [vmem:[#allocation46_spill] sm:$0xff] }
 0x92a   :  { %v2119_v18 = vpop.f32.mrf.mxu3 }
 0x92b   :  { %v2679_v15 = vmul.f32 -1.442695, %v2169_v9  ;;  %v2120_v3 = vadd.f32 %v2119_v18, %v4936_v45 }
 0x92d   :  { %2817 = vpow2.f32 %v2679_v15  ;;  %v2164_v58 = vrot.slane %v2120_v3, 2 }
 0x92f   :  { %v2168_v6 = vadd.f32 %v2164_v58, %v4938_v12 }
 0x931   :  { %v2678_v63 = vmul.f32 -1.442695, %v2168_v6 }
 0x933   :  { %v2818_v27 = vpop.eup %2817  ;;  %2819 = vpow2.f32 %v2678_v63 }
 0x934   :  { %v2177_v24 = vadd.f32 1.0, %v2818_v27 }
 0x936   :  { %2821 = vrcp.f32 %v2177_v24  ;;  %v2204_v52 = vand.u32 2147483648, %v2177_v24  ;;  %vm2198_vm15 = vweird.f32 %v2177_v24  ;;  %v2202_v0 = vand.u32 2147483647, %v2177_v24 }
 0x938   :  { %v2205_v32 = vor.u32 1.1754944e-38, %v2204_v52  ;;  %vm2203_vm12 = vcmp.eq.f32.partialorder %v2202_v0, 8.507059e+37 }
 0x939   :  { %v2820_v1 = vpop.eup %2819 }
 0x93a   :  { %v2176_v14 = vadd.f32 1.0, %v2820_v1 }
 0x93c   :  { %2823 = vrcp.f32 %v2176_v14  ;;  %v2822_v22 = vpop.eup %2821  ;;  %v2189_v20 = vand.u32 2147483648, %v2176_v14  ;;  %v2187_v12 = vand.u32 2147483647, %v2176_v14  ;;  %vm2183_vm2 = vweird.f32 %v2176_v14 }
 0x93d   :  { %v2194_v21 = vmul.f32 %v2822_v22, %v2177_v24  ;;  %vm2199_vm11 = vweird.f32 %v2822_v22 }
 0x93e   :  { %v2190_v25 = vor.u32 1.1754944e-38, %v2189_v20  ;;  %vm2188_vm0 = vcmp.eq.f32.partialorder %v2187_v12, 8.507059e+37  ;;  %vm2200_vm1 = vmor %vm2198_vm15, %vm2199_vm11  ;;  %vm4946_vm15 = vcmp.eq.s32.totalorder %v4941_v42, 10 }
 0x93f   :  { %v2195_v54 = vsub.f32 1.0, %v2194_v21 }
 0x941   :  { %v2196_v30 = vmul.f32 %v2822_v22, %v2195_v54 }
 0x942   :  { %v2824_v16 = vpop.eup %2823 }
 0x943   :  { %v2179_v7 = vmul.f32 %v2824_v16, %v2176_v14  ;;  %vm2184_vm3 = vweird.f32 %v2824_v16  ;;  %v2197_v62 = vadd.f32 %v2822_v22, %v2196_v30 }
 0x944   :  { %vm2185_vm9 = vmor %vm2183_vm2, %vm2184_vm3 }
 0x945   :  { %v2180_v26 = vsub.f32 1.0, %v2179_v7  ;;  %v2201_v28 = vsel %vm2200_vm1, %v2822_v22, %v2197_v62 }
 0x946   :  { %v2206_v38 = vsel %vm2203_vm12, %v2205_v32, %v2201_v28 }
 0x947   :  { %v2181_v57 = vmul.f32 %v2824_v16, %v2180_v26  ;;  %v2214_v4 = vsub.f32 1.0, %v2206_v38  ;;  %v2218_v59 = vmul.f32 %v2216_v47, %v2206_v38 }
 0x949   :  { %v2182_v31 = vadd.f32 %v2824_v16, %v2181_v57 }
 0x94b   :  { %v2186_v46 = vsel %vm2185_vm9, %v2824_v16, %v2182_v31 }
 0x94c   :  { %v2191_v37 = vsel %vm2188_vm0, %v2190_v25, %v2186_v46  ;;  %v4945_v46 = vld [vmem:[#allocation47_spill] sm:$0xff] }
 0x94d   :  { %v2211_v23 = vmul.f32 %v2209_v48, %v2191_v37 }
 0x94f   :  { %v2212_v39 = vadd.f32 %v2211_v23, %v4527_v41  ;;  %v2511_v41 = vsel %vm369_vm10, %v2509_v2, 0.0  ;;  %v2547_v2 = vld [vmem:[#allocation22 + $0x70] sm:$0xff] }
 0x951   :  { %2825 = vtanh.f32 %v2212_v39 }
 0x957   :  { %v2826_v8 = vpop.eup %2825 }
 0x958   :  { %v2215_v35 = vmul.f32 %v2826_v8, %v2214_v4 }
 0x95a   :  { %v2219_v61 = vadd.f32 %v2218_v59, %v2215_v35  ;;  %v2548_v59 = vld [vmem:[#allocation22 + $0x78] sm:$0xff] }
 0x95b   :  { %2553 = vmatpush.msra.mxu0 %v2548_v59 }
 0x95c   :  { %v2221_v34 = vrot.slane %v2219_v61, 6  ;;  %v2474_v53 = vperm.slane %v2219_v61, 6  ;;  %v2516_v33 = vperm.slane %v2219_v61, 7  ;;  %v2546_v61 = vld [vmem:[#allocation22 + $0x68] sm:$0xff] }
 0x95d   :  { %2554 = vmatpush.msra.mxu0 %v2547_v2 }
 0x95e   :  { %2239 = vmatmul.f32.vlgmr.msrb.gmra.mxu2 %v2221_v34  ;;  %2259 = vmatmul.f32.vlgmr.msrb.gmra.mxu3 %v2221_v34  ;;  %v4693_v43 = vsel %vm343_vm4, %v2474_v53, %v4669_v56  ;;  %v4697_v13 = vsel %vm4942_vm13, %v2516_v33, %v2511_v41  ;;  %v2544_v33 = vld [vmem:[#allocation22 + $0x58] sm:$0xff] }
 0x95f   :  { %2279 = vmatmul.f32.vlgmr.msrb.gmra.mxu0 %v2221_v34 }
 0x960   :  { %2555 = vmatpush.msra.mxu0 %v2546_v61 }
 0x9dc   :  { %v2280_v54 = vpop.f32.mrf.mxu0 }
 0x9dd   :  { %v2281_v49 = vadd.f32 %v2280_v54, %v4940_v40 }
 0x9e1   :  { %v2240_v36 = vpop.f32.mrf.mxu2  ;;  %v2260_v55 = vpop.f32.mrf.mxu3 }
 0x9e2   :  { %v2241_v10 = vadd.f32 %v2240_v36, %v4936_v45  ;;  %v2261_v11 = vadd.f32 %v2260_v55, %v4937_v17  ;;  %v2542_v55 = vld [vmem:[#allocation22 + $0x48] sm:$0xff] }
 0x9e4   :  { %v2283_v5 = vadd.f32 %v2241_v10, %v4943_v29  ;;  %v2284_v9 = vadd.f32 %v2261_v11, %v4944_v51  ;;  %v2541_v11 = vld [vmem:[#allocation22 + $0x40] sm:$0xff] }
 0x9e6   :  { %v2680_v18 = vmul.f32 -1.442695, %v2283_v5  ;;  %v2681_v15 = vmul.f32 -1.442695, %v2284_v9 }
 0x9e8   :  { %2827 = vpow2.f32 %v2680_v18  ;;  %v2540_v18 = vld [vmem:[#allocation22 + $0x38] sm:$0xff] }
 0x9e9   :  { %2829 = vpow2.f32 %v2681_v15 }
 0x9ee   :  { %v2828_v56 = vpop.eup %2827 }
 0x9ef   :  { %v2830_v3 = vpop.eup %2829  ;;  %v2291_v58 = vadd.f32 1.0, %v2828_v56  ;;  %v2539_v56 = vld [vmem:[#allocation22 + $0x30] sm:$0xff] }
 0x9f0   :  { %v2292_v6 = vadd.f32 1.0, %v2830_v3  ;;  %v2538_v3 = vld [vmem:[#allocation22 + $0x28] sm:$0xff] }
 0x9f1   :  { %2831 = vrcp.f32 %v2291_v58  ;;  %v2304_v22 = vand.u32 2147483648, %v2291_v58  ;;  %v2302_v7 = vand.u32 2147483647, %v2291_v58  ;;  %vm2298_vm10 = vweird.f32 %v2291_v58 }
 0x9f2   :  { %2833 = vrcp.f32 %v2292_v6  ;;  %v2319_v25 = vand.u32 2147483648, %v2292_v6  ;;  %vm2313_vm9 = vweird.f32 %v2292_v6  ;;  %v2317_v48 = vand.u32 2147483647, %v2292_v6 }
 0x9f3   :  { %v2305_v20 = vor.u32 1.1754944e-38, %v2304_v22  ;;  %vm2303_vm3 = vcmp.eq.f32.partialorder %v2302_v7, 8.507059e+37 }
 0x9f4   :  { %v2320_v52 = vor.u32 1.1754944e-38, %v2319_v25  ;;  %vm2318_vm11 = vcmp.eq.f32.partialorder %v2317_v48, 8.507059e+37 }
 0x9f7   :  { %v2832_v63 = vpop.eup %2831 }
 0x9f8   :  { %v2834_v27 = vpop.eup %2833  ;;  %v2294_v24 = vmul.f32 %v2832_v63, %v2291_v58  ;;  %vm2299_vm4 = vweird.f32 %v2832_v63 }
 0x9f9   :  { %v2309_v1 = vmul.f32 %v2834_v27, %v2292_v6  ;;  %vm2300_vm14 = vmor %vm2298_vm10, %vm2299_vm4  ;;  %vm2314_vm2 = vweird.f32 %v2834_v27  ;;  %v2537_v6 = vld [vmem:[#allocation22 + $0x20] sm:$0xff] }
 0x9fa   :  { %v2295_v14 = vsub.f32 1.0, %v2294_v24  ;;  %vm2315_vm0 = vmor %vm2313_vm9, %vm2314_vm2  ;;  %v2535_v24 = vld [vmem:[#allocation22 + $0x10] sm:$0xff]  ;;  %vm4947_vm2 = vcmp.eq.s32.totalorder %v4941_v42, 11  ;;  %vm2578_vm9 = vcmask 1043456  }
 0x9fb   :  { %v2310_v21 = vsub.f32 1.0, %v2309_v1  ;;  %v2533_v1 = vld [vmem:[#allocation22] sm:$0xff] }
 0x9fc   :  { %v2296_v16 = vmul.f32 %v2832_v63, %v2295_v14 }
 0x9fd   :  { %v2311_v50 = vmul.f32 %v2834_v27, %v2310_v21 }
 0x9fe   :  { %v2297_v26 = vadd.f32 %v2832_v63, %v2296_v16 }
 0x9ff   :  { %v2312_v30 = vadd.f32 %v2834_v27, %v2311_v50 }
 0xa00   :  { %v2301_v57 = vsel %vm2300_vm14, %v2832_v63, %v2297_v26 }
 0xa01   :  { %v2306_v12 = vsel %vm2303_vm3, %v2305_v20, %v2301_v57  ;;  %v2316_v62 = vsel %vm2315_vm0, %v2834_v27, %v2312_v30 }
 0xa02   :  { %v2323_v31 = vmul.f32 %v2306_v12, %v2281_v49  ;;  %v2321_v23 = vsel %vm2318_vm11, %v2320_v52, %v2316_v62 }
 0xa03   :  { %v2326_v0 = vsub.f32 1.0, %v2321_v23  ;;  %v2328_v32 = vmul.f32 %v2321_v23, %v2221_v34  ;;  %v2545_v34 = vld [vmem:[#allocation22 + $0x60] sm:$0xff] }
 0xa04   :  { %v2324_v37 = vadd.f32 %v2323_v31, %v4945_v46  ;;  %2556 = vmatpush.msra.mxu0 %v2545_v34 }
 0xa06   :  { %2835 = vtanh.f32 %v2324_v37  ;;  %2557 = vmatpush.msra.mxu0 %v2544_v33 }
 0xa0c   :  { %v2836_v39 = vpop.eup %2835 }
 0xa0d   :  { %v2327_v28 = vmul.f32 %v2836_v39, %v2326_v0 }
 0xa0f   :  { %v4705_v38 = vadd.f32 %v2328_v32, %v2327_v28 }
 0xa11   :  { %2346 = vmatmul.f32.vlgmr.msra.gmra.mxu1 %v4705_v38  ;;  %2366 = vmatmul.f32.vlgmr.msra.gmra.mxu2 %v4705_v38  ;;  %v2481_v4 = vperm.slane %v4705_v38, 0  ;;  %v2523_v47 = vperm.slane %v4705_v38, 1  ;;  %v2445_v59 = vrot.slane %v4705_v38, 6 }
 0xa12   :  { %2386 = vmatmul.f32.vlgmr.msra.gmra.mxu3 %v4705_v38 }
 0xa13   :  { %v4715_v8 = vsel %vm348_vm5, %v2481_v4, %v4693_v43  ;;  %v4720_v35 = vsel %vm4946_vm15, %v2523_v47, %v4697_v13  ;;  %v2543_v43 = vld [vmem:[#allocation22 + $0x50] sm:$0xff] }
 0xa14   :  { %2558 = vmatpush.msra.mxu0 %v2543_v43  ;;  %v2495_v43 = vperm.slane %v4536_v19, 1  ;;  %v2704_v19 = vld [vmem:[#allocation23] ss:$0 sm:$0xff] }
 0xa16   :  { %2559 = vmatpush.msra.mxu0 %v2542_v55 }
 0xa18   :  { %2560 = vmatpush.msra.mxu0 %v2541_v11 }
 0xa1a   :  { %2561 = vmatpush.msra.mxu0 %v2540_v18 }
 0xa1c   :  { %2562 = vmatpush.msra.mxu0 %v2539_v56 }
 0xa1e   :  { %2563 = vmatpush.msra.mxu0 %v2538_v3 }
 0xa20   :  { %2564 = vmatpush.msra.mxu0 %v2537_v6 }
 0xa8e   :  { %v2347_v53 = vpop.f32.mrf.mxu1 }
 0xa8f   :  { %v2348_v41 = vadd.f32 %v2347_v53, %v4936_v45 }
 0xa91   :  { %v2392_v36 = vrot.slane %v2348_v41, 6 }
 0xa93   :  { %v2396_v13 = vadd.f32 %v2392_v36, %v4943_v29  ;;  %v2536_v29 = vld [vmem:[#allocation22 + $0x18] sm:$0xff]  ;;  %v2502_v36 = vperm.slane %v4597_v60, 3 }
 0xa94   :  { %v2367_v10 = vpop.f32.mrf.mxu2  ;;  %2565 = vmatpush.msra.mxu0 %v2536_v29 }
 0xa95   :  { %v2682_v5 = vmul.f32 -1.442695, %v2396_v13  ;;  %v2368_v9 = vadd.f32 %v2367_v10, %v4937_v17  ;;  %v2534_v17 = vld [vmem:[#allocation22 + $0x8] sm:$0xff]  ;;  %v2387_v16 = vpop.f32.mrf.mxu3 }
 0xa96   :  { %2566 = vmatpush.msra.mxu0 %v2535_v24  ;;  %v2388_v50 = vadd.f32 %v2387_v16, %v4940_v40 }
 0xa97   :  { %2837 = vpow2.f32 %v2682_v5  ;;  %v2393_v15 = vrot.slane %v2368_v9, 6 }
 0xa98   :  { %2567 = vmatpush.msra.mxu0 %v2534_v17  ;;  %v2437_v48 = vrot.slane %v2388_v50, 6 }
 0xa99   :  { %v2397_v45 = vadd.f32 %v2393_v15, %v4944_v51 }
 0xa9a   :  { %2568 = vmatpush.msra.mxu0 %v2533_v1 }
 0xa9b   :  { %v2683_v58 = vmul.f32 -1.442695, %v2397_v45 }
 0xa9d   :  { %v2838_v63 = vpop.eup %2837  ;;  %2839 = vpow2.f32 %v2683_v58 }
 0xa9e   :  { %v2404_v27 = vadd.f32 1.0, %v2838_v63 }
 0xaa0   :  { %2841 = vrcp.f32 %v2404_v27  ;;  %v2417_v54 = vand.u32 2147483648, %v2404_v27  ;;  %v2415_v20 = vand.u32 2147483647, %v2404_v27  ;;  %vm2411_vm1 = vweird.f32 %v2404_v27 }
 0xaa2   :  { %v2418_v30 = vor.u32 1.1754944e-38, %v2417_v54  ;;  %vm2416_vm13 = vcmp.eq.f32.partialorder %v2415_v20, 8.507059e+37 }
 0xaa3   :  { %v2840_v14 = vpop.eup %2839 }
 0xaa4   :  { %v2405_v22 = vadd.f32 1.0, %v2840_v14 }
 0xaa6   :  { %v2842_v51 = vpop.eup %2841  ;;  %2843 = vrcp.f32 %v2405_v22  ;;  %v2432_v52 = vand.u32 2147483648, %v2405_v22  ;;  %v2430_v0 = vand.u32 2147483647, %v2405_v22  ;;  %vm2426_vm10 = vweird.f32 %v2405_v22 }
 0xaa7   :  { %v2407_v21 = vmul.f32 %v2842_v51, %v2404_v27  ;;  %vm2412_vm5 = vweird.f32 %v2842_v51 }
 0xaa8   :  { %vm2413_vm12 = vmor %vm2411_vm1, %vm2412_vm5  ;;  %v2433_v28 = vor.u32 1.1754944e-38, %v2432_v52  ;;  %vm2431_vm3 = vcmp.eq.f32.partialorder %v2430_v0, 8.507059e+37 }
 0xaa9   :  { %v2408_v7 = vsub.f32 1.0, %v2407_v21 }
 0xaab   :  { %v2409_v26 = vmul.f32 %v2842_v51, %v2408_v7 }
 0xaac   :  { %v2844_v49 = vpop.eup %2843 }
 0xaad   :  { %v2422_v57 = vmul.f32 %v2844_v49, %v2405_v22  ;;  %v2410_v12 = vadd.f32 %v2842_v51, %v2409_v26  ;;  %vm2427_vm4 = vweird.f32 %v2844_v49 }
 0xaae   :  { %vm2428_vm14 = vmor %vm2426_vm10, %vm2427_vm4 }
 0xaaf   :  { %v2423_v31 = vsub.f32 1.0, %v2422_v57  ;;  %v2414_v25 = vsel %vm2413_vm12, %v2842_v51, %v2410_v12 }
 0xab0   :  { %v2419_v37 = vsel %vm2416_vm13, %v2418_v30, %v2414_v25 }
 0xab1   :  { %v2424_v62 = vmul.f32 %v2844_v49, %v2423_v31  ;;  %v2439_v23 = vmul.f32 %v2437_v48, %v2419_v37 }
 0xab3   :  { %v2425_v40 = vadd.f32 %v2844_v49, %v2424_v62  ;;  %v2440_v39 = vadd.f32 %v2439_v23, %v4945_v46 }
 0xab5   :  { %v2429_v32 = vsel %vm2428_vm14, %v2844_v49, %v2425_v40  ;;  %2845 = vtanh.f32 %v2440_v39 }
 0xab6   :  { %v2434_v4 = vsel %vm2431_vm3, %v2433_v28, %v2429_v32 }
 0xab7   :  { %v2442_v47 = vsub.f32 1.0, %v2434_v4  ;;  %v2447_v34 = vmul.f32 %v2445_v59, %v2434_v4 }
 0xabb   :  { %v2846_v2 = vpop.eup %2845 }
 0xabc   :  { %v2443_v61 = vmul.f32 %v2846_v2, %v2442_v47 }
 0xabe   :  { %v2448_v53 = vadd.f32 %v2447_v34, %v2443_v61 }
 0xac0   :  { %v2488_v33 = vperm.slane %v2448_v53, 2  ;;  %v2530_v41 = vperm.slane %v2448_v53, 3 }
 0xac2   :  { %v2489_v46 = vsel %vm353_vm6, %v2488_v33, %v4715_v8  ;;  %v2532_v55 = vsel %vm4947_vm2, %v2530_v41, %v4720_v35 }
 0xac3   :  { %v2496_v38 = vsel %vm358_vm7, %v2495_v43, %v2489_v46 }
 0xac4   :  { %v2503_v13 = vsel %vm363_vm8, %v2502_v36, %v2496_v38 }
 0xac5   :  { %2569 = vmatmul.f32.vlgmr.msra.gmra.mxu0 %v2503_v13 }
 0xacd   :  { %2572 = vmatmul.f32.gmra.mxu0 %v2532_v55 }
 0xb42   :  { %v2570_v10 = vpop.f32.mrf.mxu0 }
 0xb43   :  { %v2571_v60 = vadd.f32 %v2704_v19, %v2570_v10 }
 0xb4a   :  { %v2573_v11 = vpop.f32.mrf.mxu0 }
 0xb4b   :  { %v2574_v5 = vadd.f32 %v2704_v19, %v2573_v11 }
 0xb4d   :  { %v2579_v8 = vsel %vm2578_vm9, %v2574_v5, -inf }
 0xb4e   :  { %2580 = vmax.xlane.f32.xlu0 %v2579_v8 }
 0xb56   :  { %2576 = vmax.xlane.f32.xlu0 %v2571_v60 }
 0xbc1   :  { %v2581_v42 = vpop.xlane.xlu0 %2580 }
 0xbc2   :  { %v2583_v18 = vsub.f32 %v2574_v5, %v2581_v42 }
 0xbc4   :  { %v2586_v44 = vmul.f32 1.442695, %v2583_v18 }
 0xbc9   :  { %v2577_v35 = vpop.xlane.xlu0 %2576 }
 0xbca   :  { %v2582_v9 = vsub.f32 %v2571_v60, %v2577_v35 }
 0xbcc   :  { %v2584_v15 = vmul.f32 1.442695, %v2582_v9 }
 0xbce   :  { %2847 = vpow2.f32 %v2584_v15 }
 0xbcf   :  { %2849 = vpow2.f32 %v2586_v44 }
 0xbd4   :  { %v2848_v56 = vpop.eup %2847 }
 0xbd5   :  { %2588 = vadd.xlane.f32.xlu1 %v2848_v56  ;;  %v2850_v45 = vpop.eup %2849 }
 0xbd6   :  { %v2590_v3 = vsel %vm2578_vm9, %v2850_v45, 0.0 }
 0xbdd   :  { %2591 = vadd.xlane.f32.xlu1 %v2590_v3 }
 0xc48   :  { %v2589_v58 = vpop.xlane.xlu1 %2588 }
 0xc49   :  { %2851 = vlog2.f32 %v2589_v58 }
 0xc4f   :  { %v2852_v6 = vpop.eup %2851 }
 0xc50   :  { %v2594_v29 = vmul.f32 0.6931472, %v2852_v6  ;;  %v2592_v63 = vpop.xlane.xlu1 %2591 }
 0xc51   :  { %2853 = vlog2.f32 %v2592_v63 }
 0xc52   :  { %v2597_v27 = vsub.f32 %v2582_v9, %v2594_v29 }
 0xc54   :  { %2599 = vst [vmem:[%s4765_s16] sm:$0xff] %v2597_v27 }
 0xc57   :  { %v2854_v24 = vpop.eup %2853 }
 0xc58   :  { %v2596_v17 = vmul.f32 0.6931472, %v2854_v24 }
 0xc5a   :  { %v2598_v1 = vsub.f32 %v2583_v18, %v2596_v17 }
 0xc5c   :  { %2600 = vst [vmem:[%s4765_s16 + $0x8] sm:$0xf] %v2598_v1 }
 0xc5d   :  { %2605 = vsyncpa [#allocation3], 1 }
 0xc5e   :  { %2606 = vsyncpa [#allocation9], 1 }
 0xc5f   :  { %2607 = vsyncpa [#allocation12], 1 }
 0xc60   :  { %2608 = vsyncpa [#allocation15], 1 }
 0xc61   :  { %2609 = vsyncpa [#allocation18], 1 }
 0xc62   :  { %2610 = vsyncpa [#allocation21], 1 }
 0xc63   :  { %2611 = vsyncpa [#allocation24], 1 }
 0xc64   :  { %2612 = vsyncpa [#allocation4], 1 }
 0xc65   :  { %2613 = vsyncpa [#allocation6], 1 }

</bundles_post_ra>
